<compile_context>
chip_gen: v6e
topology: v6e:2x2x1
jax: 0.10.0
libtpu: 0.0.40
codegen_flags: <defaults>
</compile_context>

<pallas_src>
import functools

import jax
import jax.numpy as jnp
from jax.experimental import pallas as pl
from jax.experimental.pallas import tpu as pltpu

BN_EPS = 1e-5
LANE = 128


def _round_up(v, m):
    return (v + m - 1) // m * m


def _pick_rows_per_tile(Ho, Wo, target_pixels=2048):
    """Output rows per grid step: TH | Ho, TH*Wo a multiple of 8, ~target pixels/step."""
    if Ho * Wo <= target_pixels:
        return Ho
    for th in range(Ho - 1, 0, -1):
        if Ho % th == 0 and (th * Wo) % 8 == 0 and th * Wo <= target_pixels:
            return th
    return Ho


def _vmem_limit_bytes():
    try:
        cap = int(pltpu.get_tpu_info().vmem_capacity_bytes)
    except Exception:
        cap = 64 * 1024 * 1024          # conservative default (v7x per-TC VMEM)
    # leave headroom for double-buffered I/O blocks and compiler scratch
    return min((cap * 3) // 4, 100 * 1024 * 1024)


# ----------------------------------------------------------------------------
# Kernel: one (image, output-row-band) step.
#   im2col (tap-outer) -> fused (depthwise o 1x1) MXU matmul -> bf16 y block
#   + per-tile BN moment partials (f32, from the f32 accumulator).
# ----------------------------------------------------------------------------
def _dilconv_kernel(x_ref, wf_ref, y_ref, sum_ref, sumsq_ref, col_ref, *,
                    K, de, TH, Wo, C_in):
    TM = TH * Wo
    r0 = pl.multiple_of(pl.program_id(1) * TH, TH)   # first output row of this band

    if Wo % 8 == 0:
        # Tap-outer im2col: K*K whole-plane copies (lane offset t*C_in each).
        for kh in range(K):
            for kw in range(K):
                t = kh * K + kw
                tap = x_ref[0, pl.ds(r0 + kh * de, TH), pl.ds(kw * de, Wo), :]
                # (TH, Wo, C_in) -> (TH*Wo, C_in): collapse in f32 so the sublane
                # merge is tile-aligned for Wo % 8 == 0 (exact bf16 round trip).
                tap = tap.astype(jnp.float32).reshape(TM, C_in)
                col_ref[:, t * C_in:(t + 1) * C_in] = tap.astype(col_ref.dtype)
    else:
        # Sublane-unaligned Wo: row-by-row copies (more, smaller stores) to keep
        # the (TH, Wo, C) -> (TH*Wo, C) collapse off the table entirely.
        def build_row(i, carry):
            for kh in range(K):
                for kw in range(K):
                    t = kh * K + kw
                    col_ref[pl.ds(i * Wo, Wo), t * C_in:(t + 1) * C_in] = (
                        x_ref[0, r0 + i + kh * de, pl.ds(kw * de, Wo), :]
                        .astype(col_ref.dtype))
            return carry
        jax.lax.fori_loop(0, TH, build_row, 0)

    # Depthwise dilated conv + 1x1 conv fused into ONE MXU matmul, f32 accumulation.
    acc = jnp.dot(col_ref[...], wf_ref[...], preferred_element_type=jnp.float32)

    y_ref[0] = acc.astype(y_ref.dtype)                       # bf16, lane-dense
    sum_ref[0, 0] = jnp.sum(acc, axis=0, keepdims=True)      # f32 BN partials
    sumsq_ref[0, 0] = jnp.sum(acc * acc, axis=0, keepdims=True)


@functools.partial(
    jax.jit,
    static_argnames=("kernel_size", "stride", "padding", "dilation", "compute_dtype"))
def dil_conv_forward(x, w_dw, w_pw, gamma, beta, *,
                     kernel_size, stride, padding, dilation,
                     compute_dtype=jnp.bfloat16):
    """DilConv forward: ReLU -> depthwise dilated KxK conv -> 1x1 conv -> BN (batch stats)."""
    N, C_in, H, W = x.shape
    C_out = w_pw.shape[0]
    K = kernel_size
    Ho = (H + 2 * padding - dilation * (K - 1) - 1) // stride + 1
    Wo = (W + 2 * padding - dilation * (K - 1) - 1) // stride + 1
    assert Ho >= 1 and Wo >= 1

    # Present the kernel with an "effective stride 1" problem.  For stride > 1
    # with dilation % stride == 0 (all DARTS reduction-cell DilConvs), decimate
    # the padded input so taps land at dilation de = dilation // stride.
    if stride == 1:
        de = dilation
    elif dilation % stride == 0:
        de = dilation // stride
    else:
        # TODO(synk): stride>1 with dilation % stride != 0 never occurs in DilConv.
        raise NotImplementedError("requires stride == 1 or dilation % stride == 0")
    He = Ho + (K - 1) * de
    We = Wo + (K - 1) * de

    KKC = K * K * C_in
    M = Ho * Wo
    C_out_p = _round_up(C_out, LANE)          # lane-dense y stores
    TH = _pick_rows_per_tile(Ho, Wo)
    MT = Ho // TH
    TM = TH * Wo

    # ReLU + zero pad + bf16 cast (+ decimation), all fused by XLA into the
    # NCHW->NHWC transpose producing the kernel input (no extra HBM round trip).
    x_nhwc = jnp.transpose(x, (0, 2, 3, 1))
    xe = jnp.pad(jnp.maximum(x_nhwc, 0.0).astype(compute_dtype),
                 ((0, 0), (padding, padding), (padding, padding), (0, 0)))
    if stride > 1:
        xe = xe[:, ::stride, ::stride, :]
    xe = xe[:, :He, :We, :]

    # Fused weight: wf[(kh*K + kw)*C_in + c, o] = w_dw[c, kh, kw] * w_pw[o, c],
    # zero-padded to a multiple of 128 output lanes.
    wf = (jnp.transpose(w_dw, (1, 2, 0))[:, :, :, None] *
          jnp.transpose(w_pw, (1, 0))[None, None, :, :]).reshape(KKC, C_out)
    wf = jnp.pad(wf, ((0, 0), (0, C_out_p - C_out))).astype(compute_dtype)

    kernel = functools.partial(_dilconv_kernel, K=K, de=de, TH=TH, Wo=Wo, C_in=C_in)

    cost = pl.CostEstimate(
        flops=2 * N * M * KKC * C_out_p + 4 * N * M * C_out_p,
        transcendentals=0,
        bytes_accessed=(N * He * We * C_in * 2 + KKC * C_out_p * 2
                        + N * M * C_out_p * 2 + 2 * N * MT * C_out_p * 4))

    y, psum, psumsq = pl.pallas_call(
        kernel,
        grid=(N, MT),
        in_specs=[
            # Whole (padded, decimated) image stays VMEM-resident across the m
            # axis (same block index -> no re-DMA); row bands sliced in-kernel.
            pl.BlockSpec((1, He, We, C_in), lambda n, m: (n, 0, 0, 0)),
            pl.BlockSpec((KKC, C_out_p), lambda n, m: (0, 0)),
        ],
        out_specs=(
            pl.BlockSpec((1, TM, C_out_p), lambda n, m: (n, m, 0)),
            pl.BlockSpec((1, 1, 1, C_out_p), lambda n, m: (n, m, 0, 0)),
            pl.BlockSpec((1, 1, 1, C_out_p), lambda n, m: (n, m, 0, 0)),
        ),
        out_shape=(
            jax.ShapeDtypeStruct((N, M, C_out_p), compute_dtype),
            jax.ShapeDtypeStruct((N, MT, 1, C_out_p), jnp.float32),
            jax.ShapeDtypeStruct((N, MT, 1, C_out_p), jnp.float32),
        ),
        # TODO(synk): for C_in >= 128 switch to per-tap MXU accumulation and drop
        # this (TM, K*K*C_in) scratch entirely (further v7x VMEM relief).
        scratch_shapes=[pltpu.VMEM((TM, KKC), compute_dtype)],
        compiler_params=pltpu.CompilerParams(
            dimension_semantics=("parallel", "parallel"),
            vmem_limit_bytes=_vmem_limit_bytes()),
        cost_estimate=cost,
    )(xe, wf)

    # BatchNorm (batch statistics, biased variance) applied as plain JAX so XLA
    # fuses it with the slice / reshape / NHWC->NCHW transpose below.
    count = float(N * M)
    mean = jnp.sum(psum, axis=(0, 1, 2))[:C_out] / count
    ex2 = jnp.sum(psumsq, axis=(0, 1, 2))[:C_out] / count
    # TODO(synk): E[y^2] - mean^2 can cancel when |mean| >> std; fine at BN scale.
    var = jnp.maximum(ex2 - mean * mean, 0.0)
    inv_std = jax.lax.rsqrt(var + BN_EPS)
    scale = gamma * inv_std
    shift = beta - mean * scale

    out = y[:, :, :C_out].astype(jnp.float32) * scale + shift
    out = out.reshape(N, Ho, Wo, C_out)
    return jnp.transpose(out, (0, 3, 1, 2))       # back to NCHW, f32


class DilConvPallas:
    """JAX/Pallas counterpart of DilConv(C_in, C_out, kernel_size, stride, padding, dilation)."""

    def __init__(self, C_in, C_out, kernel_size, stride, padding, dilation,
                 affine=True, *, key):
        self.C_in, self.C_out = C_in, C_out
        self.kernel_size, self.stride = kernel_size, stride
        self.padding, self.dilation = padding, dilation
        k1, k2 = jax.random.split(key)
        # PyTorch depthwise conv weight (C_in, 1, K, K); stored squeezed.
        bound_dw = 1.0 / (kernel_size * kernel_size) ** 0.5
        self.w_dw = jax.random.uniform(
            k1, (C_in, kernel_size, kernel_size), jnp.float32, -bound_dw, bound_dw)
        # PyTorch 1x1 conv weight (C_out, C_in, 1, 1); stored squeezed.
        bound_pw = 1.0 / C_in ** 0.5
        self.w_pw = jax.random.uniform(
            k2, (C_out, C_in), jnp.float32, -bound_pw, bound_pw)
        # BatchNorm2d init: gamma = 1, beta = 0 (affine=False behaves identically).
        self.gamma = jnp.ones((C_out,), jnp.float32)
        self.beta = jnp.zeros((C_out,), jnp.float32)
        # TODO(synk): the PyTorch module's energy/MACs bookkeeping is host-side
        # accounting with no tensor-compute equivalent; not reproduced here.
        # TODO(synk): BN running-stat updates don't affect the forward output.

    def __call__(self, x_nchw):
        return dil_conv_forward(
            x_nchw, self.w_dw, self.w_pw, self.gamma, self.beta,
            kernel_size=self.kernel_size, stride=self.stride,
            padding=self.padding, dilation=self.dilation)


# ----------------------------------------------------------------------------
# Pure-JAX reference (f32, HIGHEST precision) for a sanity check.
# ----------------------------------------------------------------------------
def _reference(x, w_dw, w_pw, gamma, beta, *, kernel_size, stride, padding, dilation):
    C_in = x.shape[1]
    xr = jnp.maximum(x, 0.0)
    z = jax.lax.conv_general_dilated(
        xr, w_dw.reshape(C_in, 1, kernel_size, kernel_size),
        window_strides=(stride, stride),
        padding=[(padding, padding), (padding, padding)],
        rhs_dilation=(dilation, dilation),
        dimension_numbers=("NCHW", "OIHW", "NCHW"),
        feature_group_count=C_in,
        precision=jax.lax.Precision.HIGHEST)
    y = jnp.einsum("nchw,oc->nohw", z, w_pw, precision=jax.lax.Precision.HIGHEST)
    mean = jnp.mean(y, axis=(0, 2, 3), keepdims=True)
    var = jnp.mean((y - mean) ** 2, axis=(0, 2, 3), keepdims=True)
    yhat = (y - mean) * jax.lax.rsqrt(var + BN_EPS)
    return yhat * gamma.reshape(1, -1, 1, 1) + beta.reshape(1, -1, 1, 1)


if __name__ == "__main__":
    key = jax.random.PRNGKey(0)
    k_x, k_p1, k_p2, k_p3 = jax.random.split(key, 4)

    N, C_in, H, W = 2, 4, 16, 16
    x = jax.random.normal(k_x, (N, C_in, H, W), jnp.float32)

    configs = [
        # (C_out, K, stride, padding, dilation, key)
        (4, 3, 1, 2, 2, k_p1),   # DARTS dil_conv_3x3, normal cell
        (8, 5, 1, 4, 2, k_p2),   # DARTS dil_conv_5x5, normal cell
        (8, 3, 2, 2, 2, k_p3),   # DARTS dil_conv_3x3, reduction cell (stride 2)
    ]
    for C_out, K, s, p, d, kk in configs:
        op = DilConvPallas(C_in, C_out, kernel_size=K, stride=s, padding=p,
                           dilation=d, key=kk)
        out = jax.block_until_ready(op(x))
        Ho = (H + 2 * p - d * (K - 1) - 1) // s + 1
        assert out.shape == (N, C_out, Ho, Ho), out.shape
        ref = _reference(x, op.w_dw, op.w_pw, op.gamma, op.beta,
                         kernel_size=K, stride=s, padding=p, dilation=d)
        err = float(jnp.max(jnp.abs(out - ref)))
        # bf16 MXU inputs / bf16 y, f32 accumulation & statistics -> loose tolerance.
        assert jnp.allclose(out, ref, atol=5e-2, rtol=5e-2), (K, s, err)

    print("KERNEL_OK")
</pallas_src>

<mosaic_0001>
module attributes {stable_mosaic.version = 11 : i64} {
  func.func @_dilconv_kernel(%arg0: i32, %arg1: i32, %arg2: memref<1x20x20x4xbf16, #tpu.memory_space<vmem>>, %arg3: memref<36x128xbf16, #tpu.memory_space<vmem>>, %arg4: memref<1x256x128xbf16, #tpu.memory_space<vmem>>, %arg5: memref<1x1x1x128xf32, #tpu.memory_space<vmem>>, %arg6: memref<1x1x1x128xf32, #tpu.memory_space<vmem>>, %arg7: memref<256x36xbf16, #tpu.memory_space<vmem>>) attributes {dimension_semantics = [#tpu.dimension_semantics<parallel>, #tpu.dimension_semantics<parallel>], iteration_bounds = array<i64: 2, 1>, scalar_prefetch = 0 : i64, scratch_operands = 1 : i64, tpu.core_type = #tpu.core_type<tc>, window_params = [{transform_indices = @transform_0, window_bounds = array<i64: 1, 20, 20, 4>}, {pipeline_mode = #tpu.pipeline_mode<synchronous>, transform_indices = @transform_1, window_bounds = array<i64: 36, 128>}, {transform_indices = @transform_2, window_bounds = array<i64: 1, 256, 128>}, {transform_indices = @transform_3, window_bounds = array<i64: 1, 1, 1, 128>}, {transform_indices = @transform_4, window_bounds = array<i64: 1, 1, 1, 128>}]} {
    %c16_i32 = arith.constant 16 : i32
    %0 = arith.muli %arg1, %c16_i32 : i32
    %1 = tpu.assume_multiple %0, 16 : i32
    %c0_i32 = arith.constant 0 : i32
    %2 = arith.addi %1, %c0_i32 : i32
    %c0 = arith.constant 0 : index
    %3 = arith.index_cast %2 : i32 to index
    %c0_0 = arith.constant 0 : index
    %c0_1 = arith.constant 0 : index
    %4 = vector.load %arg2[%c0, %3, %c0_0, %c0_1] : memref<1x20x20x4xbf16, #tpu.memory_space<vmem>>, vector<1x16x16x4xbf16>
    %5 = vector.shape_cast %4 : vector<1x16x16x4xbf16> to vector<16x16x4xbf16>
    %6 = arith.extf %5 : vector<16x16x4xbf16> to vector<16x16x4xf32>
    %7 = vector.shape_cast %6 : vector<16x16x4xf32> to vector<256x4xf32>
    %8 = arith.truncf %7 : vector<256x4xf32> to vector<256x4xbf16>
    %c0_2 = arith.constant 0 : index
    %c0_3 = arith.constant 0 : index
    %9 = vector.load %arg7[%c0_2, %c0_3] : memref<256x36xbf16, #tpu.memory_space<vmem>>, vector<256x4xbf16>
    tpu.vector_store %arg7[%c0_2, %c0_3], %8 {strides = array<i32>} : memref<256x36xbf16, #tpu.memory_space<vmem>>, vector<256x4xbf16>,
    %c0_i32_4 = arith.constant 0 : i32
    %10 = arith.addi %1, %c0_i32_4 : i32
    %c0_5 = arith.constant 0 : index
    %11 = arith.index_cast %10 : i32 to index
    %c2 = arith.constant 2 : index
    %c0_6 = arith.constant 0 : index
    %12 = vector.load %arg2[%c0_5, %11, %c2, %c0_6] : memref<1x20x20x4xbf16, #tpu.memory_space<vmem>>, vector<1x16x16x4xbf16>
    %13 = vector.shape_cast %12 : vector<1x16x16x4xbf16> to vector<16x16x4xbf16>
    %14 = arith.extf %13 : vector<16x16x4xbf16> to vector<16x16x4xf32>
    %15 = vector.shape_cast %14 : vector<16x16x4xf32> to vector<256x4xf32>
    %16 = arith.truncf %15 : vector<256x4xf32> to vector<256x4xbf16>
    %c0_7 = arith.constant 0 : index
    %c4 = arith.constant 4 : index
    %17 = vector.load %arg7[%c0_7, %c4] : memref<256x36xbf16, #tpu.memory_space<vmem>>, vector<256x4xbf16>
    tpu.vector_store %arg7[%c0_7, %c4], %16 {strides = array<i32>} : memref<256x36xbf16, #tpu.memory_space<vmem>>, vector<256x4xbf16>,
    %c0_i32_8 = arith.constant 0 : i32
    %18 = arith.addi %1, %c0_i32_8 : i32
    %c0_9 = arith.constant 0 : index
    %19 = arith.index_cast %18 : i32 to index
    %c4_10 = arith.constant 4 : index
    %c0_11 = arith.constant 0 : index
    %20 = vector.load %arg2[%c0_9, %19, %c4_10, %c0_11] : memref<1x20x20x4xbf16, #tpu.memory_space<vmem>>, vector<1x16x16x4xbf16>
    %21 = vector.shape_cast %20 : vector<1x16x16x4xbf16> to vector<16x16x4xbf16>
    %22 = arith.extf %21 : vector<16x16x4xbf16> to vector<16x16x4xf32>
    %23 = vector.shape_cast %22 : vector<16x16x4xf32> to vector<256x4xf32>
    %24 = arith.truncf %23 : vector<256x4xf32> to vector<256x4xbf16>
    %c0_12 = arith.constant 0 : index
    %c8 = arith.constant 8 : index
    %25 = vector.load %arg7[%c0_12, %c8] : memref<256x36xbf16, #tpu.memory_space<vmem>>, vector<256x4xbf16>
    tpu.vector_store %arg7[%c0_12, %c8], %24 {strides = array<i32>} : memref<256x36xbf16, #tpu.memory_space<vmem>>, vector<256x4xbf16>,
    %c2_i32 = arith.constant 2 : i32
    %26 = arith.addi %1, %c2_i32 : i32
    %c0_13 = arith.constant 0 : index
    %27 = arith.index_cast %26 : i32 to index
    %c0_14 = arith.constant 0 : index
    %c0_15 = arith.constant 0 : index
    %28 = vector.load %arg2[%c0_13, %27, %c0_14, %c0_15] : memref<1x20x20x4xbf16, #tpu.memory_space<vmem>>, vector<1x16x16x4xbf16>
    %29 = vector.shape_cast %28 : vector<1x16x16x4xbf16> to vector<16x16x4xbf16>
    %30 = arith.extf %29 : vector<16x16x4xbf16> to vector<16x16x4xf32>
    %31 = vector.shape_cast %30 : vector<16x16x4xf32> to vector<256x4xf32>
    %32 = arith.truncf %31 : vector<256x4xf32> to vector<256x4xbf16>
    %c0_16 = arith.constant 0 : index
    %c12 = arith.constant 12 : index
    %33 = vector.load %arg7[%c0_16, %c12] : memref<256x36xbf16, #tpu.memory_space<vmem>>, vector<256x4xbf16>
    tpu.vector_store %arg7[%c0_16, %c12], %32 {strides = array<i32>} : memref<256x36xbf16, #tpu.memory_space<vmem>>, vector<256x4xbf16>,
    %c2_i32_17 = arith.constant 2 : i32
    %34 = arith.addi %1, %c2_i32_17 : i32
    %c0_18 = arith.constant 0 : index
    %35 = arith.index_cast %34 : i32 to index
    %c2_19 = arith.constant 2 : index
    %c0_20 = arith.constant 0 : index
    %36 = vector.load %arg2[%c0_18, %35, %c2_19, %c0_20] : memref<1x20x20x4xbf16, #tpu.memory_space<vmem>>, vector<1x16x16x4xbf16>
    %37 = vector.shape_cast %36 : vector<1x16x16x4xbf16> to vector<16x16x4xbf16>
    %38 = arith.extf %37 : vector<16x16x4xbf16> to vector<16x16x4xf32>
    %39 = vector.shape_cast %38 : vector<16x16x4xf32> to vector<256x4xf32>
    %40 = arith.truncf %39 : vector<256x4xf32> to vector<256x4xbf16>
    %c0_21 = arith.constant 0 : index
    %c16 = arith.constant 16 : index
    %41 = vector.load %arg7[%c0_21, %c16] : memref<256x36xbf16, #tpu.memory_space<vmem>>, vector<256x4xbf16>
    tpu.vector_store %arg7[%c0_21, %c16], %40 {strides = array<i32>} : memref<256x36xbf16, #tpu.memory_space<vmem>>, vector<256x4xbf16>,
    %c2_i32_22 = arith.constant 2 : i32
    %42 = arith.addi %1, %c2_i32_22 : i32
    %c0_23 = arith.constant 0 : index
    %43 = arith.index_cast %42 : i32 to index
    %c4_24 = arith.constant 4 : index
    %c0_25 = arith.constant 0 : index
    %44 = vector.load %arg2[%c0_23, %43, %c4_24, %c0_25] : memref<1x20x20x4xbf16, #tpu.memory_space<vmem>>, vector<1x16x16x4xbf16>
    %45 = vector.shape_cast %44 : vector<1x16x16x4xbf16> to vector<16x16x4xbf16>
    %46 = arith.extf %45 : vector<16x16x4xbf16> to vector<16x16x4xf32>
    %47 = vector.shape_cast %46 : vector<16x16x4xf32> to vector<256x4xf32>
    %48 = arith.truncf %47 : vector<256x4xf32> to vector<256x4xbf16>
    %c0_26 = arith.constant 0 : index
    %c20 = arith.constant 20 : index
    %49 = vector.load %arg7[%c0_26, %c20] : memref<256x36xbf16, #tpu.memory_space<vmem>>, vector<256x4xbf16>
    tpu.vector_store %arg7[%c0_26, %c20], %48 {strides = array<i32>} : memref<256x36xbf16, #tpu.memory_space<vmem>>, vector<256x4xbf16>,
    %c4_i32 = arith.constant 4 : i32
    %50 = arith.addi %1, %c4_i32 : i32
    %c0_27 = arith.constant 0 : index
    %51 = arith.index_cast %50 : i32 to index
    %c0_28 = arith.constant 0 : index
    %c0_29 = arith.constant 0 : index
    %52 = vector.load %arg2[%c0_27, %51, %c0_28, %c0_29] : memref<1x20x20x4xbf16, #tpu.memory_space<vmem>>, vector<1x16x16x4xbf16>
    %53 = vector.shape_cast %52 : vector<1x16x16x4xbf16> to vector<16x16x4xbf16>
    %54 = arith.extf %53 : vector<16x16x4xbf16> to vector<16x16x4xf32>
    %55 = vector.shape_cast %54 : vector<16x16x4xf32> to vector<256x4xf32>
    %56 = arith.truncf %55 : vector<256x4xf32> to vector<256x4xbf16>
    %c0_30 = arith.constant 0 : index
    %c24 = arith.constant 24 : index
    %57 = vector.load %arg7[%c0_30, %c24] : memref<256x36xbf16, #tpu.memory_space<vmem>>, vector<256x4xbf16>
    tpu.vector_store %arg7[%c0_30, %c24], %56 {strides = array<i32>} : memref<256x36xbf16, #tpu.memory_space<vmem>>, vector<256x4xbf16>,
    %c4_i32_31 = arith.constant 4 : i32
    %58 = arith.addi %1, %c4_i32_31 : i32
    %c0_32 = arith.constant 0 : index
    %59 = arith.index_cast %58 : i32 to index
    %c2_33 = arith.constant 2 : index
    %c0_34 = arith.constant 0 : index
    %60 = vector.load %arg2[%c0_32, %59, %c2_33, %c0_34] : memref<1x20x20x4xbf16, #tpu.memory_space<vmem>>, vector<1x16x16x4xbf16>
    %61 = vector.shape_cast %60 : vector<1x16x16x4xbf16> to vector<16x16x4xbf16>
    %62 = arith.extf %61 : vector<16x16x4xbf16> to vector<16x16x4xf32>
    %63 = vector.shape_cast %62 : vector<16x16x4xf32> to vector<256x4xf32>
    %64 = arith.truncf %63 : vector<256x4xf32> to vector<256x4xbf16>
    %c0_35 = arith.constant 0 : index
    %c28 = arith.constant 28 : index
    %65 = vector.load %arg7[%c0_35, %c28] : memref<256x36xbf16, #tpu.memory_space<vmem>>, vector<256x4xbf16>
    tpu.vector_store %arg7[%c0_35, %c28], %64 {strides = array<i32>} : memref<256x36xbf16, #tpu.memory_space<vmem>>, vector<256x4xbf16>,
    %c4_i32_36 = arith.constant 4 : i32
    %66 = arith.addi %1, %c4_i32_36 : i32
    %c0_37 = arith.constant 0 : index
    %67 = arith.index_cast %66 : i32 to index
    %c4_38 = arith.constant 4 : index
    %c0_39 = arith.constant 0 : index
    %68 = vector.load %arg2[%c0_37, %67, %c4_38, %c0_39] : memref<1x20x20x4xbf16, #tpu.memory_space<vmem>>, vector<1x16x16x4xbf16>
    %69 = vector.shape_cast %68 : vector<1x16x16x4xbf16> to vector<16x16x4xbf16>
    %70 = arith.extf %69 : vector<16x16x4xbf16> to vector<16x16x4xf32>
    %71 = vector.shape_cast %70 : vector<16x16x4xf32> to vector<256x4xf32>
    %72 = arith.truncf %71 : vector<256x4xf32> to vector<256x4xbf16>
    %c0_40 = arith.constant 0 : index
    %c32 = arith.constant 32 : index
    %73 = vector.load %arg7[%c0_40, %c32] : memref<256x36xbf16, #tpu.memory_space<vmem>>, vector<256x4xbf16>
    tpu.vector_store %arg7[%c0_40, %c32], %72 {strides = array<i32>} : memref<256x36xbf16, #tpu.memory_space<vmem>>, vector<256x4xbf16>,
    %c0_41 = arith.constant 0 : index
    %c0_42 = arith.constant 0 : index
    %74 = vector.load %arg7[%c0_41, %c0_42] : memref<256x36xbf16, #tpu.memory_space<vmem>>, vector<256x36xbf16>
    %c0_43 = arith.constant 0 : index
    %c0_44 = arith.constant 0 : index
    %75 = vector.load %arg3[%c0_43, %c0_44] : memref<36x128xbf16, #tpu.memory_space<vmem>>, vector<36x128xbf16>
    %cst = arith.constant dense<0.000000e+00> : vector<256x128xf32>
    %76 = tpu.matmul %74, %75, %cst {dimension_numbers = #tpu.dot_dimension_numbers<[1], [0], [0], [1], [0, 0, 1, 1], [], []>} : vector<256x36xbf16>, vector<36x128xbf16>, vector<256x128xf32> -> vector<256x128xf32>
    %77 = arith.truncf %76 : vector<256x128xf32> to vector<256x128xbf16>
    %c0_45 = arith.constant 0 : index
    %c0_46 = arith.constant 0 : index
    %c0_47 = arith.constant 0 : index
    %78 = vector.load %arg4[%c0_45, %c0_46, %c0_47] : memref<1x256x128xbf16, #tpu.memory_space<vmem>>, vector<1x256x128xbf16>
    %79 = vector.shape_cast %78 : vector<1x256x128xbf16> to vector<256x128xbf16>
    %80 = vector.shape_cast %77 : vector<256x128xbf16> to vector<1x256x128xbf16>
    tpu.vector_store %arg4[%c0_45, %c0_46, %c0_47], %80 {strides = array<i32>} : memref<1x256x128xbf16, #tpu.memory_space<vmem>>, vector<1x256x128xbf16>,
    %cst_48 = arith.constant dense<0.000000e+00> : vector<128xf32>
    %81 = vector.multi_reduction <add>, %76, %cst_48 [0] : vector<256x128xf32> to vector<128xf32>
    %82 = vector.shape_cast %81 : vector<128xf32> to vector<1x128xf32>
    %c0_49 = arith.constant 0 : index
    %c0_50 = arith.constant 0 : index
    %c0_51 = arith.constant 0 : index
    %c0_52 = arith.constant 0 : index
    %83 = vector.load %arg5[%c0_49, %c0_50, %c0_51, %c0_52] : memref<1x1x1x128xf32, #tpu.memory_space<vmem>>, vector<1x1x1x128xf32>
    %84 = vector.shape_cast %83 : vector<1x1x1x128xf32> to vector<1x128xf32>
    %85 = vector.shape_cast %82 : vector<1x128xf32> to vector<1x1x1x128xf32>
    tpu.vector_store %arg5[%c0_49, %c0_50, %c0_51, %c0_52], %85 {strides = array<i32>} : memref<1x1x1x128xf32, #tpu.memory_space<vmem>>, vector<1x1x1x128xf32>,
    %86 = arith.mulf %76, %76 : vector<256x128xf32>
    %cst_53 = arith.constant dense<0.000000e+00> : vector<128xf32>
    %87 = vector.multi_reduction <add>, %86, %cst_53 [0] : vector<256x128xf32> to vector<128xf32>
    %88 = vector.shape_cast %87 : vector<128xf32> to vector<1x128xf32>
    %c0_54 = arith.constant 0 : index
    %c0_55 = arith.constant 0 : index
    %c0_56 = arith.constant 0 : index
    %c0_57 = arith.constant 0 : index
    %89 = vector.load %arg6[%c0_54, %c0_55, %c0_56, %c0_57] : memref<1x1x1x128xf32, #tpu.memory_space<vmem>>, vector<1x1x1x128xf32>
    %90 = vector.shape_cast %89 : vector<1x1x1x128xf32> to vector<1x128xf32>
    %91 = vector.shape_cast %88 : vector<1x128xf32> to vector<1x1x1x128xf32>
    tpu.vector_store %arg6[%c0_54, %c0_55, %c0_56, %c0_57], %91 {strides = array<i32>} : memref<1x1x1x128xf32, #tpu.memory_space<vmem>>, vector<1x1x1x128xf32>,
    return
  }
  func.func @transform_0(%arg0: i32, %arg1: i32) -> (i32, i32, i32, i32) {
    %c0_i32 = arith.constant 0 : i32
    %c0_i32_0 = arith.constant 0 : i32
    %c0_i32_1 = arith.constant 0 : i32
    %c0_i32_2 = arith.constant 0 : i32
    return %arg0, %c0_i32, %c0_i32_0, %c0_i32_1 : i32, i32, i32, i32
  }
  func.func @transform_1(%arg0: i32, %arg1: i32) -> (i32, i32) {
    %c0_i32 = arith.constant 0 : i32
    %c0_i32_0 = arith.constant 0 : i32
    %c0_i32_1 = arith.constant 0 : i32
    return %c0_i32, %c0_i32_0 : i32, i32
  }
  func.func @transform_2(%arg0: i32, %arg1: i32) -> (i32, i32, i32) {
    %c0_i32 = arith.constant 0 : i32
    %c0_i32_0 = arith.constant 0 : i32
    return %arg0, %arg1, %c0_i32 : i32, i32, i32
  }
  func.func @transform_3(%arg0: i32, %arg1: i32) -> (i32, i32, i32, i32) {
    %c0_i32 = arith.constant 0 : i32
    %c0_i32_0 = arith.constant 0 : i32
    %c0_i32_1 = arith.constant 0 : i32
    return %arg0, %arg1, %c0_i32, %c0_i32_0 : i32, i32, i32, i32
  }
  func.func @transform_4(%arg0: i32, %arg1: i32) -> (i32, i32, i32, i32) {
    %c0_i32 = arith.constant 0 : i32
    %c0_i32_0 = arith.constant 0 : i32
    %c0_i32_1 = arith.constant 0 : i32
    return %arg0, %arg1, %c0_i32, %c0_i32_0 : i32, i32, i32, i32
  }
}

</mosaic_0001>

<bundles_post_ra>
// kernel: dil_conv_forward.1
= control target key start
LH: loop header
LB: loop body
LE: loop exit
PB: predicated region body
PF: predicated region fallthrough
CT: control target
= control target key end

     0   :  { %s6088_s15 = smov 0   ;;  %s6090_s16 = smov 0   ;;  %s7258_s0 = inlined_call_operand.vmem [shape: bf16[2,20,20,4], index: 0, kind: input, shape index: {}]   ;;  %s7259_s1 = inlined_call_operand.vmem [shape: bf16[36,128], index: 1, kind: input, shape index: {}]   ;;  %s7260_s2 = inlined_call_operand.vmem [shape: bf16[2,256,128], index: 2, kind: output, shape index: {0}]   ;;  %s7261_s3 = inlined_call_operand.vmem [shape: f32[2,1,1,128], index: 3, kind: output, shape index: {1}]   ;;  %s7262_s4 = inlined_call_operand.vmem [shape: f32[2,1,1,128], index: 4, kind: output, shape index: {2}]  }
   0x1   :  { %s6092_s17 = smov 0  }
   0x2 LB: > { %s27_s18 = sadd.s32 1, %s6049_s16  ;;  %p4737_p0 = scmp.ge.s32.totalorder %s6053_s17, 1  ;;  %s6053_s17 = sphi %s6092_s17, %s15_s17   ;;  %s6049_s16 = sphi %s6090_s16, %s7264_s16   ;;  %s6045_s15 = sphi %s6088_s15, %s7263_s15  }
   0x3   : > { %p29_p1 = scmp.ge.s32.totalorder %s27_s18, 2  ;;  %p185_p2 = scmp.lt.s32.totalorder %s6053_s17, 3 }
   0x5   : > { %s7266_s18 = smov (%p29_p1, %s27_s18), 0  ;;  %p186_p3 = pnand %p4737_p0, %p185_p2 }
   0x6   : > { %p227_p4 = scmp.lt.s32.totalorder (!%p186_p3), %s6045_s15, 1  ;;  %s6055_s23 = smov (!%p186_p3), 4  }
   0x7   : > { %189 = sbr.rel (%p186_p3) target bundleno = 876 (0x36c), region = 28  ;;  %s6056_s24 = smov (!%p186_p3), 8  }
   0x8   : > { %s6057_s25 = smov (!%p186_p3), 12   ;;  %s6058_s26 = smov (!%p186_p3), 16  }
   0x9   : > { %s6059_s27 = smov (!%p186_p3), 20   ;;  %s6060_s28 = smov (!%p186_p3), 24  }
   0xa   : > { %s6061_s7 = smov (!%p186_p3), 28   ;;  %s6062_s10 = smov (!%p186_p3), 32  }
   0xc   : > { %s7268_s15 = smov (!%p227_p4, %s6045_s15), 1  ;;  %vm628_vm0 = vcmask 1045504   ;;  %vm451_vm1 = vcmask 27648   ;;  %vm1110_vm2 = vcmask 1043456   ;;  %vm933_vm3 = vcmask 60448  }
   0xd   : > { %s5883_s19 = smul.u32 240, %s7268_s15  ;;  %vm1415_vm4 = vcmask 93248   ;;  %vm4139_vm5 = vcmask 1041408   ;;  %vm1708_vm6 = vcmask 126048   ;;  %vm2189_vm7 = vcmask 158848   ;;  %s5402_s11 = sshll.u32 %s7268_s15, 7 }
   0xe   : > { %vm2670_vm8 = vcmask 191648   ;;  %vm2963_vm9 = vcmask 224448   ;;  %vm3444_vm10 = vcmask 257248   ;;  %vm3925_vm11 = vcmask 290048   ;;  %s7165_s14 = scalar_lea.vmem %s7260_s2, %s5402_s11  ;;  %s247_s21 = scalar_lea.vmem %s7261_s3, %s7268_s15 }
   0xf   : > { %s6112_s22 = scalar_lea.vmem %s7258_s0, %s5883_s19  ;;  %vm4090_vm12 = vcmask 293888  }
  0x10   : > { %v487_v0 = vld [vmem:[%s6112_s22 + $0xc] sm:$0xe]  ;;  %v488_v1 = vld [vmem:[%s6112_s22 + $0x4] ss:$12 sps:$4 sm:$0xff]   ;;  %v484_v2 = vld [vmem:[%s6112_s22] sm:$0xe] }
  0x11   : > { %v535_v3 = vunpack.c.l.bf16 %v487_v0  ;;  %v536_v4 = vunpack.c.h.bf16 %v488_v1  ;;  %v532_v5 = vunpack.c.l.bf16 %v484_v2  ;;  %v533_v6 = vunpack.c.l.bf16 %v488_v1  ;;  %v489_v7 = vld [vmem:[%s6112_s22 + $0x14] sm:$0x1]  ;;  %v486_v8 = vld [vmem:[%s6112_s22 + $0x8] sm:$0x1]  ;;  %v492_v12 = vld [vmem:[%s6112_s22 + $0x20] sm:$0x1] }
  0x12   : > { %v491_v9 = vld [vmem:[%s6112_s22 + $0x1c] ss:$12 sps:$4 sm:$0xff]   ;;  %v537_v10 = vunpack.c.l.bf16 %v489_v7  ;;  %v534_v11 = vunpack.c.l.bf16 %v486_v8  ;;  %v490_v14 = vld [vmem:[%s6112_s22 + $0x18] sm:$0xe]  ;;  %v495_v15 = vld [vmem:[%s6112_s22 + $0x2c] sm:$0x1]  ;;  %v540_v23 = vunpack.c.l.bf16 %v492_v12 }
  0x13   : > { %v539_v13 = vunpack.c.l.bf16 %v491_v9  ;;  %v542_v16 = vunpack.c.h.bf16 %v491_v9  ;;  %v634_v17 = vrot.slane %v535_v3, 2  ;;  %v635_v18 = vrot.slane %v536_v4, 2  ;;  %v493_v29 = vld [vmem:[%s6112_s22 + $0x24] sm:$0xe]  ;;  %v497_v30 = vld [vmem:[%s6112_s22 + $0x34] ss:$12 sps:$4 sm:$0xff]  }
  0x14   : > { %v629_v19 = vrot.slane %v532_v5, 2  ;;  %v630_v20 = vrot.slane %v533_v6, 2  ;;  %v637_v21 = vrot.slane %v537_v10, 2  ;;  %v632_v22 = vrot.slane %v534_v11, 2  ;;  %v498_v35 = vld [vmem:[%s6112_s22 + $0x38] sm:$0x1] }
  0x15   : > { %v640_v24 = vrot.slane %v539_v13, 2  ;;  %v636_v25 = vsel %vm628_vm0, %v634_v17, %v635_v18  ;;  %v538_v27 = vunpack.c.l.bf16 %v490_v14  ;;  %v543_v28 = vunpack.c.l.bf16 %v495_v15  ;;  %v496_v36 = vld [vmem:[%s6112_s22 + $0x30] sm:$0xe]  ;;  %v501_v49 = vld [vmem:[%s6112_s22 + $0x44] sm:$0x1] }
  0x16   : > { %v631_v26 = vsel %vm628_vm0, %v629_v19, %v630_v20  ;;  %v5437_v31 = vpack.c.bf16 %v636_v25, %v636_v25  ;;  %v638_v33 = vsel %vm628_vm0, %v635_v18, %v637_v21  ;;  %v633_v34 = vsel %vm628_vm0, %v630_v20, %v632_v22  ;;  %v499_v50 = vld [vmem:[%s6112_s22 + $0x3c] sm:$0xe]  ;;  %v503_v62 = vld [vmem:[%s6112_s22 + $0x4c] ss:$12 sps:$4 sm:$0xff]   ;;  %v504_v63 = vld [vmem:[%s6112_s22 + $0x50] sm:$0x1] }
  0x17   : > { %v5435_v32 = vpack.c.bf16 %v631_v26, %v631_v26  ;;  %v5438_v37 = vpack.c.bf16 %v638_v33, %v638_v33  ;;  %v5436_v38 = vpack.c.bf16 %v633_v34, %v633_v34  ;;  %v642_v39 = vrot.slane %v540_v23, 2  ;;  %v502_v0 = vld [vmem:[%s6112_s22 + $0x48] sm:$0xe]  ;;  %v507_v11 = vld [vmem:[%s6112_s22 + $0x5c] sm:$0x1] }
  0x18   : > { %v639_v40 = vrot.slane %v538_v27, 2  ;;  %841 = vrot.lane.b32.xlu1 %v5437_v31, %s6055_s23  ;;  %v645_v41 = vrot.slane %v542_v16, 2  ;;  %v647_v42 = vrot.slane %v543_v28, 2  ;;  %v541_v43 = vunpack.c.l.bf16 %v493_v29  ;;  %v505_v12 = vld [vmem:[%s6112_s22 + $0x54] sm:$0xe] }
  0x19   : > { %837 = vrot.lane.b32.xlu0 %v5435_v32, %s6055_s23  ;;  %v545_v44 = vunpack.c.l.bf16 %v497_v30  ;;  %v643_v45 = vsel %vm628_vm0, %v640_v24, %v642_v39  ;;  %v546_v47 = vunpack.c.l.bf16 %v498_v35  ;;  %v544_v48 = vunpack.c.l.bf16 %v496_v36  ;;  %v509_v23 = vld [vmem:[%s6112_s22 + $0x64] ss:$12 sps:$4 sm:$0xff]   ;;  %v508_v26 = vld [vmem:[%s6112_s22 + $0x60] sm:$0xe]  ;;  %v513_v36 = vld [vmem:[%s6112_s22 + $0x74] sm:$0x1] }
  0x1a   : > { %v641_v46 = vsel %vm628_vm0, %v639_v40, %v640_v24  ;;  %v5440_v51 = vpack.c.bf16 %v643_v45, %v643_v45  ;;  %v644_v53 = vrot.slane %v541_v43, 2  ;;  %v648_v54 = vsel %vm628_vm0, %v645_v41, %v647_v42  ;;  %v510_v24 = vld [vmem:[%s6112_s22 + $0x68] sm:$0x1] }
  0x1b   : > { %v5439_v52 = vpack.c.bf16 %v641_v46, %v641_v46  ;;  %v650_v55 = vrot.slane %v545_v44, 2  ;;  %v652_v56 = vrot.slane %v546_v47, 2  ;;  %v649_v57 = vrot.slane %v544_v48, 2  ;;  %v515_v48 = vld [vmem:[%s6112_s22 + $0x7c] ss:$12 sps:$4 sm:$0xff]  }
  0x1c   : > { %843 = vrot.lane.b32.xlu1 %v5438_v37, %s6055_s23  ;;  %v646_v58 = vsel %vm628_vm0, %v644_v53, %v645_v41  ;;  %v548_v59 = vunpack.c.h.bf16 %v497_v30  ;;  %v549_v60 = vunpack.c.l.bf16 %v501_v49  ;;  %v547_v61 = vunpack.c.l.bf16 %v499_v50  ;;  %v511_v37 = vld [vmem:[%s6112_s22 + $0x6c] sm:$0xe]  ;;  %v516_v49 = vld [vmem:[%s6112_s22 + $0x80] sm:$0x1]  ;;  %v514_v50 = vld [vmem:[%s6112_s22 + $0x78] sm:$0xe] }
  0x1d   : > { %839 = vrot.lane.b32.xlu0 %v5436_v38, %s6055_s23  ;;  %v5442_v1 = vpack.c.bf16 %v648_v54, %v648_v54  ;;  %v5441_v2 = vpack.c.bf16 %v646_v58, %v646_v58  ;;  %v653_v3 = vsel %vm628_vm0, %v650_v55, %v652_v56  ;;  %v651_v4 = vsel %vm628_vm0, %v649_v57, %v650_v55  ;;  %v519_v57 = vld [vmem:[%s6112_s22 + $0x8c] sm:$0x1]  ;;  %v517_v58 = vld [vmem:[%s6112_s22 + $0x84] sm:$0xe] }
  0x1e   : > { %v655_v5 = vrot.slane %v548_v59, 2  ;;  %v657_v6 = vrot.slane %v549_v60, 2  ;;  %v654_v7 = vrot.slane %v547_v61, 2  ;;  %v551_v8 = vunpack.c.l.bf16 %v503_v62 }
  0x1f   : > { %v552_v9 = vunpack.c.l.bf16 %v504_v63  ;;  %v550_v10 = vunpack.c.l.bf16 %v502_v0  ;;  %v5444_v13 = vpack.c.bf16 %v653_v3, %v653_v3  ;;  %v5443_v14 = vpack.c.bf16 %v651_v4, %v651_v4  ;;  %v5916_v63 = vld [vmem:[%s6112_s22 + $0xc] ss:$0 sps:$4 sm:$0xff]   ;;  %v5917_v0 = vld [vmem:[%s6112_s22] ss:$0 sps:$4 sm:$0xff]   ;;  %v522_v4 = vld [vmem:[%s6112_s22 + $0x98] sm:$0x1] }
  0x20   : > { %847 = vrot.lane.b32.xlu1 %v5440_v51, %s6055_s23  ;;  %v658_v15 = vsel %vm628_vm0, %v655_v5, %v657_v6  ;;  %v554_v16 = vunpack.c.h.bf16 %v503_v62  ;;  %v555_v17 = vunpack.c.l.bf16 %v507_v11  ;;  %v553_v18 = vunpack.c.l.bf16 %v505_v12  ;;  %v521_v3 = vld [vmem:[%s6112_s22 + $0x94] ss:$12 sps:$4 sm:$0xff]   ;;  %454 = vst.msk [vmem:[#allocation2 + $0x8] sm:$0xf] %vm451_vm1, %v5916_v63  ;;  %452 = vst.msk [vmem:[#allocation2] sm:$0xf] %vm451_vm1, %v5917_v0 }
  0x21   : > { %845 = vrot.lane.b32.xlu0 %v5439_v52, %s6055_s23  ;;  %v656_v19 = vsel %vm628_vm0, %v654_v7, %v655_v5  ;;  %v660_v20 = vrot.slane %v551_v8, 2  ;;  %v662_v21 = vrot.slane %v552_v9, 2  ;;  %v659_v22 = vrot.slane %v550_v10, 2  ;;  %v520_v9 = vld [vmem:[%s6112_s22 + $0x90] sm:$0xe] }
  0x22   : > { %v5446_v25 = vpack.c.bf16 %v658_v15, %v658_v15  ;;  %v5445_v27 = vpack.c.bf16 %v656_v19, %v656_v19  ;;  %v665_v28 = vrot.slane %v554_v16, 2  ;;  %v667_v29 = vrot.slane %v555_v17, 2  ;;  %v5918_v10 = vld [vmem:[%s6112_s22 + $0x10] ss:$0 sps:$4 sm:$0xff]   ;;  %v5919_v15 = vld [vmem:[%s6112_s22 + $0x4] ss:$0 sps:$4 sm:$0xff]  }
  0x23   : > { %v664_v30 = vrot.slane %v553_v18, 2  ;;  %v663_v31 = vsel %vm628_vm0, %v660_v20, %v662_v21  ;;  %v661_v32 = vsel %vm628_vm0, %v659_v22, %v660_v20  ;;  %v557_v33 = vunpack.c.l.bf16 %v509_v23  ;;  %455 = vst.msk [vmem:[#allocation2 + $0xc] sm:$0xf] %vm451_vm1, %v5918_v10  ;;  %453 = vst.msk [vmem:[#allocation2 + $0x4] sm:$0xf] %vm451_vm1, %v5919_v15 }
  0x24   : > { %851 = vrot.lane.b32.xlu1 %v5442_v1, %s6055_s23  ;;  %v558_v34 = vunpack.c.l.bf16 %v510_v24  ;;  %v556_v35 = vunpack.c.l.bf16 %v508_v26  ;;  %v5448_v38 = vpack.c.bf16 %v663_v31, %v663_v31  ;;  %v5447_v39 = vpack.c.bf16 %v661_v32, %v661_v32  ;;  %v5920_v20 = vld [vmem:[%s6112_s22 + $0x1c] ss:$0 sps:$4 sm:$0xff]   ;;  %v5921_v26 = vld [vmem:[%s6112_s22 + $0x18] ss:$0 sps:$4 sm:$0xff]   ;;  %v523_v31 = vld [vmem:[%s6112_s22 + $0x9c] sm:$0xe] }
  0x25   : > { %849 = vrot.lane.b32.xlu0 %v5441_v2, %s6055_s23  ;;  %v668_v40 = vsel %vm628_vm0, %v665_v28, %v667_v29  ;;  %v666_v41 = vsel %vm628_vm0, %v664_v30, %v665_v28  ;;  %v670_v42 = vrot.slane %v557_v33, 2  ;;  %v560_v44 = vunpack.c.h.bf16 %v509_v23  ;;  %457 = vst.msk [vmem:[#allocation2 + $0x14] sm:$0xf] %vm451_vm1, %v5920_v20  ;;  %v5922_v29 = vld [vmem:[%s6112_s22 + $0x28] ss:$0 sps:$4 sm:$0xff]  }
  0x26   : > { %v672_v43 = vrot.slane %v558_v34, 2  ;;  %v669_v45 = vrot.slane %v556_v35, 2  ;;  %v561_v46 = vunpack.c.l.bf16 %v513_v36  ;;  %v559_v47 = vunpack.c.l.bf16 %v511_v37  ;;  %456 = vst.msk [vmem:[#allocation2 + $0x10] sm:$0xf] %vm451_vm1, %v5921_v26  ;;  %v5923_v32 = vld [vmem:[%s6112_s22 + $0x24] ss:$0 sps:$4 sm:$0xff]  }
  0x27   : > { %v5450_v51 = vpack.c.bf16 %v668_v40, %v668_v40  ;;  %v5449_v52 = vpack.c.bf16 %v666_v41, %v666_v41  ;;  %v675_v54 = vrot.slane %v560_v44, 2  ;;  %v563_v55 = vunpack.c.l.bf16 %v515_v48  ;;  %v527_v37 = vld [vmem:[%s6112_s22 + $0xac] ss:$12 sps:$4 sm:$0xff]   ;;  %459 = vst.msk [vmem:[#allocation2 + $0x1c] sm:$0xf] %vm451_vm1, %v5922_v29 }
  0x28   : > { %855 = vrot.lane.b32.xlu1 %v5444_v13, %s6055_s23  ;;  %v673_v53 = vsel %vm628_vm0, %v670_v42, %v672_v43  ;;  %v564_v56 = vunpack.c.l.bf16 %v516_v49  ;;  %v671_v59 = vsel %vm628_vm0, %v669_v45, %v670_v42  ;;  %v677_v60 = vrot.slane %v561_v46, 2  ;;  %v528_v42 = vld [vmem:[%s6112_s22 + $0xb0] sm:$0x1]  ;;  %458 = vst.msk [vmem:[#allocation2 + $0x18] sm:$0xf] %vm451_vm1, %v5923_v32 }
  0x29   : > { %853 = vrot.lane.b32.xlu0 %v5443_v14, %s6055_s23  ;;  %v674_v61 = vrot.slane %v559_v47, 2  ;;  %v562_v62 = vunpack.c.l.bf16 %v514_v50  ;;  %v566_v1 = vunpack.c.h.bf16 %v515_v48  ;;  %v567_v2 = vunpack.c.l.bf16 %v519_v57  ;;  %v526_v44 = vld [vmem:[%s6112_s22 + $0xa8] sm:$0xe]  ;;  %v5926_v45 = vld [vmem:[%s6112_s22 + $0x34] ss:$0 sps:$4 sm:$0xff]  }
  0x2a   : > { %v5452_v5 = vpack.c.bf16 %v673_v53, %v673_v53  ;;  %v5451_v6 = vpack.c.bf16 %v671_v59, %v671_v59  ;;  %v680_v7 = vrot.slane %v563_v55, 2  ;;  %v565_v8 = vunpack.c.l.bf16 %v517_v58  ;;  %v5927_v47 = vld [vmem:[%s6112_s22 + $0x30] ss:$0 sps:$4 sm:$0xff]   ;;  %461 = vst.msk [vmem:[#allocation2 + $0x24] sm:$0xf] %vm451_vm1, %v5926_v45 }
  0x2b   : > { %v678_v11 = vsel %vm628_vm0, %v675_v54, %v677_v60  ;;  %v676_v12 = vsel %vm628_vm0, %v674_v61, %v675_v54  ;;  %v682_v13 = vrot.slane %v564_v56, 2  ;;  %v679_v14 = vrot.slane %v562_v62, 2  ;;  %v531_v56 = vld [vmem:[%s6112_s22 + $0xbc] sm:$0x1]  ;;  %460 = vst.msk [vmem:[#allocation2 + $0x20] sm:$0xf] %vm451_vm1, %v5927_v47 }
  0x2c   : > { %859 = vrot.lane.b32.xlu1 %v5446_v25, %s6055_s23  ;;  %v685_v16 = vrot.slane %v566_v1, 2  ;;  %v687_v17 = vrot.slane %v567_v2, 2  ;;  %v569_v18 = vunpack.c.l.bf16 %v521_v3  ;;  %v570_v19 = vunpack.c.l.bf16 %v522_v4  ;;  %v525_v25 = vld [vmem:[%s6112_s22 + $0xa4] sm:$0x1]  ;;  %v529_v58 = vld [vmem:[%s6112_s22 + $0xb4] sm:$0xe] }
  0x2d   : > { %857 = vrot.lane.b32.xlu0 %v5445_v27, %s6055_s23  ;;  %v5454_v21 = vpack.c.bf16 %v678_v11, %v678_v11  ;;  %v5453_v22 = vpack.c.bf16 %v676_v12, %v676_v12  ;;  %v684_v23 = vrot.slane %v565_v8, 2  ;;  %v568_v24 = vunpack.c.l.bf16 %v520_v9  ;;  %v5930_v59 = vld [vmem:[%s6112_s22 + $0x40] ss:$0 sps:$4 sm:$0xff]   ;;  %v967_v1 = vld [vmem:[%s6112_s22 + $0x4] ss:$12 sps:$4 sm:$0xff]  }
  0x2e   : > { %v683_v27 = vsel %vm628_vm0, %v680_v7, %v682_v13  ;;  %v681_v28 = vsel %vm628_vm0, %v679_v14, %v680_v7  ;;  %v572_v30 = vunpack.c.h.bf16 %v521_v3  ;;  %v688_v33 = vsel %vm628_vm0, %v685_v16, %v687_v17  ;;  %463 = vst.msk [vmem:[#allocation2 + $0x2c] sm:$0xf] %vm451_vm1, %v5930_v59  ;;  %v5931_v2 = vld [vmem:[%s6112_s22 + $0x3c] ss:$0 sps:$4 sm:$0xff]   ;;  %v968_v8 = vld [vmem:[%s6112_s22 + $0x8] sm:$0x3] }
  0x2f   : > { %v690_v34 = vrot.slane %v569_v18, 2  ;;  %v692_v35 = vrot.slane %v570_v19, 2  ;;  %v573_v36 = vunpack.c.l.bf16 %v525_v25  ;;  %v686_v40 = vsel %vm628_vm0, %v684_v23, %v685_v16  ;;  %462 = vst.msk [vmem:[#allocation2 + $0x28] sm:$0xf] %vm451_vm1, %v5931_v2  ;;  %v5934_v9 = vld [vmem:[%s6112_s22 + $0x4c] ss:$0 sps:$4 sm:$0xff]  }
  0x30   : > { %863 = vrot.lane.b32.xlu1 %v5448_v38, %s6055_s23  ;;  %v5456_v38 = vpack.c.bf16 %v683_v27, %v683_v27  ;;  %v689_v41 = vrot.slane %v568_v24, 2  ;;  %v571_v43 = vunpack.c.l.bf16 %v523_v31  ;;  %v5458_v46 = vpack.c.bf16 %v688_v33, %v688_v33  ;;  %v966_v10 = vld [vmem:[%s6112_s22] sm:$0xc]  ;;  %v5935_v11 = vld [vmem:[%s6112_s22 + $0x48] ss:$0 sps:$4 sm:$0xff]  }
  0x31   : > { %861 = vrot.lane.b32.xlu0 %v5447_v39, %s6055_s23  ;;  %v5455_v39 = vpack.c.bf16 %v681_v28, %v681_v28  ;;  %v5457_v48 = vpack.c.bf16 %v686_v40, %v686_v40  ;;  %v693_v49 = vsel %vm628_vm0, %v690_v34, %v692_v35  ;;  %v695_v50 = vrot.slane %v572_v30, 2  ;;  %465 = vst.msk [vmem:[#allocation2 + $0x34] sm:$0xf] %vm451_vm1, %v5934_v9  ;;  %v971_v20 = vld [vmem:[%s6112_s22 + $0x14] sm:$0x3] }
  0x32   : > { %v575_v53 = vunpack.c.l.bf16 %v527_v37  ;;  %v576_v54 = vunpack.c.l.bf16 %v528_v42  ;;  %v574_v55 = vunpack.c.l.bf16 %v526_v44  ;;  %v694_v57 = vrot.slane %v571_v43, 2  ;;  %464 = vst.msk [vmem:[#allocation2 + $0x30] sm:$0xf] %vm451_vm1, %v5935_v11  ;;  %v969_v23 = vld [vmem:[%s6112_s22 + $0xc] sm:$0xc] }
  0x33   : > { %v5460_v60 = vpack.c.bf16 %v693_v49, %v693_v49  ;;  %v578_v63 = vunpack.c.h.bf16 %v527_v37  ;;  %v579_v0 = vunpack.c.l.bf16 %v531_v56  ;;  %v1015_v15 = vunpack.c.l.bf16 %v967_v1  ;;  %v5938_v24 = vld [vmem:[%s6112_s22 + $0x58] ss:$0 sps:$4 sm:$0xff]   ;;  %v5939_v25 = vld [vmem:[%s6112_s22 + $0x54] ss:$0 sps:$4 sm:$0xff]   ;;  %v973_v30 = vld [vmem:[%s6112_s22 + $0x1c] ss:$12 sps:$4 sm:$0xff]  }
  0x34   : > { %867 = vrot.lane.b32.xlu1 %v5450_v51, %s6055_s23  ;;  %v697_v51 = vrot.slane %v573_v36, 2  ;;  %v700_v3 = vrot.slane %v575_v53, 2  ;;  %v702_v4 = vrot.slane %v576_v54, 2  ;;  %v696_v7 = vsel %vm628_vm0, %v694_v57, %v695_v50  ;;  %467 = vst.msk [vmem:[#allocation2 + $0x3c] sm:$0xf] %vm451_vm1, %v5938_v24 }
  0x35   : > { %865 = vrot.lane.b32.xlu0 %v5449_v52, %s6055_s23  ;;  %v691_v52 = vsel %vm628_vm0, %v689_v41, %v690_v34  ;;  %v705_v13 = vrot.slane %v578_v63, 2  ;;  %v707_v14 = vrot.slane %v579_v0, 2  ;;  %v5461_v16 = vpack.c.bf16 %v696_v7, %v696_v7  ;;  %v974_v35 = vld [vmem:[%s6112_s22 + $0x20] sm:$0x3]  ;;  %466 = vst.msk [vmem:[#allocation2 + $0x38] sm:$0xf] %vm451_vm1, %v5939_v25 }
  0x36   : > { %v5459_v61 = vpack.c.bf16 %v691_v52, %v691_v52  ;;  %v698_v62 = vsel %vm628_vm0, %v695_v50, %v697_v51  ;;  %v703_v17 = vsel %vm628_vm0, %v700_v3, %v702_v4  ;;  %v1112_v29 = vrot.slane %v1015_v15, 4  ;;  %v5943_v40 = vld [vmem:[%s6112_s22 + $0x60] ss:$0 sps:$4 sm:$0xff]   ;;  %v977_v43 = vld [vmem:[%s6112_s22 + $0x2c] sm:$0x3] }
  0x37   : > { %v5462_v12 = vpack.c.bf16 %v698_v62, %v698_v62  ;;  %v5464_v26 = vpack.c.bf16 %v703_v17, %v703_v17  ;;  %v708_v28 = vsel %vm628_vm0, %v705_v13, %v707_v14  ;;  %v1018_v32 = vunpack.c.h.bf16 %v967_v1  ;;  %468 = vst.msk [vmem:[#allocation2 + $0x40] sm:$0xf] %vm451_vm1, %v5943_v40  ;;  %v975_v52 = vld [vmem:[%s6112_s22 + $0x24] sm:$0xc]  ;;  %v5946_v53 = vld [vmem:[%s6112_s22 + $0x70] ss:$0 sps:$4 sm:$0xff]  }
  0x38   : > { %871 = vrot.lane.b32.xlu1 %v5452_v5, %s6055_s23  ;;  %v699_v5 = vrot.slane %v574_v55, 2  ;;  %v1019_v33 = vunpack.c.l.bf16 %v971_v20  ;;  %v1017_v34 = vunpack.c.l.bf16 %v969_v23  ;;  %v5466_v41 = vpack.c.bf16 %v708_v28, %v708_v28  ;;  %v6266_v54 = vld [vmem:[%s6112_s22 + $0x34] ss:$12 sps:$4 sm:$0xff]   ;;  %v5947_v55 = vld [vmem:[%s6112_s22 + $0x6c] ss:$0 sps:$4 sm:$0xff]  }
  0x39   : > { %869 = vrot.lane.b32.xlu0 %v5451_v6, %s6055_s23  ;;  %v577_v6 = vunpack.c.l.bf16 %v529_v58  ;;  %v1117_v44 = vrot.slane %v1018_v32, 4  ;;  %v1021_v47 = vunpack.c.l.bf16 %v973_v30  ;;  %v1022_v50 = vunpack.c.l.bf16 %v974_v35  ;;  %v980_v58 = vld [vmem:[%s6112_s22 + $0x38] sm:$0x3]  ;;  %v978_v59 = vld [vmem:[%s6112_s22 + $0x30] sm:$0xc] }
  0x3a   : > { %v701_v18 = vsel %vm628_vm0, %v699_v5, %v700_v3  ;;  %v1119_v45 = vrot.slane %v1019_v33, 4  ;;  %v1024_v56 = vunpack.c.h.bf16 %v973_v30  ;;  %v1025_v57 = vunpack.c.l.bf16 %v977_v43  ;;  %471 = vst.msk [vmem:[#allocation2 + $0x4c] sm:$0xf] %vm451_vm1, %v5946_v53  ;;  %470 = vst.msk [vmem:[#allocation2 + $0x48] sm:$0xf] %vm451_vm1, %v5947_v55 }
  0x3b   : > { %v704_v19 = vrot.slane %v577_v6, 2  ;;  %v5463_v27 = vpack.c.bf16 %v701_v18, %v701_v18  ;;  %v1122_v63 = vrot.slane %v1021_v47, 4  ;;  %v5950_v0 = vld [vmem:[%s6112_s22 + $0x7c] ss:$0 sps:$4 sm:$0xff]   ;;  %v1124_v2 = vrot.slane %v1022_v50, 4 }
  0x3c   : > { %875 = vrot.lane.b32.xlu1 %v5454_v21, %s6055_s23  ;;  %v1016_v21 = vunpack.c.l.bf16 %v968_v8  ;;  %v1120_v62 = vsel %vm1110_vm2, %v1117_v44, %v1119_v45  ;;  %v1023_v4 = vunpack.c.l.bf16 %v975_v52  ;;  %v5951_v5 = vld [vmem:[%s6112_s22 + $0x78] ss:$0 sps:$4 sm:$0xff]   ;;  %v1027_v6 = vunpack.c.l.bf16 %v6266_v54  ;;  %v983_v8 = vld [vmem:[%s6112_s22 + $0x44] sm:$0x3]  ;;  %v981_v9 = vld [vmem:[%s6112_s22 + $0x3c] sm:$0xc] }
  0x3d   : > { %873 = vrot.lane.b32.xlu0 %v5453_v22, %s6055_s23  ;;  %v1014_v22 = vunpack.c.l.bf16 %v966_v10  ;;  %v706_v31 = vsel %vm628_vm0, %v704_v19, %v705_v13  ;;  %v1028_v7 = vunpack.c.l.bf16 %v980_v58  ;;  %473 = vst.msk [vmem:[#allocation2 + $0x54] sm:$0xf] %vm451_vm1, %v5950_v0  ;;  %v1127_v10 = vrot.slane %v1024_v56, 4  ;;  %472 = vst.msk [vmem:[#allocation2 + $0x50] sm:$0xf] %vm451_vm1, %v5951_v5 }
  0x3e   : > { %v1114_v36 = vrot.slane %v1016_v21, 4  ;;  %v5465_v42 = vpack.c.bf16 %v706_v31, %v706_v31  ;;  %v1129_v11 = vrot.slane %v1025_v57, 4  ;;  %v5470_v13 = vpack.c.bf16 %v1120_v62, %v1120_v62  ;;  %v5959_v30 = vld [vmem:[%s6112_s22 + $0x90] ss:$0 sps:$4 sm:$0xff]   ;;  %v985_v32 = vld [vmem:[%s6112_s22 + $0x4c] ss:$12 sps:$4 sm:$0xff]  }
  0x3f   : > { %v1111_v37 = vrot.slane %v1014_v22, 4  ;;  %v1026_v15 = vunpack.c.l.bf16 %v978_v59  ;;  %v1125_v17 = vsel %vm1110_vm2, %v1122_v63, %v1124_v2  ;;  %v1126_v19 = vrot.slane %v1023_v4, 4  ;;  %v986_v33 = vld [vmem:[%s6112_s22 + $0x50] sm:$0x3]  ;;  %476 = vst.msk [vmem:[#allocation2 + $0x60] sm:$0xf] %vm451_vm1, %v5959_v30 }
  0x40   : > { %879 = vrot.lane.b32.xlu1 %v5456_v38, %s6055_s23  ;;  %v5942_v38 = vld [vmem:[%s6112_s22 + $0x64] ss:$0 sps:$4 sm:$0xff]   ;;  %v1132_v20 = vrot.slane %v1027_v6, 4  ;;  %v1134_v21 = vrot.slane %v1028_v7, 4  ;;  %v1130_v22 = vsel %vm1110_vm2, %v1127_v10, %v1129_v11  ;;  %v1030_v23 = vunpack.c.h.bf16 %v6266_v54  ;;  %v5965_v0 = vld [vmem:[%s6112_s22 + $0xb4] ss:$0 sps:$4 sm:$0xff]  }
  0x41   : > { %877 = vrot.lane.b32.xlu0 %v5455_v39, %s6055_s23  ;;  %v972_v39 = vld [vmem:[%s6112_s22 + $0x18] sm:$0xc]  ;;  %469 = vst.msk [vmem:[#allocation2 + $0x44] sm:$0xf] %vm451_vm1, %v5942_v38  ;;  %v1113_v49 = vsel %vm1110_vm2, %v1111_v37, %v1112_v29  ;;  %v1031_v24 = vunpack.c.l.bf16 %v983_v8  ;;  %v1029_v25 = vunpack.c.l.bf16 %v981_v9  ;;  %v1128_v31 = vsel %vm1110_vm2, %v1126_v19, %v1127_v10  ;;  %482 = vst.msk [vmem:[#allocation2 + $0x78] sm:$0xf] %vm451_vm1, %v5965_v0 }
  0x42   : > { %v1020_v51 = vunpack.c.l.bf16 %v972_v39  ;;  %v5474_v35 = vpack.c.bf16 %v1130_v22, %v1130_v22  ;;  %v1135_v37 = vsel %vm1110_vm2, %v1132_v20, %v1134_v21  ;;  %v1137_v38 = vrot.slane %v1030_v23, 4  ;;  %v995_v8 = vld [vmem:[%s6112_s22 + $0x74] sm:$0x3]  ;;  %v998_v21 = vld [vmem:[%s6112_s22 + $0x80] sm:$0x3] }
  0x43   : > { %v1139_v39 = vrot.slane %v1031_v24, 4  ;;  %v1136_v40 = vrot.slane %v1029_v25, 4  ;;  %v1034_v45 = vunpack.c.l.bf16 %v986_v33  ;;  %v5476_v50 = vpack.c.bf16 %v1135_v37, %v1135_v37  ;;  %v996_v22 = vld [vmem:[%s6112_s22 + $0x78] sm:$0xc]  ;;  %v1001_v37 = vld [vmem:[%s6112_s22 + $0x8c] sm:$0x3] }
  0x44   : > { %883 = vrot.lane.b32.xlu1 %v5458_v46, %s6055_s23  ;;  %v1116_v46 = vrot.slane %v1017_v34, 4  ;;  %v1121_v3 = vrot.slane %v1020_v51, 4  ;;  %v984_v34 = vld [vmem:[%s6112_s22 + $0x48] sm:$0xc]  ;;  %v5963_v51 = vld [vmem:[%s6112_s22 + $0xa8] ss:$0 sps:$4 sm:$0xff]   ;;  %v1036_v55 = vunpack.c.h.bf16 %v985_v32  ;;  %v1046_v30 = vunpack.c.l.bf16 %v998_v21 }
  0x45   : > { %881 = vrot.lane.b32.xlu0 %v5457_v48, %s6055_s23  ;;  %v1115_v48 = vsel %vm1110_vm2, %v1112_v29, %v1114_v36  ;;  %v1131_v29 = vrot.slane %v1026_v15, 4  ;;  %v5960_v36 = vld [vmem:[%s6112_s22 + $0xa0] ss:$0 sps:$4 sm:$0xff]   ;;  %v1032_v47 = vunpack.c.l.bf16 %v984_v34  ;;  %v1140_v53 = vsel %vm1110_vm2, %v1137_v38, %v1139_v39  ;;  %480 = vst.msk [vmem:[#allocation2 + $0x70] sm:$0xf] %vm451_vm1, %v5963_v51 }
  0x46   : > { %v1118_v1 = vsel %vm1110_vm2, %v1116_v46, %v1117_v44  ;;  %v1123_v18 = vsel %vm1110_vm2, %v1121_v3, %v1122_v63  ;;  %v1033_v44 = vunpack.c.l.bf16 %v985_v32  ;;  %v989_v46 = vld [vmem:[%s6112_s22 + $0x5c] sm:$0x3]  ;;  %479 = vst.msk [vmem:[#allocation2 + $0x6c] sm:$0xf] %vm451_vm1, %v5960_v36  ;;  %v1138_v54 = vsel %vm1110_vm2, %v1136_v40, %v1137_v38  ;;  %v992_v63 = vld [vmem:[%s6112_s22 + $0x68] sm:$0x3] }
  0x47   : > { %v5469_v14 = vpack.c.bf16 %v1118_v1, %v1118_v1  ;;  %v5471_v28 = vpack.c.bf16 %v1123_v18, %v1123_v18  ;;  %v1133_v43 = vsel %vm1110_vm2, %v1131_v29, %v1132_v20  ;;  %v1144_v57 = vrot.slane %v1034_v45, 4  ;;  %v990_v1 = vld [vmem:[%s6112_s22 + $0x60] sm:$0xc]  ;;  %v999_v39 = vld [vmem:[%s6112_s22 + $0x84] sm:$0xc] }
  0x48   : > { %887 = vrot.lane.b32.xlu1 %v5460_v60, %s6055_s23  ;;  %v5468_v60 = vpack.c.bf16 %v1115_v48, %v1115_v48  ;;  %v987_v48 = vld [vmem:[%s6112_s22 + $0x54] sm:$0xc]  ;;  %v5475_v52 = vpack.c.bf16 %v1133_v43, %v1133_v43  ;;  %v1142_v56 = vrot.slane %v1033_v44, 4  ;;  %v1037_v58 = vunpack.c.l.bf16 %v989_v46  ;;  %v1002_v51 = vld [vmem:[%s6112_s22 + $0x90] sm:$0xc] }
  0x49   : > { %885 = vrot.lane.b32.xlu0 %v5459_v61, %s6055_s23  ;;  %v5467_v61 = vpack.c.bf16 %v1113_v49, %v1113_v49  ;;  %v5962_v49 = vld [vmem:[%s6112_s22 + $0xac] ss:$0 sps:$4 sm:$0xff]   ;;  %v1035_v59 = vunpack.c.l.bf16 %v987_v48  ;;  %v1141_v62 = vrot.slane %v1032_v47, 4  ;;  %v5478_v2 = vpack.c.bf16 %v1140_v53, %v1140_v53  ;;  %v1003_v48 = vld [vmem:[%s6112_s22 + $0x94] ss:$12 sps:$4 sm:$0xff]  }
  0x4a   : > { %481 = vst.msk [vmem:[#allocation2 + $0x74] sm:$0xf] %vm451_vm1, %v5962_v49  ;;  %v5477_v3 = vpack.c.bf16 %v1138_v54, %v1138_v54  ;;  %v1145_v4 = vsel %vm1110_vm2, %v1142_v56, %v1144_v57  ;;  %v1147_v5 = vrot.slane %v1036_v55, 4  ;;  %v1149_v6 = vrot.slane %v1037_v58, 4 }
  0x4b   : > { %v1146_v7 = vrot.slane %v1035_v59, 4  ;;  %v1143_v9 = vsel %vm1110_vm2, %v1141_v62, %v1142_v56  ;;  %v1040_v11 = vunpack.c.l.bf16 %v992_v63  ;;  %v1043_v15 = vunpack.c.l.bf16 %v995_v8  ;;  %v1005_v63 = vld [vmem:[%s6112_s22 + $0x9c] sm:$0xc] }
  0x4c   : > { %891 = vrot.lane.b32.xlu1 %v5462_v12, %s6055_s23  ;;  %v5954_v12 = vld [vmem:[%s6112_s22 + $0x88] ss:$0 sps:$4 sm:$0xff]   ;;  %v5479_v18 = vpack.c.bf16 %v1143_v9, %v1143_v9  ;;  %v1150_v19 = vsel %vm1110_vm2, %v1147_v5, %v1149_v6  ;;  %v1049_v47 = vunpack.c.l.bf16 %v1001_v37  ;;  %v1047_v49 = vunpack.c.l.bf16 %v999_v39 }
  0x4d   : > { %889 = vrot.lane.b32.xlu0 %v5461_v16, %s6055_s23  ;;  %v5955_v16 = vld [vmem:[%s6112_s22 + $0x84] ss:$0 sps:$4 sm:$0xff]   ;;  %475 = vst.msk [vmem:[#allocation2 + $0x5c] sm:$0xf] %vm451_vm1, %v5954_v12  ;;  %v1038_v12 = vunpack.c.l.bf16 %v990_v1  ;;  %v1148_v23 = vsel %vm1110_vm2, %v1146_v7, %v1147_v5  ;;  %v1154_v25 = vrot.slane %v1040_v11, 4  ;;  %v1159_v29 = vrot.slane %v1043_v15, 4 }
  0x4e   : > { %474 = vst.msk [vmem:[#allocation2 + $0x58] sm:$0xf] %vm451_vm1, %v5955_v16  ;;  %v997_v16 = vld [vmem:[%s6112_s22 + $0x7c] ss:$12 sps:$4 sm:$0xff]   ;;  %v5482_v32 = vpack.c.bf16 %v1150_v19, %v1150_v19  ;;  %v5481_v33 = vpack.c.bf16 %v1148_v23, %v1148_v23  ;;  %v1169_v57 = vrot.slane %v1049_v47, 4  ;;  %v1051_v58 = vunpack.c.l.bf16 %v1003_v48 }
  0x4f   : > { %v1048_v43 = vunpack.c.h.bf16 %v997_v16  ;;  %v1166_v62 = vrot.slane %v1047_v49, 4  ;;  %v1053_v9 = vunpack.c.l.bf16 %v1005_v63  ;;  %v1010_v11 = vld [vmem:[%s6112_s22 + $0xb0] sm:$0x3] }
  0x50   : > { %895 = vrot.lane.b32.xlu1 %v5464_v26, %s6055_s23  ;;  %v5958_v26 = vld [vmem:[%s6112_s22 + $0x94] ss:$0 sps:$4 sm:$0xff]   ;;  %v1172_v5 = vrot.slane %v1051_v58, 4  ;;  %v5928_v58 = vld [vmem:[%s6112_s22 + $0x28] ss:$0 sps:$4 sm:$0xff]  }
  0x51   : > { %893 = vrot.lane.b32.xlu0 %v5463_v27, %s6055_s23  ;;  %v5472_v27 = vpack.c.bf16 %v1125_v17, %v1125_v17  ;;  %477 = vst.msk [vmem:[#allocation2 + $0x64] sm:$0xf] %vm451_vm1, %v5958_v26  ;;  %v5480_v17 = vpack.c.bf16 %v1145_v4, %v1145_v4  ;;  %v1151_v26 = vrot.slane %v1038_v12, 4  ;;  %v1167_v56 = vrot.slane %v1048_v43, 4  ;;  %v1008_v12 = vld [vmem:[%s6112_s22 + $0xa8] sm:$0xc] }
  0x52   : > { %v1176_v21 = vrot.slane %v1053_v9, 4  ;;  %v1056_v23 = vunpack.c.l.bf16 %v1008_v12  ;;  %v5933_v63 = vld [vmem:[%s6112_s22 + $0x30] ss:$0 sps:$4 sm:$0xff]   ;;  %v4934_v12 = vld [vmem:[%s6112_s22 + $0x1c] ss:$12 sps:$4 sm:$0xff]  }
  0x53   : > { %v1170_v4 = vsel %vm1110_vm2, %v1167_v56, %v1169_v57  ;;  %v1168_v8 = vsel %vm1110_vm2, %v1166_v62, %v1167_v56  ;;  %v5932_v62 = vld [vmem:[%s6112_s22 + $0x34] ss:$0 sps:$4 sm:$0xff]  }
  0x54   : > { %899 = vrot.lane.b32.xlu1 %v5466_v41, %s6055_s23  ;;  %v5961_v41 = vld [vmem:[%s6112_s22 + $0x9c] ss:$0 sps:$4 sm:$0xff]  }
  0x55   : > { %897 = vrot.lane.b32.xlu0 %v5465_v42, %s6055_s23  ;;  %v5473_v42 = vpack.c.bf16 %v1128_v31, %v1128_v31  ;;  %478 = vst.msk [vmem:[#allocation2 + $0x68] sm:$0xf] %vm451_vm1, %v5961_v41  ;;  %v1044_v31 = vunpack.c.l.bf16 %v996_v22  ;;  %v1164_v41 = vrot.slane %v1046_v30, 4  ;;  %v1058_v22 = vunpack.c.l.bf16 %v1010_v11  ;;  %v5945_v11 = vld [vmem:[%s6112_s22 + $0x54] ss:$0 sps:$4 sm:$0xff]  }
  0x58   : > { %1321 = vrot.lane.b32.xlu1 %v5468_v60, %s6056_s24  ;;  %v991_v60 = vld [vmem:[%s6112_s22 + $0x64] ss:$12 sps:$4 sm:$0xff]  }
  0x59   : > { %1319 = vrot.lane.b32.xlu0 %v5467_v61, %s6056_s24  ;;  %v5964_v61 = vld [vmem:[%s6112_s22 + $0xb8] ss:$0 sps:$4 sm:$0xff]   ;;  %v1039_v10 = vunpack.c.l.bf16 %v991_v60 }
  0x5a   : > { %483 = vst.msk [vmem:[#allocation2 + $0x7c] sm:$0xf] %vm451_vm1, %v5964_v61  ;;  %v1007_v61 = vld [vmem:[%s6112_s22 + $0xa4] sm:$0x3] }
  0x5b   : > { %v1152_v24 = vrot.slane %v1039_v10, 4  ;;  %v1009_v10 = vld [vmem:[%s6112_s22 + $0xac] ss:$12 sps:$4 sm:$0xff]  }
  0x5c   : > { %1325 = vrot.lane.b32.xlu1 %v5470_v13, %s6056_s24  ;;  %v993_v13 = vld [vmem:[%s6112_s22 + $0x6c] sm:$0xc]  ;;  %v1057_v19 = vunpack.c.l.bf16 %v1009_v10 }
  0x5d   : > { %1323 = vrot.lane.b32.xlu0 %v5469_v14, %s6056_s24  ;;  %v1042_v14 = vunpack.c.h.bf16 %v991_v60  ;;  %v1041_v20 = vunpack.c.l.bf16 %v993_v13  ;;  %v1153_v36 = vsel %vm1110_vm2, %v1151_v26, %v1152_v24  ;;  %v1050_v60 = vunpack.c.l.bf16 %v1002_v51 }
  0x5e   : > { %v5483_v45 = vpack.c.bf16 %v1153_v36, %v1153_v36  ;;  %v5490_v13 = vpack.c.bf16 %v1170_v4, %v1170_v4 }
  0x5f   : > { %v1156_v34 = vrot.slane %v1041_v20, 4  ;;  %v1171_v7 = vrot.slane %v1050_v60, 4  ;;  %v1013_v20 = vld [vmem:[%s6112_s22 + $0xbc] sm:$0x3] }
  0x60   : > { %1329 = vrot.lane.b32.xlu1 %v5472_v27, %s6056_s24  ;;  %v1045_v27 = vunpack.c.l.bf16 %v997_v16  ;;  %v5489_v16 = vpack.c.bf16 %v1168_v8, %v1168_v8  ;;  %v1061_v30 = vunpack.c.l.bf16 %v1013_v20  ;;  %v5949_v20 = vld [vmem:[%s6112_s22 + $0x60] ss:$0 sps:$4 sm:$0xff]  }
  0x61   : > { %1327 = vrot.lane.b32.xlu0 %v5471_v28, %s6056_s24  ;;  %v1157_v28 = vrot.slane %v1042_v14, 4 }
  0x62   : > { %v1162_v38 = vrot.slane %v1045_v27, 4 }
  0x63   : > { %v1160_v40 = vsel %vm1110_vm2, %v1157_v28, %v1159_v29  ;;  %v1158_v46 = vsel %vm1110_vm2, %v1156_v34, %v1157_v28  ;;  %v1182_v28 = vrot.slane %v1057_v19, 4  ;;  %v1060_v29 = vunpack.c.h.bf16 %v1009_v10  ;;  %v5944_v10 = vld [vmem:[%s6112_s22 + $0x58] ss:$0 sps:$4 sm:$0xff]   ;;  %v5948_v19 = vld [vmem:[%s6112_s22 + $0x64] ss:$0 sps:$4 sm:$0xff]  }
  0x64   : > { %1333 = vrot.lane.b32.xlu1 %v5474_v35, %s6056_s24  ;;  %v1155_v35 = vsel %vm1110_vm2, %v1152_v24, %v1154_v25  ;;  %v5485_v53 = vpack.c.bf16 %v1158_v46, %v1158_v46  ;;  %v1165_v54 = vsel %vm1110_vm2, %v1162_v38, %v1164_v41  ;;  %v1011_v24 = vld [vmem:[%s6112_s22 + $0xb4] sm:$0xc]  ;;  %v1181_v34 = vrot.slane %v1056_v23, 4  ;;  %v4936_v23 = vld [vmem:[%s6112_s22 + $0x24] sm:$0xe] }
  0x65   : > { %1331 = vrot.lane.b32.xlu0 %v5473_v42, %s6056_s24  ;;  %v1161_v42 = vrot.slane %v1044_v31, 4  ;;  %v5484_v44 = vpack.c.bf16 %v1155_v35, %v1155_v35  ;;  %v5488_v0 = vpack.c.bf16 %v1165_v54, %v1165_v54  ;;  %v1059_v31 = vunpack.c.l.bf16 %v1011_v24  ;;  %v5924_v54 = vld [vmem:[%s6112_s22 + $0x1c] ss:$0 sps:$4 sm:$0xff]  }
  0x66   : > { %v1187_v37 = vrot.slane %v1060_v29, 4  ;;  %v1183_v41 = vsel %vm1110_vm2, %v1181_v34, %v1182_v28  ;;  %v5953_v29 = vld [vmem:[%s6112_s22 + $0x6c] ss:$0 sps:$4 sm:$0xff]  }
  0x67   : > { %v1163_v55 = vsel %vm1110_vm2, %v1161_v42, %v1162_v38  ;;  %v1189_v38 = vrot.slane %v1061_v30, 4  ;;  %v1186_v39 = vrot.slane %v1059_v31, 4  ;;  %v1793_v31 = vunpack.c.h.bf16 %v4934_v12 }
  0x68   : > { %1337 = vrot.lane.b32.xlu1 %v5476_v50, %s6056_s24  ;;  %v1004_v50 = vld [vmem:[%s6112_s22 + $0x98] sm:$0x3]  ;;  %v5487_v1 = vpack.c.bf16 %v1163_v55, %v1163_v55 }
  0x69   : > { %1335 = vrot.lane.b32.xlu0 %v5475_v52, %s6056_s24  ;;  %v5486_v52 = vpack.c.bf16 %v1160_v40, %v1160_v40  ;;  %v1052_v59 = vunpack.c.l.bf16 %v1004_v50  ;;  %v1190_v46 = vsel %vm1110_vm2, %v1187_v37, %v1189_v38  ;;  %v1188_v47 = vsel %vm1110_vm2, %v1186_v39, %v1187_v37  ;;  %v5925_v55 = vld [vmem:[%s6112_s22 + $0x18] ss:$0 sps:$4 sm:$0xff]   ;;  %v5015_v37 = vld [vmem:[%s6112_s22 + $0x20] sm:$0x3]  ;;  %v5013_v38 = vld [vmem:[%s6112_s22 + $0x18] sm:$0xc] }
  0x6a   : > { %v5498_v50 = vpack.c.bf16 %v1190_v46, %v1190_v46  ;;  %v5497_v51 = vpack.c.bf16 %v1188_v47, %v1188_v47  ;;  %v5956_v39 = vld [vmem:[%s6112_s22 + $0x7c] ss:$0 sps:$4 sm:$0xff]   ;;  %v2272_v47 = vunpack.c.l.bf16 %v5015_v37 }
  0x6b   : > { %v1174_v6 = vrot.slane %v1052_v59, 4  ;;  %v5929_v59 = vld [vmem:[%s6112_s22 + $0x24] ss:$0 sps:$4 sm:$0xff]  }
  0x6c   : > { %1341 = vrot.lane.b32.xlu1 %v5478_v2, %s6056_s24  ;;  %v1054_v2 = vunpack.c.h.bf16 %v1003_v48 }
  0x6d   : > { %1339 = vrot.lane.b32.xlu0 %v5477_v3, %s6056_s24  ;;  %v1055_v3 = vunpack.c.l.bf16 %v1007_v61 }
  0x6e   : > { %v1177_v14 = vrot.slane %v1054_v2, 4  ;;  %v5936_v2 = vld [vmem:[%s6112_s22 + $0x40] ss:$0 sps:$4 sm:$0xff]  }
  0x6f   : > { %v1179_v15 = vrot.slane %v1055_v3, 4  ;;  %v5937_v3 = vld [vmem:[%s6112_s22 + $0x3c] ss:$0 sps:$4 sm:$0xff]  }
  0x70   : > { %1345 = vrot.lane.b32.xlu1 %v5480_v17, %s6056_s24  ;;  %v1175_v17 = vsel %vm1110_vm2, %v1172_v5, %v1174_v6  ;;  %v5940_v6 = vld [vmem:[%s6112_s22 + $0x4c] ss:$0 sps:$4 sm:$0xff]  }
  0x71   : > { %1343 = vrot.lane.b32.xlu0 %v5479_v18, %s6056_s24  ;;  %v1173_v18 = vsel %vm1110_vm2, %v1171_v7, %v1172_v5  ;;  %v5492_v25 = vpack.c.bf16 %v1175_v17, %v1175_v17  ;;  %v1180_v27 = vsel %vm1110_vm2, %v1177_v14, %v1179_v15  ;;  %v5941_v7 = vld [vmem:[%s6112_s22 + $0x48] ss:$0 sps:$4 sm:$0xff]   ;;  %v1790_v17 = vunpack.c.l.bf16 %v4934_v12 }
  0x72   : > { %v5491_v26 = vpack.c.bf16 %v1173_v18, %v1173_v18  ;;  %v5494_v35 = vpack.c.bf16 %v1180_v27, %v1180_v27 }
  0x74   : > { %1349 = vrot.lane.b32.xlu1 %v5482_v32, %s6056_s24  ;;  %v1178_v32 = vsel %vm1110_vm2, %v1176_v21, %v1177_v14  ;;  %v4933_v14 = vld [vmem:[%s6112_s22 + $0x18] sm:$0xe] }
  0x75   : > { %1347 = vrot.lane.b32.xlu0 %v5481_v33, %s6056_s24  ;;  %v1184_v33 = vrot.slane %v1058_v22, 4  ;;  %v5493_v36 = vpack.c.bf16 %v1178_v32, %v1178_v32  ;;  %v1789_v21 = vunpack.c.l.bf16 %v4933_v14  ;;  %v4938_v22 = vld [vmem:[%s6112_s22 + $0x2c] sm:$0x1] }
  0x76   : > { %v1794_v32 = vunpack.c.l.bf16 %v4938_v22 }
  0x77   : > { %v1185_v40 = vsel %vm1110_vm2, %v1182_v28, %v1184_v33  ;;  %v5952_v28 = vld [vmem:[%s6112_s22 + $0x70] ss:$0 sps:$4 sm:$0xff]   ;;  %v1885_v30 = vrot.slane %v1789_v21, 2  ;;  %v1792_v33 = vunpack.c.l.bf16 %v4936_v23 }
  0x78   : > { %1353 = vrot.lane.b32.xlu1 %v5484_v44, %s6056_s24  ;;  %v5496_v44 = vpack.c.bf16 %v1185_v40, %v1185_v40 }
  0x79   : > { %1351 = vrot.lane.b32.xlu0 %v5483_v45, %s6056_s24  ;;  %v5495_v45 = vpack.c.bf16 %v1183_v41, %v1183_v41  ;;  %v5957_v41 = vld [vmem:[%s6112_s22 + $0x78] ss:$0 sps:$4 sm:$0xff]  }
  0x7c   : > { %1357 = vrot.lane.b32.xlu1 %v5486_v52, %s6056_s24 }
  0x7d   : > { %1355 = vrot.lane.b32.xlu0 %v5485_v53, %s6056_s24 }
  0x80   : > { %1361 = vrot.lane.b32.xlu1 %v5488_v0, %s6056_s24 }
  0x81   : > { %1359 = vrot.lane.b32.xlu0 %v5487_v1, %s6056_s24 }
  0x84   : > { %1365 = vrot.lane.b32.xlu1 %v5490_v13, %s6056_s24  ;;  %v4935_v13 = vld [vmem:[%s6112_s22 + $0x20] sm:$0x1] }
  0x85   : > { %1363 = vrot.lane.b32.xlu0 %v5489_v16, %s6056_s24  ;;  %v1791_v18 = vunpack.c.l.bf16 %v4935_v13 }
  0x87   : > { %v1888_v27 = vrot.slane %v1791_v18, 2  ;;  %v5173_v18 = vld [vmem:[%s6112_s22 + $0x30] sm:$0xe] }
  0x88   : > { %1369 = vrot.lane.b32.xlu1 %v5492_v25, %s6056_s24  ;;  %v3044_v23 = vunpack.c.l.bf16 %v5173_v18 }
  0x89   : > { %1367 = vrot.lane.b32.xlu0 %v5491_v26, %s6056_s24  ;;  %v1886_v26 = vrot.slane %v1790_v17, 2  ;;  %v5175_v17 = vld [vmem:[%s6112_s22 + $0x38] sm:$0x1] }
  0x8a   : > { %v842_v42 = vpop.permute.xlu1 %841  ;;  %v3046_v22 = vunpack.c.l.bf16 %v5175_v17  ;;  %v3140_v37 = vrot.slane %v3044_v23, 2 }
  0x8b   : > { %v838_v43 = vpop.permute.xlu0 %837  ;;  %936 = vst.msk [vmem:[#allocation2 + $0x8] sm:$0xf] %vm933_vm3, %v842_v42  ;;  %v1889_v40 = vsel %vm628_vm0, %v1886_v26, %v1888_v27  ;;  %v1887_v42 = vsel %vm628_vm0, %v1885_v30, %v1886_v26  ;;  %v5176_v27 = vld [vmem:[%s6112_s22 + $0x3c] sm:$0xe]  ;;  %v5255_v30 = vld [vmem:[%s6112_s22 + $0x38] sm:$0x3] }
  0x8c   : > { %934 = vst.msk [vmem:[#allocation2] sm:$0xf] %vm933_vm3, %v838_v43  ;;  %1373 = vrot.lane.b32.xlu1 %v5494_v35, %s6056_s24  ;;  %v1891_v43 = vrot.slane %v1793_v31, 2  ;;  %v5967_v31 = vld [vmem:[%s6112_s22 + $0x30] ss:$0 sps:$4 sm:$0xff]  }
  0x8d   : > { %1371 = vrot.lane.b32.xlu0 %v5493_v36, %s6056_s24  ;;  %v5014_v36 = vld [vmem:[%s6112_s22 + $0x1c] ss:$12 sps:$4 sm:$0xff]  }
  0x8e   : > { %v844_v48 = vpop.permute.xlu1 %843  ;;  %v2271_v46 = vunpack.c.l.bf16 %v5014_v36 }
  0x8f   : > { %v840_v49 = vpop.permute.xlu0 %839  ;;  %937 = vst.msk [vmem:[#allocation2 + $0xc] sm:$0xf] %vm933_vm3, %v844_v48  ;;  %v2270_v48 = vunpack.c.l.bf16 %v5013_v38  ;;  %v3047_v38 = vunpack.c.l.bf16 %v5176_v27 }
  0x90   : > { %935 = vst.msk [vmem:[#allocation2 + $0x4] sm:$0xf] %vm933_vm3, %v840_v49  ;;  %1377 = vrot.lane.b32.xlu1 %v5496_v44, %s6056_s24  ;;  %v1893_v44 = vrot.slane %v1794_v32, 2  ;;  %v5018_v49 = vld [vmem:[%s6112_s22 + $0x2c] sm:$0x3] }
  0x91   : > { %1375 = vrot.lane.b32.xlu0 %v5495_v45, %s6056_s24  ;;  %v1890_v45 = vrot.slane %v1792_v33, 2 }
  0x92   : > { %v848_v52 = vpop.permute.xlu1 %847 }
  0x93   : > { %v846_v53 = vpop.permute.xlu0 %845  ;;  %939 = vst.msk [vmem:[#allocation2 + $0x14] sm:$0xf] %vm933_vm3, %v848_v52  ;;  %v5016_v52 = vld [vmem:[%s6112_s22 + $0x24] sm:$0xc] }
  0x94   : > { %938 = vst.msk [vmem:[#allocation2 + $0x10] sm:$0xf] %vm933_vm3, %v846_v53  ;;  %1381 = vrot.lane.b32.xlu1 %v5498_v50, %s6056_s24  ;;  %v5532_v53 = vpack.c.bf16 %v1889_v40, %v1889_v40 }
  0x95   : > { %1379 = vrot.lane.b32.xlu0 %v5497_v51, %s6056_s24  ;;  %s253_s24 = scalar_lea.vmem %s7262_s4, %s7268_s15 }
  0x96   : > { %v852_v56 = vpop.permute.xlu1 %851 }
  0x97   : > { %v850_v57 = vpop.permute.xlu0 %849  ;;  %941 = vst.msk [vmem:[#allocation2 + $0x1c] sm:$0xf] %vm933_vm3, %v852_v56  ;;  %v1892_v56 = vsel %vm628_vm0, %v1890_v45, %v1891_v43  ;;  %v5969_v45 = vld [vmem:[%s6112_s22 + $0x3c] ss:$0 sps:$4 sm:$0xff]  }
  0x98   : > { %940 = vst.msk [vmem:[#allocation2 + $0x18] sm:$0xf] %vm933_vm3, %v850_v57  ;;  %1614 = vrot.lane.b32.xlu1 %v5924_v54, %s6057_s25  ;;  %v5531_v54 = vpack.c.bf16 %v1887_v42, %v1887_v42  ;;  %v2274_v57 = vunpack.c.h.bf16 %v5014_v36  ;;  %v3143_v36 = vrot.slane %v3046_v22, 2  ;;  %v3527_v42 = vunpack.c.l.bf16 %v5255_v30 }
  0x99   : > { %1612 = vrot.lane.b32.xlu0 %v5925_v55, %s6057_s25  ;;  %v1894_v55 = vsel %vm628_vm0, %v1891_v43, %v1893_v44  ;;  %v5968_v43 = vld [vmem:[%s6112_s22 + $0x40] ss:$0 sps:$4 sm:$0xff]  }
  0x9a   : > { %v856_v60 = vpop.permute.xlu1 %855 }
  0x9b   : > { %v854_v61 = vpop.permute.xlu0 %853  ;;  %943 = vst.msk [vmem:[#allocation2 + $0x24] sm:$0xf] %vm933_vm3, %v856_v60  ;;  %v2369_v60 = vrot.slane %v2272_v47, 4  ;;  %v5258_v47 = vld [vmem:[%s6112_s22 + $0x44] sm:$0x3] }
  0x9c   : > { %942 = vst.msk [vmem:[#allocation2 + $0x20] sm:$0xf] %vm933_vm3, %v854_v61  ;;  %1618 = vrot.lane.b32.xlu1 %v5928_v58, %s6057_s25  ;;  %v2275_v58 = vunpack.c.l.bf16 %v5018_v49  ;;  %v2366_v61 = vrot.slane %v2270_v48, 4 }
  0x9d   : > { %1616 = vrot.lane.b32.xlu0 %v5929_v59, %s6057_s25  ;;  %v2367_v59 = vrot.slane %v2271_v46, 4 }
  0x9e   : > { %v860_v0 = vpop.permute.xlu1 %859 }
  0x9f   : > { %v858_v1 = vpop.permute.xlu0 %857  ;;  %945 = vst.msk [vmem:[#allocation2 + $0x2c] sm:$0xf] %vm933_vm3, %v860_v0 }
  0xa0   : > { %944 = vst.msk [vmem:[#allocation2 + $0x28] sm:$0xf] %vm933_vm3, %v858_v1  ;;  %1622 = vrot.lane.b32.xlu1 %v5932_v62, %s6057_s25  ;;  %v2273_v62 = vunpack.c.l.bf16 %v5016_v52  ;;  %v5534_v1 = vpack.c.bf16 %v1894_v55, %v1894_v55  ;;  %v5256_v52 = vld [vmem:[%s6112_s22 + $0x3c] sm:$0xc] }
  0xa1   : > { %1620 = vrot.lane.b32.xlu0 %v5933_v63, %s6057_s25 }
  0xa2   : > { %v864_v4 = vpop.permute.xlu1 %863 }
  0xa3   : > { %v862_v5 = vpop.permute.xlu0 %861  ;;  %947 = vst.msk [vmem:[#allocation2 + $0x34] sm:$0xf] %vm933_vm3, %v864_v4  ;;  %v2370_v4 = vsel %vm1110_vm2, %v2367_v59, %v2369_v60  ;;  %v3530_v60 = vunpack.c.l.bf16 %v5258_v47 }
  0xa4   : > { %946 = vst.msk [vmem:[#allocation2 + $0x30] sm:$0xf] %vm933_vm3, %v862_v5  ;;  %1626 = vrot.lane.b32.xlu1 %v5936_v2, %s6057_s25  ;;  %v5533_v2 = vpack.c.bf16 %v1892_v56, %v1892_v56  ;;  %v2368_v5 = vsel %vm1110_vm2, %v2366_v61, %v2367_v59  ;;  %v3624_v56 = vrot.slane %v3527_v42, 4 }
  0xa5   : > { %1624 = vrot.lane.b32.xlu0 %v5937_v3, %s6057_s25  ;;  %v2372_v3 = vrot.slane %v2274_v57, 4 }
  0xa6   : > { %v868_v8 = vpop.permute.xlu1 %867 }
  0xa7   : > { %v866_v9 = vpop.permute.xlu0 %865  ;;  %949 = vst.msk [vmem:[#allocation2 + $0x3c] sm:$0xf] %vm933_vm3, %v868_v8 }
  0xa8   : > { %948 = vst.msk [vmem:[#allocation2 + $0x38] sm:$0xf] %vm933_vm3, %v866_v9  ;;  %1630 = vrot.lane.b32.xlu1 %v5940_v6, %s6057_s25  ;;  %v2374_v6 = vrot.slane %v2275_v58, 4  ;;  %v5982_v58 = vld [vmem:[%s7259_s1 + $0x10] ss:$0 sps:$4 sm:$0x33]  }
  0xa9   : > { %1628 = vrot.lane.b32.xlu0 %v5941_v7, %s6057_s25  ;;  %v2371_v7 = vrot.slane %v2273_v62, 4  ;;  %5881 = vmatprep.subr.msk.bf16.mxu0 %vm4139_vm5, %v5982_v58 }
  0xaa   : > { %v872_v15 = vpop.permute.xlu1 %871  ;;  %v2375_v12 = vsel %vm1110_vm2, %v2372_v3, %v2374_v6  ;;  %5882 = vmatprep.subr.msk.bf16.mxu1 %vm4139_vm5, %v5982_v58 }
  0xab   : > { %v870_v16 = vpop.permute.xlu0 %869  ;;  %951 = vst.msk [vmem:[#allocation2 + $0x44] sm:$0xf] %vm933_vm3, %v872_v15  ;;  %v2373_v13 = vsel %vm1110_vm2, %v2371_v7, %v2372_v3 }
  0xac   : > { %950 = vst.msk [vmem:[#allocation2 + $0x40] sm:$0xf] %vm933_vm3, %v870_v16  ;;  %1634 = vrot.lane.b32.xlu1 %v5944_v10, %s6057_s25  ;;  %v5564_v10 = vpack.c.bf16 %v2370_v4, %v2370_v4  ;;  %v5174_v16 = vld [vmem:[%s6112_s22 + $0x34] ss:$12 sps:$4 sm:$0xff]  }
  0xad   : > { %1632 = vrot.lane.b32.xlu0 %v5945_v11, %s6057_s25  ;;  %v5563_v11 = vpack.c.bf16 %v2368_v5, %v2368_v5  ;;  %v3045_v21 = vunpack.c.l.bf16 %v5174_v16  ;;  %v3048_v32 = vunpack.c.h.bf16 %v5174_v16  ;;  %v4939_v5 = vld [vmem:[%s6112_s22 + $0x30] sm:$0xe] }
  0xae   : > { %v876_v24 = vpop.permute.xlu1 %875  ;;  %v1795_v18 = vunpack.c.l.bf16 %v4939_v5 }
  0xaf   : > { %v874_v25 = vpop.permute.xlu0 %873  ;;  %953 = vst.msk [vmem:[#allocation2 + $0x4c] sm:$0xf] %vm933_vm3, %v876_v24  ;;  %v5178_v24 = vld [vmem:[%s6112_s22 + $0x44] sm:$0x1]  ;;  %v3146_v46 = vrot.slane %v3048_v32, 2 }
  0xb0   : > { %952 = vst.msk [vmem:[#allocation2 + $0x48] sm:$0xf] %vm933_vm3, %v874_v25  ;;  %1638 = vrot.lane.b32.xlu1 %v5948_v19, %s6057_s25  ;;  %v5566_v19 = vpack.c.bf16 %v2375_v12, %v2375_v12  ;;  %v3049_v33 = vunpack.c.l.bf16 %v5178_v24  ;;  %v3629_v12 = vrot.slane %v3530_v60, 4 }
  0xb1   : > { %1636 = vrot.lane.b32.xlu0 %v5949_v20, %s6057_s25  ;;  %v5565_v20 = vpack.c.bf16 %v2373_v13, %v2373_v13 }
  0xb2   : > { %v880_v34 = vpop.permute.xlu1 %879 }
  0xb3   : > { %v878_v35 = vpop.permute.xlu0 %877  ;;  %955 = vst.msk [vmem:[#allocation2 + $0x54] sm:$0xf] %vm933_vm3, %v880_v34  ;;  %v5253_v34 = vld [vmem:[%s6112_s22 + $0x30] sm:$0xc] }
  0xb4   : > { %954 = vst.msk [vmem:[#allocation2 + $0x50] sm:$0xf] %vm933_vm3, %v878_v35  ;;  %1642 = vrot.lane.b32.xlu1 %v5952_v28, %s6057_s25  ;;  %v5966_v28 = vld [vmem:[%s6112_s22 + $0x34] ss:$0 sps:$4 sm:$0xff]   ;;  %v3141_v35 = vrot.slane %v3045_v21, 2  ;;  %v3525_v44 = vunpack.c.l.bf16 %v5253_v34 }
  0xb5   : > { %1640 = vrot.lane.b32.xlu0 %v5953_v29, %s6057_s25  ;;  %v5254_v29 = vld [vmem:[%s6112_s22 + $0x34] ss:$12 sps:$4 sm:$0xff]  }
  0xb6   : > { %v884_v50 = vpop.permute.xlu1 %883  ;;  %v3144_v48 = vsel %vm628_vm0, %v3141_v35, %v3143_v36  ;;  %v3142_v49 = vsel %vm628_vm0, %v3140_v37, %v3141_v35  ;;  %v3529_v57 = vunpack.c.h.bf16 %v5254_v29  ;;  %v3621_v59 = vrot.slane %v3525_v44, 4  ;;  %v5020_v34 = vld [vmem:[%s6112_s22 + $0x34] ss:$12 sps:$4 sm:$0xff]   ;;  %v5021_v37 = vld [vmem:[%s6112_s22 + $0x38] sm:$0x3] }
  0xb7   : > { %v882_v51 = vpop.permute.xlu0 %881  ;;  %957 = vst.msk [vmem:[#allocation2 + $0x5c] sm:$0xf] %vm933_vm3, %v884_v50  ;;  %v3148_v50 = vrot.slane %v3049_v33, 2  ;;  %v5628_v61 = vpack.c.bf16 %v3144_v48, %v3144_v48  ;;  %v5627_v62 = vpack.c.bf16 %v3142_v49, %v3142_v49  ;;  %v2278_v47 = vunpack.c.l.bf16 %v5021_v37 }
  0xb8   : > { %956 = vst.msk [vmem:[#allocation2 + $0x58] sm:$0xf] %vm933_vm3, %v882_v51  ;;  %1646 = vrot.lane.b32.xlu1 %v5956_v39, %s6057_s25  ;;  %v3145_v51 = vrot.slane %v3047_v38, 2  ;;  %v5019_v38 = vld [vmem:[%s6112_s22 + $0x30] sm:$0xc] }
  0xb9   : > { %1644 = vrot.lane.b32.xlu0 %v5957_v41, %s6057_s25  ;;  %v3526_v41 = vunpack.c.l.bf16 %v5254_v29  ;;  %v3149_v3 = vsel %vm628_vm0, %v3146_v46, %v3148_v50  ;;  %v2276_v48 = vunpack.c.l.bf16 %v5019_v38  ;;  %v5259_v38 = vld [vmem:[%s6112_s22 + $0x48] sm:$0xc] }
  0xba   : > { %v888_v63 = vpop.permute.xlu1 %887  ;;  %v3147_v4 = vsel %vm628_vm0, %v3145_v51, %v3146_v46  ;;  %v2277_v46 = vunpack.c.l.bf16 %v5020_v34  ;;  %v5024_v51 = vld [vmem:[%s6112_s22 + $0x44] sm:$0x3] }
  0xbb   : > { %v886_v0 = vpop.permute.xlu0 %885  ;;  %959 = vst.msk [vmem:[#allocation2 + $0x64] sm:$0xf] %vm933_vm3, %v888_v63  ;;  %v3622_v55 = vrot.slane %v3526_v41, 4  ;;  %v3528_v63 = vunpack.c.l.bf16 %v5256_v52  ;;  %v5629_v16 = vpack.c.bf16 %v3147_v4, %v3147_v4  ;;  %v5022_v52 = vld [vmem:[%s6112_s22 + $0x3c] sm:$0xc]  ;;  %v2376_v60 = vrot.slane %v2276_v48, 4 }
  0xbc   : > { %958 = vst.msk [vmem:[#allocation2 + $0x60] sm:$0xf] %vm933_vm3, %v886_v0  ;;  %2095 = vrot.lane.b32.xlu1 %v5532_v53, %s6058_s26  ;;  %v6512_v0 = vld [vmem:[%s6112_s22 + $0x34] ss:$12 sps:$4 sm:$0xff]  }
  0xbd   : > { %2093 = vrot.lane.b32.xlu0 %v5531_v54, %s6058_s26  ;;  %v1796_v13 = vunpack.c.l.bf16 %v6512_v0  ;;  %v3626_v17 = vrot.slane %v3528_v63, 4  ;;  %v1799_v29 = vunpack.c.h.bf16 %v6512_v0 }
  0xbe   : > { %v892_v8 = vpop.permute.xlu1 %891 }
  0xbf   : > { %v890_v9 = vpop.permute.xlu0 %889  ;;  %961 = vst.msk [vmem:[#allocation2 + $0x6c] sm:$0xf] %vm933_vm3, %v892_v8  ;;  %v3625_v8 = vsel %vm1110_vm2, %v3622_v55, %v3624_v56  ;;  %v1896_v27 = vrot.slane %v1796_v13, 2  ;;  %v1901_v42 = vrot.slane %v1799_v29, 2  ;;  %v5181_v13 = vld [vmem:[%s6112_s22 + $0x50] sm:$0x1] }
  0xc0   : > { %960 = vst.msk [vmem:[#allocation2 + $0x68] sm:$0xf] %vm933_vm3, %v890_v9  ;;  %2099 = vrot.lane.b32.xlu1 %v5534_v1, %s6058_s26  ;;  %v4941_v1 = vld [vmem:[%s6112_s22 + $0x38] sm:$0x1]  ;;  %v3627_v9 = vrot.slane %v3529_v57, 4  ;;  %v5660_v23 = vpack.c.bf16 %v3625_v8, %v3625_v8  ;;  %v2377_v57 = vrot.slane %v2277_v46, 4 }
  0xc1   : > { %2097 = vrot.lane.b32.xlu0 %v5533_v2, %s6058_s26  ;;  %v4141_v2 = vsel %vm4139_vm5, %v5982_v58, 0  ;;  %v2280_v58 = vunpack.c.h.bf16 %v5020_v34  ;;  %v5971_v34 = vld [vmem:[%s6112_s22 + $0x48] ss:$0 sps:$4 sm:$0xff]  }
  0xc2   : > { %v896_v14 = vpop.permute.xlu1 %895  ;;  %5838 = vmatpush3.bf16.msra.mxu0 %v4141_v2  ;;  %5878 = vmatpush3.bf16.msra.mxu1 %v4141_v2  ;;  %v3628_v30 = vsel %vm1110_vm2, %v3626_v17, %v3627_v9  ;;  %v2378_v5 = vsel %vm1110_vm2, %v2376_v60, %v2377_v57 }
  0xc3   : > { %v894_v15 = vpop.permute.xlu0 %893  ;;  %963 = vst.msk [vmem:[#allocation2 + $0x74] sm:$0xf] %vm933_vm3, %v896_v14  ;;  %v1797_v14 = vunpack.c.l.bf16 %v4941_v1 }
  0xc4   : > { %962 = vst.msk [vmem:[#allocation2 + $0x70] sm:$0xf] %vm933_vm3, %v894_v15  ;;  %2576 = vrot.lane.b32.xlu1 %v5564_v10, %s6059_s27  ;;  %v5983_v10 = vld [vmem:[%s7259_s1 + $0x8] sm:$0xff]   ;;  %v5630_v15 = vpack.c.bf16 %v3149_v3, %v3149_v3  ;;  %v2382_v3 = vrot.slane %v2280_v58, 4 }
  0xc5   : > { %2574 = vrot.lane.b32.xlu0 %v5563_v11, %s6059_s27  ;;  %v3623_v11 = vsel %vm1110_vm2, %v3621_v59, %v3622_v55  ;;  %5839 = vmatprep.subr.bf16.mxu0 %v5983_v10  ;;  %v2379_v59 = vrot.slane %v2278_v47, 4  ;;  %v5973_v47 = vld [vmem:[%s6112_s22 + $0x54] ss:$0 sps:$4 sm:$0xff]  }
  0xc6   : > { %v900_v25 = vpop.permute.xlu1 %899  ;;  %5876 = vmatprep.subr.bf16.mxu1 %v5983_v10  ;;  %v5659_v24 = vpack.c.bf16 %v3623_v11, %v3623_v11  ;;  %5840 = vmatpush3.bf16.msra.mxu0 %v5983_v10  ;;  %v5567_v11 = vpack.c.bf16 %v2378_v5, %v2378_v5 }
  0xc7   : > { %v898_v26 = vpop.permute.xlu0 %897  ;;  %965 = vst.msk [vmem:[#allocation2 + $0x7c] sm:$0xf] %vm933_vm3, %v900_v25  ;;  %v5984_v25 = vld [vmem:[%s7259_s1] sm:$0xff]   ;;  %5879 = vmatpush3.bf16.msra.mxu1 %v5983_v10  ;;  %v2380_v4 = vsel %vm1110_vm2, %v2377_v57, %v2379_v59 }
  0xc8   : > { %964 = vst.msk [vmem:[#allocation2 + $0x78] sm:$0xf] %vm933_vm3, %v898_v26  ;;  %2580 = vrot.lane.b32.xlu1 %v5566_v19, %s6059_s27  ;;  %v4944_v19 = vld [vmem:[%s6112_s22 + $0x44] sm:$0x1]  ;;  %v3630_v26 = vsel %vm1110_vm2, %v3627_v9, %v3629_v12  ;;  %5841 = vmatprep.subr.bf16.mxu0 %v5984_v25  ;;  %v5568_v10 = vpack.c.bf16 %v2380_v4, %v2380_v4  ;;  %v5180_v12 = vld [vmem:[%s6112_s22 + $0x4c] ss:$12 sps:$4 sm:$0xff]  }
  0xc9   : > { %2578 = vrot.lane.b32.xlu0 %v5565_v20, %s6059_s27  ;;  %v4942_v20 = vld [vmem:[%s6112_s22 + $0x3c] sm:$0xe]  ;;  %v1800_v32 = vunpack.c.l.bf16 %v4944_v19  ;;  %5877 = vmatprep.subr.bf16.mxu1 %v5984_v25  ;;  %v3051_v19 = vunpack.c.l.bf16 %v5180_v12 }
  0xca   : > { %v1322_v39 = vpop.permute.xlu1 %1321  ;;  %v1798_v33 = vunpack.c.l.bf16 %v4942_v20  ;;  %5842 = vmatpush3.bf16.msra.mxu0 %v5984_v25  ;;  %v3052_v20 = vunpack.c.l.bf16 %v5181_v13 }
  0xcb   : > { %v1320_v40 = vpop.permute.xlu0 %1319  ;;  %1417 = vst.msk [vmem:[#allocation2 + $0x4] sm:$0xf] %vm1415_vm4, %v1322_v39  ;;  %5880 = vmatpush3.bf16.msra.mxu1 %v5984_v25  ;;  %v5662_v39 = vpack.c.bf16 %v3630_v26, %v3630_v26  ;;  %v1903_v44 = vrot.slane %v1800_v32, 2  ;;  %v5182_v25 = vld [vmem:[%s6112_s22 + $0x54] sm:$0xe]  ;;  %v3151_v29 = vrot.slane %v3051_v19, 2 }
  0xcc   : > { %1416 = vst.msk [vmem:[#allocation2] sm:$0xf] %vm1415_vm4, %v1320_v40  ;;  %2869 = vrot.lane.b32.xlu1 %v5966_v28, %s6060_s28  ;;  %v1898_v28 = vrot.slane %v1797_v14, 2  ;;  %v5661_v40 = vpack.c.bf16 %v3628_v30, %v3628_v30  ;;  %v3153_v30 = vrot.slane %v3052_v20, 2 }
  0xcd   : > { %2867 = vrot.lane.b32.xlu0 %v5967_v31, %s6060_s28  ;;  %v1895_v31 = vrot.slane %v1795_v18, 2  ;;  %v1904_v55 = vsel %vm628_vm0, %v1901_v42, %v1903_v44  ;;  %v5179_v18 = vld [vmem:[%s6112_s22 + $0x48] sm:$0xe] }
  0xce   : > { %v1326_v53 = vpop.permute.xlu1 %1325  ;;  %v1899_v41 = vsel %vm628_vm0, %v1896_v27, %v1898_v28  ;;  %v5538_v1 = vpack.c.bf16 %v1904_v55, %v1904_v55  ;;  %v5970_v28 = vld [vmem:[%s6112_s22 + $0x4c] ss:$0 sps:$4 sm:$0xff]  }
  0xcf   : > { %v1324_v54 = vpop.permute.xlu0 %1323  ;;  %1419 = vst.msk [vmem:[#allocation2 + $0xc] sm:$0xf] %vm1415_vm4, %v1326_v53  ;;  %v5536_v53 = vpack.c.bf16 %v1899_v41, %v1899_v41 }
  0xd0   : > { %1418 = vst.msk [vmem:[#allocation2 + $0x8] sm:$0xf] %vm1415_vm4, %v1324_v54  ;;  %2873 = vrot.lane.b32.xlu1 %v5968_v43, %s6060_s28  ;;  %v1897_v43 = vsel %vm628_vm0, %v1895_v31, %v1896_v27  ;;  %v3054_v31 = vunpack.c.h.bf16 %v5180_v12 }
  0xd1   : > { %2871 = vrot.lane.b32.xlu0 %v5969_v45, %s6060_s28  ;;  %v1900_v45 = vrot.slane %v1798_v33, 2  ;;  %v5535_v54 = vpack.c.bf16 %v1897_v43, %v1897_v43  ;;  %v5260_v33 = vld [vmem:[%s6112_s22 + $0x4c] ss:$12 sps:$4 sm:$0xff]   ;;  %v3154_v43 = vsel %vm628_vm0, %v3151_v29, %v3153_v30 }
  0xd2   : > { %v1330_v6 = vpop.permute.xlu1 %1329  ;;  %v3532_v41 = vunpack.c.l.bf16 %v5260_v33  ;;  %v3156_v44 = vrot.slane %v3054_v31, 2  ;;  %v5632_v55 = vpack.c.bf16 %v3154_v43, %v3154_v43  ;;  %v3535_v59 = vunpack.c.h.bf16 %v5260_v33  ;;  %v5026_v30 = vld [vmem:[%s6112_s22 + $0x4c] ss:$12 sps:$4 sm:$0xff]   ;;  %v5027_v31 = vld [vmem:[%s6112_s22 + $0x50] sm:$0x3] }
  0xd3   : > { %v1328_v7 = vpop.permute.xlu0 %1327  ;;  %1421 = vst.msk [vmem:[#allocation2 + $0x14] sm:$0xf] %vm1415_vm4, %v1330_v6  ;;  %v1902_v56 = vsel %vm628_vm0, %v1900_v45, %v1901_v42  ;;  %v5972_v42 = vld [vmem:[%s6112_s22 + $0x58] ss:$0 sps:$4 sm:$0xff]  }
  0xd4   : > { %1420 = vst.msk [vmem:[#allocation2 + $0x10] sm:$0xf] %vm1415_vm4, %v1328_v7  ;;  %3350 = vrot.lane.b32.xlu1 %v5628_v61, %s6061_s7  ;;  %v2281_v61 = vunpack.c.l.bf16 %v5024_v51  ;;  %v5537_v2 = vpack.c.bf16 %v1902_v56, %v1902_v56  ;;  %v3632_v56 = vrot.slane %v3532_v41, 4  ;;  %v2283_v41 = vunpack.c.l.bf16 %v5026_v30 }
  0xd5   : > { %3348 = vrot.lane.b32.xlu0 %v5627_v62, %s6061_s7  ;;  %v2279_v62 = vunpack.c.l.bf16 %v5022_v52  ;;  %v5262_v52 = vld [vmem:[%s6112_s22 + $0x54] sm:$0xc] }
  0xd6   : > { %v1334_v21 = vpop.permute.xlu1 %1333  ;;  %v2384_v6 = vrot.slane %v2281_v61, 4 }
  0xd7   : > { %v1332_v22 = vpop.permute.xlu0 %1331  ;;  %1423 = vst.msk [vmem:[#allocation2 + $0x1c] sm:$0xf] %vm1415_vm4, %v1334_v21  ;;  %v2381_v7 = vrot.slane %v2279_v62, 4 }
  0xd8   : > { %1422 = vst.msk [vmem:[#allocation2 + $0x18] sm:$0xf] %vm1415_vm4, %v1332_v22  ;;  %3354 = vrot.lane.b32.xlu1 %v5630_v15, %s6061_s7  ;;  %v2385_v14 = vsel %vm1110_vm2, %v2382_v3, %v2384_v6  ;;  %v4945_v6 = vld [vmem:[%s6112_s22 + $0x48] sm:$0xe] }
  0xd9   : > { %3352 = vrot.lane.b32.xlu0 %v5629_v16, %s6061_s7  ;;  %v2383_v15 = vsel %vm1110_vm2, %v2381_v7, %v2382_v3  ;;  %v5570_v21 = vpack.c.bf16 %v2385_v14, %v2385_v14 }
  0xda   : > { %v1338_v35 = vpop.permute.xlu1 %1337  ;;  %v5569_v22 = vpack.c.bf16 %v2383_v15, %v2383_v15  ;;  %v4950_v15 = vld [vmem:[%s6112_s22 + $0x5c] sm:$0x1] }
  0xdb   : > { %v1336_v36 = vpop.permute.xlu0 %1335  ;;  %1425 = vst.msk [vmem:[#allocation2 + $0x24] sm:$0xf] %vm1415_vm4, %v1338_v35  ;;  %v3053_v35 = vunpack.c.l.bf16 %v5182_v25 }
  0xdc   : > { %1424 = vst.msk [vmem:[#allocation2 + $0x20] sm:$0xf] %vm1415_vm4, %v1336_v36  ;;  %3831 = vrot.lane.b32.xlu1 %v5660_v23, %s6062_s10  ;;  %v5184_v23 = vld [vmem:[%s6112_s22 + $0x5c] sm:$0x1]  ;;  %v5261_v36 = vld [vmem:[%s6112_s22 + $0x50] sm:$0x3] }
  0xdd   : > { %3829 = vrot.lane.b32.xlu0 %v5659_v24, %s6062_s10  ;;  %v3050_v24 = vunpack.c.l.bf16 %v5179_v18  ;;  %v3055_v32 = vunpack.c.l.bf16 %v5184_v23  ;;  %v3533_v46 = vunpack.c.l.bf16 %v5261_v36  ;;  %v3155_v48 = vrot.slane %v3053_v35, 2 }
  0xde   : > { %v1342_v49 = vpop.permute.xlu1 %1341 }
  0xdf   : > { %v1340_v50 = vpop.permute.xlu0 %1339  ;;  %1427 = vst.msk [vmem:[#allocation2 + $0x2c] sm:$0xf] %vm1415_vm4, %v1342_v49  ;;  %v3150_v37 = vrot.slane %v3050_v24, 2  ;;  %v3158_v45 = vrot.slane %v3055_v32, 2  ;;  %v3531_v49 = vunpack.c.l.bf16 %v5259_v38  ;;  %v3634_v58 = vrot.slane %v3533_v46, 4 }
  0xe0   : > { %1426 = vst.msk [vmem:[#allocation2 + $0x28] sm:$0xf] %vm1415_vm4, %v1340_v50  ;;  %3835 = vrot.lane.b32.xlu1 %v5662_v39, %s6062_s10  ;;  %v5264_v50 = vld [vmem:[%s6112_s22 + $0x5c] sm:$0x3]  ;;  %v3157_v62 = vsel %vm628_vm0, %v3155_v48, %v3156_v44  ;;  %v1806_v24 = vunpack.c.l.bf16 %v4950_v15  ;;  %v5028_v48 = vld [vmem:[%s6112_s22 + $0x54] sm:$0xc] }
  0xe1   : > { %3833 = vrot.lane.b32.xlu0 %v5661_v40, %s6062_s10  ;;  %v3152_v51 = vsel %vm628_vm0, %v3150_v37, %v3151_v29  ;;  %v3159_v57 = vsel %vm628_vm0, %v3156_v44, %v3158_v45  ;;  %v3536_v60 = vunpack.c.l.bf16 %v5264_v50  ;;  %v5633_v7 = vpack.c.bf16 %v3157_v62, %v3157_v62 }
  0xe2   : > { %v1346_v63 = vpop.permute.xlu1 %1345  ;;  %v5631_v61 = vpack.c.bf16 %v3152_v51, %v3152_v51  ;;  %v5634_v5 = vpack.c.bf16 %v3159_v57, %v3159_v57  ;;  %v1913_v38 = vrot.slane %v1806_v24, 2  ;;  %v5974_v24 = vld [vmem:[%s6112_s22 + $0x64] ss:$0 sps:$4 sm:$0xff]  }
  0xe3   : > { %v1344_v0 = vpop.permute.xlu0 %1343  ;;  %1429 = vst.msk [vmem:[#allocation2 + $0x34] sm:$0xf] %vm1415_vm4, %v1346_v63  ;;  %v3631_v63 = vrot.slane %v3531_v49, 4 }
  0xe4   : > { %1428 = vst.msk [vmem:[#allocation2 + $0x30] sm:$0xf] %vm1415_vm4, %v1344_v0  ;;  %2103 = vrot.lane.b32.xlu1 %v5536_v53, %s6058_s26  ;;  %v3534_v0 = vunpack.c.l.bf16 %v5262_v52 }
  0xe5   : > { %2101 = vrot.lane.b32.xlu0 %v5535_v54, %s6058_s26 }
  0xe6   : > { %v1350_v8 = vpop.permute.xlu1 %1349  ;;  %v3636_v12 = vrot.slane %v3534_v0, 4 }
  0xe7   : > { %v1348_v9 = vpop.permute.xlu0 %1347  ;;  %1431 = vst.msk [vmem:[#allocation2 + $0x3c] sm:$0xf] %vm1415_vm4, %v1350_v8  ;;  %v3635_v8 = vsel %vm1110_vm2, %v3632_v56, %v3634_v58  ;;  %v2285_v58 = vunpack.c.l.bf16 %v5028_v48  ;;  %v5268_v48 = vld [vmem:[%s6112_s22 + $0x6c] sm:$0xc] }
  0xe8   : > { %1430 = vst.msk [vmem:[#allocation2 + $0x38] sm:$0xf] %vm1415_vm4, %v1348_v9  ;;  %2107 = vrot.lane.b32.xlu1 %v5538_v1, %s6058_s26  ;;  %v4946_v1 = vld [vmem:[%s6112_s22 + $0x4c] ss:$12 sps:$4 sm:$0xff]   ;;  %v3637_v9 = vrot.slane %v3535_v59, 4  ;;  %v5664_v20 = vpack.c.bf16 %v3635_v8, %v3635_v8 }
  0xe9   : > { %2105 = vrot.lane.b32.xlu0 %v5537_v2, %s6058_s26  ;;  %v4947_v2 = vld [vmem:[%s6112_s22 + $0x50] sm:$0x1]  ;;  %v1802_v13 = vunpack.c.l.bf16 %v4946_v1  ;;  %v1805_v23 = vunpack.c.h.bf16 %v4946_v1 }
  0xea   : > { %v1354_v16 = vpop.permute.xlu1 %1353  ;;  %v1803_v14 = vunpack.c.l.bf16 %v4947_v2  ;;  %v3638_v25 = vsel %vm1110_vm2, %v3636_v12, %v3637_v9  ;;  %v5186_v8 = vld [vmem:[%s6112_s22 + $0x64] ss:$12 sps:$4 sm:$0xff]   ;;  %v5185_v12 = vld [vmem:[%s6112_s22 + $0x60] sm:$0xe] }
  0xeb   : > { %v1352_v17 = vpop.permute.xlu0 %1351  ;;  %1433 = vst.msk [vmem:[#allocation2 + $0x44] sm:$0xf] %vm1415_vm4, %v1354_v16  ;;  %v1801_v16 = vunpack.c.l.bf16 %v4945_v6  ;;  %v5665_v36 = vpack.c.bf16 %v3638_v25, %v3638_v25  ;;  %v1911_v37 = vrot.slane %v1805_v23, 2  ;;  %v3057_v15 = vunpack.c.l.bf16 %v5186_v8  ;;  %v5188_v23 = vld [vmem:[%s6112_s22 + $0x6c] sm:$0xe] }
  0xec   : > { %1432 = vst.msk [vmem:[#allocation2 + $0x40] sm:$0xf] %vm1415_vm4, %v1352_v17  ;;  %2584 = vrot.lane.b32.xlu1 %v5568_v10, %s6059_s27  ;;  %v3639_v10 = vrot.slane %v3536_v60, 4  ;;  %v4948_v17 = vld [vmem:[%s6112_s22 + $0x54] sm:$0xe] }
  0xed   : > { %2582 = vrot.lane.b32.xlu0 %v5567_v11, %s6059_s27  ;;  %v3633_v11 = vsel %vm1110_vm2, %v3631_v63, %v3632_v56  ;;  %v1905_v29 = vrot.slane %v1801_v16, 2  ;;  %v1914_v50 = vsel %vm628_vm0, %v1911_v37, %v1913_v38  ;;  %v2286_v56 = vunpack.c.h.bf16 %v5026_v30  ;;  %v5975_v25 = vld [vmem:[%s6112_s22 + $0x60] ss:$0 sps:$4 sm:$0xff]   ;;  %v5267_v30 = vld [vmem:[%s6112_s22 + $0x68] sm:$0x3] }
  0xee   : > { %v1358_v26 = vpop.permute.xlu1 %1357  ;;  %v3539_v38 = vunpack.c.l.bf16 %v5267_v30 }
  0xef   : > { %v1356_v27 = vpop.permute.xlu0 %1355  ;;  %1435 = vst.msk [vmem:[#allocation2 + $0x4c] sm:$0xf] %vm1415_vm4, %v1358_v26  ;;  %v1906_v26 = vrot.slane %v1802_v13, 2  ;;  %v2392_v1 = vrot.slane %v2286_v56, 4 }
  0xf0   : > { %1434 = vst.msk [vmem:[#allocation2 + $0x48] sm:$0xf] %vm1415_vm4, %v1356_v27  ;;  %2588 = vrot.lane.b32.xlu1 %v5570_v21, %s6059_s27  ;;  %v5663_v21 = vpack.c.bf16 %v3633_v11, %v3633_v11  ;;  %v1908_v27 = vrot.slane %v1803_v14, 2  ;;  %v5187_v11 = vld [vmem:[%s6112_s22 + $0x68] sm:$0x1] }
  0xf1   : > { %2586 = vrot.lane.b32.xlu0 %v5569_v22, %s6059_s27  ;;  %v3640_v22 = vsel %vm1110_vm2, %v3637_v9, %v3639_v10  ;;  %v1907_v43 = vsel %vm628_vm0, %v1905_v29, %v1906_v26  ;;  %v5266_v29 = vld [vmem:[%s6112_s22 + $0x64] ss:$12 sps:$4 sm:$0xff]  }
  0xf2   : > { %v1362_v39 = vpop.permute.xlu1 %1361  ;;  %v5666_v35 = vpack.c.bf16 %v3640_v22, %v3640_v22  ;;  %v5539_v51 = vpack.c.bf16 %v1907_v43, %v1907_v43  ;;  %v5190_v22 = vld [vmem:[%s6112_s22 + $0x74] sm:$0x1] }
  0xf3   : > { %v1360_v40 = vpop.permute.xlu0 %1359  ;;  %1437 = vst.msk [vmem:[#allocation2 + $0x54] sm:$0xf] %vm1415_vm4, %v1362_v39  ;;  %v1909_v39 = vsel %vm628_vm0, %v1906_v26, %v1908_v27  ;;  %v3161_v26 = vrot.slane %v3057_v15, 2 }
  0xf4   : > { %1436 = vst.msk [vmem:[#allocation2 + $0x50] sm:$0xf] %vm1415_vm4, %v1360_v40  ;;  %2877 = vrot.lane.b32.xlu1 %v5970_v28, %s6060_s28  ;;  %v1804_v28 = vunpack.c.l.bf16 %v4948_v17  ;;  %v5540_v49 = vpack.c.bf16 %v1909_v39, %v1909_v39  ;;  %v5270_v39 = vld [vmem:[%s6112_s22 + $0x74] sm:$0x3] }
  0xf5   : > { %2875 = vrot.lane.b32.xlu0 %v5971_v34, %s6060_s28  ;;  %v5025_v34 = vld [vmem:[%s6112_s22 + $0x48] sm:$0xc] }
  0xf6   : > { %v1366_v53 = vpop.permute.xlu1 %1365  ;;  %v1910_v40 = vrot.slane %v1804_v28, 2  ;;  %v2282_v44 = vunpack.c.l.bf16 %v5025_v34 }
  0xf7   : > { %v1364_v54 = vpop.permute.xlu0 %1363  ;;  %1439 = vst.msk [vmem:[#allocation2 + $0x5c] sm:$0xf] %vm1415_vm4, %v1366_v53  ;;  %v2387_v53 = vrot.slane %v2283_v41, 4  ;;  %v5977_v41 = vld [vmem:[%s6112_s22 + $0x6c] ss:$0 sps:$4 sm:$0xff]  }
  0xf8   : > { %1438 = vst.msk [vmem:[#allocation2 + $0x58] sm:$0xf] %vm1415_vm4, %v1364_v54  ;;  %2881 = vrot.lane.b32.xlu1 %v5972_v42, %s6060_s28  ;;  %v2284_v42 = vunpack.c.l.bf16 %v5027_v31  ;;  %v1912_v52 = vsel %vm628_vm0, %v1910_v40, %v1911_v37  ;;  %v3060_v31 = vunpack.c.h.bf16 %v5186_v8  ;;  %v3538_v37 = vunpack.c.l.bf16 %v5266_v29  ;;  %v5976_v40 = vld [vmem:[%s6112_s22 + $0x70] ss:$0 sps:$4 sm:$0xff]  }
  0xf9   : > { %2879 = vrot.lane.b32.xlu0 %v5973_v47, %s6060_s28  ;;  %v5030_v47 = vld [vmem:[%s6112_s22 + $0x5c] sm:$0x3]  ;;  %v5541_v62 = vpack.c.bf16 %v1912_v52, %v1912_v52  ;;  %v3542_v52 = vunpack.c.l.bf16 %v5270_v39 }
  0xfa   : > { %v1370_v3 = vpop.permute.xlu1 %1369  ;;  %v2389_v54 = vrot.slane %v2284_v42, 4  ;;  %v2287_v57 = vunpack.c.l.bf16 %v5030_v47 }
  0xfb   : > { %v1368_v4 = vpop.permute.xlu0 %1367  ;;  %1441 = vst.msk [vmem:[#allocation2 + $0x64] sm:$0xf] %vm1415_vm4, %v1370_v3  ;;  %v2391_v3 = vrot.slane %v2285_v58, 4  ;;  %v3540_v58 = vunpack.c.l.bf16 %v5268_v48 }
  0xfc   : > { %1440 = vst.msk [vmem:[#allocation2 + $0x60] sm:$0xf] %vm1415_vm4, %v1368_v4  ;;  %3358 = vrot.lane.b32.xlu1 %v5632_v55, %s6061_s7  ;;  %v2386_v55 = vrot.slane %v2282_v44, 4  ;;  %v2390_v63 = vsel %vm1110_vm2, %v2387_v53, %v2389_v54  ;;  %v2394_v2 = vrot.slane %v2287_v57, 4  ;;  %v3166_v44 = vrot.slane %v3060_v31, 2 }
  0xfd   : > { %3356 = vrot.lane.b32.xlu0 %v5631_v61, %s6061_s7  ;;  %v5542_v61 = vpack.c.bf16 %v1914_v50, %v1914_v50  ;;  %v5572_v6 = vpack.c.bf16 %v2390_v63, %v2390_v63  ;;  %v2393_v10 = vsel %vm1110_vm2, %v2391_v3, %v2392_v1  ;;  %v3644_v54 = vrot.slane %v3539_v38, 4  ;;  %v5031_v31 = vld [vmem:[%s6112_s22 + $0x60] sm:$0xc] }
  0xfe   : > { %v1374_v18 = vpop.permute.xlu1 %1373  ;;  %v2388_v0 = vsel %vm1110_vm2, %v2386_v55, %v2387_v53  ;;  %v2395_v9 = vsel %vm1110_vm2, %v2392_v1, %v2394_v2  ;;  %v5573_v17 = vpack.c.bf16 %v2393_v10, %v2393_v10  ;;  %v3642_v53 = vrot.slane %v3538_v37, 4  ;;  %v4952_v55 = vld [vmem:[%s6112_s22 + $0x64] ss:$12 sps:$4 sm:$0xff]  }
  0xff   : > { %v1372_v19 = vpop.permute.xlu0 %1371  ;;  %1443 = vst.msk [vmem:[#allocation2 + $0x6c] sm:$0xf] %vm1415_vm4, %v1374_v18  ;;  %v5574_v16 = vpack.c.bf16 %v2395_v9, %v2395_v9  ;;  %v3058_v18 = vunpack.c.l.bf16 %v5187_v11  ;;  %v3649_v3 = vrot.slane %v3542_v52, 4  ;;  %v3646_v10 = vrot.slane %v3540_v58, 4 }
 0x100   : > { %1442 = vst.msk [vmem:[#allocation2 + $0x68] sm:$0xf] %vm1415_vm4, %v1372_v19  ;;  %3362 = vrot.lane.b32.xlu1 %v5634_v5, %s6061_s7  ;;  %v3056_v19 = vunpack.c.l.bf16 %v5185_v12  ;;  %v4956_v12 = vld [vmem:[%s6112_s22 + $0x74] sm:$0x1] }
 0x101   : > { %3360 = vrot.lane.b32.xlu0 %v5633_v7, %s6061_s7  ;;  %v5571_v7 = vpack.c.bf16 %v2388_v0, %v2388_v0  ;;  %v3163_v27 = vrot.slane %v3058_v18, 2 }
 0x102   : > { %v1378_v32 = vpop.permute.xlu1 %1377  ;;  %v3160_v28 = vrot.slane %v3056_v19, 2 }
 0x103   : > { %v1376_v33 = vpop.permute.xlu0 %1375  ;;  %1445 = vst.msk [vmem:[#allocation2 + $0x74] sm:$0xf] %vm1415_vm4, %v1378_v32  ;;  %v3061_v32 = vunpack.c.l.bf16 %v5190_v22  ;;  %v3164_v42 = vsel %vm628_vm0, %v3161_v26, %v3163_v27  ;;  %v5033_v27 = vld [vmem:[%s6112_s22 + $0x68] sm:$0x3] }
 0x104   : > { %1444 = vst.msk [vmem:[#allocation2 + $0x70] sm:$0xf] %vm1415_vm4, %v1376_v33  ;;  %3839 = vrot.lane.b32.xlu1 %v5664_v20, %s6062_s10  ;;  %v3059_v33 = vunpack.c.l.bf16 %v5188_v23  ;;  %v3162_v43 = vsel %vm628_vm0, %v3160_v28, %v3161_v26  ;;  %v5636_v56 = vpack.c.bf16 %v3164_v42, %v3164_v42  ;;  %v5032_v26 = vld [vmem:[%s6112_s22 + $0x64] ss:$12 sps:$4 sm:$0xff]   ;;  %v2290_v39 = vunpack.c.l.bf16 %v5033_v27 }
 0x105   : > { %3837 = vrot.lane.b32.xlu0 %v5663_v21, %s6062_s10  ;;  %v5635_v57 = vpack.c.bf16 %v3162_v43, %v3162_v43  ;;  %v2289_v38 = vunpack.c.l.bf16 %v5032_v26  ;;  %v5036_v43 = vld [vmem:[%s6112_s22 + $0x74] sm:$0x3]  ;;  %v2292_v52 = vunpack.c.h.bf16 %v5032_v26 }
 0x106   : > { %v1382_v45 = vpop.permute.xlu1 %1381 }
 0x107   : > { %v1380_v46 = vpop.permute.xlu0 %1379  ;;  %1447 = vst.msk [vmem:[#allocation2 + $0x7c] sm:$0xf] %vm1415_vm4, %v1382_v45  ;;  %v3168_v45 = vrot.slane %v3061_v32, 2 }
 0x108   : > { %1446 = vst.msk [vmem:[#allocation2 + $0x78] sm:$0xf] %vm1415_vm4, %v1380_v46  ;;  %3843 = vrot.lane.b32.xlu1 %v5666_v35, %s6062_s10  ;;  %v3165_v46 = vrot.slane %v3059_v33, 2 }
 0x109   : > { %3841 = vrot.lane.b32.xlu0 %v5665_v36, %s6062_s10  ;;  %v5265_v36 = vld [vmem:[%s6112_s22 + $0x60] sm:$0xc] }
 0x10a   : > { %v1615_v59 = vpop.permute.xlu1 %1614  ;;  %v3537_v47 = vunpack.c.l.bf16 %v5265_v36 }
 0x10b   : > { %v1613_v60 = vpop.permute.xlu0 %1612  ;;  %1710 = vst.msk [vmem:[#allocation2 + $0x4] sm:$0xf] %vm1708_vm6, %v1615_v59  ;;  %v4953_v59 = vld [vmem:[%s6112_s22 + $0x68] sm:$0x1] }
 0x10c   : > { %1709 = vst.msk [vmem:[#allocation2] sm:$0xf] %vm1708_vm6, %v1613_v60  ;;  %2111 = vrot.lane.b32.xlu1 %v5540_v49, %s6058_s26  ;;  %v4951_v60 = vld [vmem:[%s6112_s22 + $0x60] sm:$0xe]  ;;  %v3641_v63 = vrot.slane %v3537_v47, 4 }
 0x10d   : > { %2109 = vrot.lane.b32.xlu0 %v5539_v51, %s6058_s26  ;;  %v3541_v51 = vunpack.c.h.bf16 %v5266_v29 }
 0x10e   : > { %v1619_v4 = vpop.permute.xlu1 %1618  ;;  %v3643_v11 = vsel %vm1110_vm2, %v3641_v63, %v3642_v53 }
 0x10f   : > { %v1617_v5 = vpop.permute.xlu0 %1616  ;;  %1712 = vst.msk [vmem:[#allocation2 + $0xc] sm:$0xf] %vm1708_vm6, %v1619_v4  ;;  %v3647_v2 = vrot.slane %v3541_v51, 4  ;;  %v3645_v4 = vsel %vm1110_vm2, %v3642_v53, %v3644_v54  ;;  %v5667_v22 = vpack.c.bf16 %v3643_v11, %v3643_v11  ;;  %v2293_v53 = vunpack.c.l.bf16 %v5036_v43 }
 0x110   : > { %1711 = vst.msk [vmem:[#allocation2 + $0x8] sm:$0xf] %vm1708_vm6, %v1617_v5  ;;  %2115 = vrot.lane.b32.xlu1 %v5542_v61, %s6058_s26  ;;  %v3169_v61 = vsel %vm628_vm0, %v3166_v44, %v3168_v45  ;;  %v1808_v5 = vunpack.c.l.bf16 %v4952_v55 }
 0x111   : > { %2113 = vrot.lane.b32.xlu0 %v5541_v62, %s6058_s26  ;;  %v3167_v62 = vsel %vm628_vm0, %v3165_v46, %v3166_v44  ;;  %v5638_v8 = vpack.c.bf16 %v3169_v61, %v3169_v61  ;;  %v3648_v23 = vsel %vm1110_vm2, %v3646_v10, %v3647_v2  ;;  %v5034_v44 = vld [vmem:[%s6112_s22 + $0x6c] sm:$0xc]  ;;  %v2402_v61 = vrot.slane %v2292_v52, 4 }
 0x112   : > { %v1623_v13 = vpop.permute.xlu1 %1622  ;;  %v5637_v9 = vpack.c.bf16 %v3167_v62, %v3167_v62  ;;  %v1916_v18 = vrot.slane %v1808_v5, 2  ;;  %v5669_v32 = vpack.c.bf16 %v3648_v23, %v3648_v23  ;;  %v2291_v54 = vunpack.c.l.bf16 %v5034_v44  ;;  %v5193_v5 = vld [vmem:[%s6112_s22 + $0x80] sm:$0x1] }
 0x113   : > { %v1621_v14 = vpop.permute.xlu0 %1620  ;;  %1714 = vst.msk [vmem:[#allocation2 + $0x14] sm:$0xf] %vm1708_vm6, %v1623_v13  ;;  %v4954_v13 = vld [vmem:[%s6112_s22 + $0x6c] sm:$0xe]  ;;  %v2404_v62 = vrot.slane %v2293_v53, 4 }
 0x114   : > { %1713 = vst.msk [vmem:[#allocation2 + $0x10] sm:$0xf] %vm1708_vm6, %v1621_v14  ;;  %2592 = vrot.lane.b32.xlu1 %v5572_v6, %s6059_s27  ;;  %v1809_v6 = vunpack.c.l.bf16 %v4953_v59  ;;  %v2401_v63 = vrot.slane %v2291_v54, 4 }
 0x115   : > { %2590 = vrot.lane.b32.xlu0 %v5571_v7, %s6059_s27  ;;  %v1807_v7 = vunpack.c.l.bf16 %v4951_v60 }
 0x116   : > { %v1627_v20 = vpop.permute.xlu1 %1626  ;;  %v1918_v19 = vrot.slane %v1809_v6, 2  ;;  %v5191_v6 = vld [vmem:[%s6112_s22 + $0x78] sm:$0xe] }
 0x117   : > { %v1625_v21 = vpop.permute.xlu0 %1624  ;;  %1716 = vst.msk [vmem:[#allocation2 + $0x1c] sm:$0xf] %vm1708_vm6, %v1627_v20  ;;  %v1915_v20 = vrot.slane %v1807_v7, 2  ;;  %v2405_v7 = vsel %vm1110_vm2, %v2402_v61, %v2404_v62 }
 0x118   : > { %1715 = vst.msk [vmem:[#allocation2 + $0x18] sm:$0xf] %vm1708_vm6, %v1625_v21  ;;  %2596 = vrot.lane.b32.xlu1 %v5574_v16, %s6059_s27  ;;  %v5668_v16 = vpack.c.bf16 %v3645_v4, %v3645_v4  ;;  %v1811_v21 = vunpack.c.h.bf16 %v4952_v55  ;;  %v1919_v33 = vsel %vm628_vm0, %v1916_v18, %v1918_v19 }
 0x119   : > { %2594 = vrot.lane.b32.xlu0 %v5573_v17, %s6059_s27  ;;  %v3650_v17 = vsel %vm1110_vm2, %v3647_v2, %v3649_v3  ;;  %v5544_v45 = vpack.c.bf16 %v1919_v33, %v1919_v33  ;;  %v5192_v2 = vld [vmem:[%s6112_s22 + $0x7c] ss:$12 sps:$4 sm:$0xff]  }
 0x11a   : > { %v1631_v34 = vpop.permute.xlu1 %1630  ;;  %v5670_v30 = vpack.c.bf16 %v3650_v17, %v3650_v17  ;;  %v3063_v11 = vunpack.c.l.bf16 %v5192_v2  ;;  %v5194_v17 = vld [vmem:[%s6112_s22 + $0x84] sm:$0xe]  ;;  %v3066_v23 = vunpack.c.h.bf16 %v5192_v2 }
 0x11b   : > { %v1629_v35 = vpop.permute.xlu0 %1628  ;;  %1718 = vst.msk [vmem:[#allocation2 + $0x24] sm:$0xf] %vm1708_vm6, %v1631_v34  ;;  %v1917_v34 = vsel %vm628_vm0, %v1915_v20, %v1916_v18  ;;  %v3065_v27 = vunpack.c.l.bf16 %v5194_v17 }
 0x11c   : > { %1717 = vst.msk [vmem:[#allocation2 + $0x20] sm:$0xf] %vm1708_vm6, %v1629_v35  ;;  %2885 = vrot.lane.b32.xlu1 %v5974_v24, %s6060_s28  ;;  %v1812_v24 = vunpack.c.l.bf16 %v4956_v12  ;;  %v1921_v35 = vrot.slane %v1811_v21, 2  ;;  %v5543_v46 = vpack.c.bf16 %v1917_v34, %v1917_v34  ;;  %v3064_v12 = vunpack.c.l.bf16 %v5193_v5 }
 0x11d   : > { %2883 = vrot.lane.b32.xlu0 %v5975_v25, %s6060_s28  ;;  %v1810_v25 = vunpack.c.l.bf16 %v4954_v13  ;;  %v3062_v13 = vunpack.c.l.bf16 %v5191_v6  ;;  %v3171_v20 = vrot.slane %v3063_v11, 2 }
 0x11e   : > { %v1635_v49 = vpop.permute.xlu1 %1634  ;;  %v1923_v36 = vrot.slane %v1812_v24, 2  ;;  %v3173_v21 = vrot.slane %v3064_v12, 2  ;;  %v5978_v24 = vld [vmem:[%s6112_s22 + $0x7c] ss:$0 sps:$4 sm:$0xff]  }
 0x11f   : > { %v1633_v50 = vpop.permute.xlu0 %1632  ;;  %1720 = vst.msk [vmem:[#allocation2 + $0x2c] sm:$0xf] %vm1708_vm6, %v1635_v49  ;;  %v1920_v37 = vrot.slane %v1810_v25, 2  ;;  %v2397_v49 = vrot.slane %v2289_v38, 4  ;;  %v5979_v25 = vld [vmem:[%s6112_s22 + $0x78] ss:$0 sps:$4 sm:$0xff]  }
 0x120   : > { %1719 = vst.msk [vmem:[#allocation2 + $0x28] sm:$0xf] %vm1708_vm6, %v1633_v50  ;;  %2889 = vrot.lane.b32.xlu1 %v5976_v40, %s6060_s28  ;;  %v2288_v40 = vunpack.c.l.bf16 %v5031_v31  ;;  %v1924_v47 = vsel %vm628_vm0, %v1921_v35, %v1923_v36  ;;  %v2399_v50 = vrot.slane %v2290_v39, 4  ;;  %v3174_v33 = vsel %vm628_vm0, %v3171_v20, %v3173_v21  ;;  %v5980_v36 = vld [vmem:[%s6112_s22 + $0x88] ss:$0 sps:$4 sm:$0xff]  }
 0x121   : > { %2887 = vrot.lane.b32.xlu0 %v5977_v41, %s6060_s28  ;;  %v1922_v48 = vsel %vm628_vm0, %v1920_v37, %v1921_v35  ;;  %v3176_v35 = vrot.slane %v3066_v23, 2  ;;  %v5981_v37 = vld [vmem:[%s6112_s22 + $0x84] ss:$0 sps:$4 sm:$0xff]   ;;  %v3175_v39 = vrot.slane %v3065_v27, 2  ;;  %v5039_v27 = vld [vmem:[%s6112_s22 + $0x80] sm:$0x3] }
 0x122   : > { %v1639_v0 = vpop.permute.xlu1 %1638  ;;  %v2396_v51 = vrot.slane %v2288_v40, 4  ;;  %v5545_v58 = vpack.c.bf16 %v1922_v48, %v1922_v48  ;;  %v2400_v59 = vsel %vm1110_vm2, %v2397_v49, %v2399_v50 }
 0x123   : > { %v1637_v1 = vpop.permute.xlu0 %1636  ;;  %1722 = vst.msk [vmem:[#allocation2 + $0x34] sm:$0xf] %vm1708_vm6, %v1639_v0  ;;  %v5576_v3 = vpack.c.bf16 %v2400_v59, %v2400_v59  ;;  %v3177_v50 = vsel %vm628_vm0, %v3175_v39, %v3176_v35  ;;  %v4958_v59 = vld [vmem:[%s6112_s22 + $0x7c] ss:$12 sps:$4 sm:$0xff]  }
 0x124   : > { %1721 = vst.msk [vmem:[#allocation2 + $0x30] sm:$0xf] %vm1708_vm6, %v1637_v1  ;;  %3366 = vrot.lane.b32.xlu1 %v5636_v56, %s6061_s7  ;;  %v2398_v60 = vsel %vm1110_vm2, %v2396_v51, %v2397_v49  ;;  %v1817_v21 = vunpack.c.h.bf16 %v4958_v59 }
 0x125   : > { %3364 = vrot.lane.b32.xlu0 %v5635_v57, %s6061_s7  ;;  %v5546_v57 = vpack.c.bf16 %v1924_v47, %v1924_v47  ;;  %v5575_v4 = vpack.c.bf16 %v2398_v60, %v2398_v60  ;;  %v5640_v47 = vpack.c.bf16 %v3174_v33, %v3174_v33 }
 0x126   : > { %v1643_v14 = vpop.permute.xlu1 %1642 }
 0x127   : > { %v1641_v15 = vpop.permute.xlu0 %1640  ;;  %1724 = vst.msk [vmem:[#allocation2 + $0x3c] sm:$0xf] %vm1708_vm6, %v1643_v14  ;;  %v5578_v14 = vpack.c.bf16 %v2405_v7, %v2405_v7  ;;  %v1814_v7 = vunpack.c.l.bf16 %v4958_v59 }
 0x128   : > { %1723 = vst.msk [vmem:[#allocation2 + $0x38] sm:$0xf] %vm1708_vm6, %v1641_v15  ;;  %3370 = vrot.lane.b32.xlu1 %v5638_v8, %s6061_s7  ;;  %v2403_v8 = vsel %vm1110_vm2, %v2401_v63, %v2402_v61  ;;  %v5641_v61 = vpack.c.bf16 %v3177_v50, %v3177_v50  ;;  %v4959_v63 = vld [vmem:[%s6112_s22 + $0x80] sm:$0x1] }
 0x129   : > { %3368 = vrot.lane.b32.xlu0 %v5637_v9, %s6061_s7  ;;  %v5577_v15 = vpack.c.bf16 %v2403_v8, %v2403_v8  ;;  %v1815_v8 = vunpack.c.l.bf16 %v4959_v63 }
 0x12a   : > { %v1647_v28 = vpop.permute.xlu1 %1646 }
 0x12b   : > { %v1645_v29 = vpop.permute.xlu0 %1644  ;;  %1726 = vst.msk [vmem:[#allocation2 + $0x44] sm:$0xf] %vm1708_vm6, %v1647_v28  ;;  %v5272_v28 = vld [vmem:[%s6112_s22 + $0x7c] ss:$12 sps:$4 sm:$0xff]  }
 0x12c   : > { %1725 = vst.msk [vmem:[#allocation2 + $0x40] sm:$0xf] %vm1708_vm6, %v1645_v29  ;;  %3847 = vrot.lane.b32.xlu1 %v5668_v16, %s6062_s10  ;;  %v5196_v16 = vld [vmem:[%s6112_s22 + $0x8c] sm:$0x1]  ;;  %v5273_v29 = vld [vmem:[%s6112_s22 + $0x80] sm:$0x3]  ;;  %v3544_v40 = vunpack.c.l.bf16 %v5272_v28  ;;  %v3547_v54 = vunpack.c.h.bf16 %v5272_v28 }
 0x12d   : > { %3845 = vrot.lane.b32.xlu0 %v5667_v22, %s6062_s10  ;;  %v3170_v22 = vrot.slane %v3062_v13, 2  ;;  %v3067_v26 = vunpack.c.l.bf16 %v5196_v16  ;;  %v5037_v28 = vld [vmem:[%s6112_s22 + $0x78] sm:$0xc] }
 0x12e   : > { %v2096_v41 = vpop.permute.xlu1 %2095  ;;  %v3652_v51 = vrot.slane %v3544_v40, 4  ;;  %v3657_v2 = vrot.slane %v3547_v54, 4  ;;  %v2296_v40 = vunpack.c.l.bf16 %v5039_v27  ;;  %v5990_v27 = vld [vmem:[%s6112_s22 + $0x90] ss:$0 sps:$4 sm:$0xff]  }
 0x12f   : > { %v2094_v42 = vpop.permute.xlu0 %2093  ;;  %2191 = vst.msk [vmem:[#allocation2 + $0x4] sm:$0xf] %vm2189_vm7, %v2096_v41  ;;  %v3172_v34 = vsel %vm628_vm0, %v3170_v22, %v3171_v20  ;;  %v3178_v38 = vrot.slane %v3067_v26, 2  ;;  %v3545_v41 = vunpack.c.l.bf16 %v5273_v29  ;;  %v5038_v26 = vld [vmem:[%s6112_s22 + $0x7c] ss:$12 sps:$4 sm:$0xff]  }
 0x130   : > { %2190 = vst.msk [vmem:[#allocation2] sm:$0xf] %vm2189_vm7, %v2094_v42  ;;  %3851 = vrot.lane.b32.xlu1 %v5670_v30, %s6062_s10  ;;  %v5639_v48 = vpack.c.bf16 %v3172_v34, %v3172_v34  ;;  %v1931_v34 = vrot.slane %v1817_v21, 2  ;;  %v2295_v39 = vunpack.c.l.bf16 %v5038_v26  ;;  %v2298_v54 = vunpack.c.h.bf16 %v5038_v26  ;;  %v5989_v26 = vld [vmem:[%s6112_s22 + $0x94] ss:$0 sps:$4 sm:$0xff]  }
 0x131   : > { %3849 = vrot.lane.b32.xlu0 %v5669_v32, %s6062_s10  ;;  %v5271_v32 = vld [vmem:[%s6112_s22 + $0x78] sm:$0xc]  ;;  %v3179_v49 = vsel %vm628_vm0, %v3176_v35, %v3178_v38  ;;  %v3654_v52 = vrot.slane %v3545_v41, 4  ;;  %v5986_v35 = vld [vmem:[%s6112_s22 + $0x88] ss:$0 sps:$4 sm:$0xff]   ;;  %v2294_v41 = vunpack.c.l.bf16 %v5037_v28 }
 0x132   : > { %v2100_v55 = vpop.permute.xlu1 %2099  ;;  %v3543_v42 = vunpack.c.l.bf16 %v5271_v32  ;;  %v5642_v60 = vpack.c.bf16 %v3179_v49, %v3179_v49  ;;  %v2412_v63 = vrot.slane %v2298_v54, 4 }
 0x133   : > { %v2098_v56 = vpop.permute.xlu0 %2097  ;;  %2193 = vst.msk [vmem:[#allocation2 + $0xc] sm:$0xf] %vm2189_vm7, %v2100_v55  ;;  %v3655_v62 = vsel %vm1110_vm2, %v3652_v51, %v3654_v52  ;;  %v2409_v52 = vrot.slane %v2296_v40, 4 }
 0x134   : > { %2192 = vst.msk [vmem:[#allocation2 + $0x8] sm:$0xf] %vm2189_vm7, %v2098_v56  ;;  %2119 = vrot.lane.b32.xlu1 %v5544_v45, %s6058_s26  ;;  %v5276_v45 = vld [vmem:[%s6112_s22 + $0x8c] sm:$0x3]  ;;  %v3651_v53 = vrot.slane %v3543_v42, 4 }
 0x135   : > { %2117 = vrot.lane.b32.xlu0 %v5543_v46, %s6058_s26  ;;  %v5274_v46 = vld [vmem:[%s6112_s22 + $0x84] sm:$0xc]  ;;  %v3548_v55 = vunpack.c.l.bf16 %v5276_v45  ;;  %v5042_v42 = vld [vmem:[%s6112_s22 + $0x8c] sm:$0x3] }
 0x136   : > { %v2577_v0 = vpop.permute.xlu1 %2576  ;;  %v3546_v56 = vunpack.c.l.bf16 %v5274_v46 }
 0x137   : > { %v2575_v1 = vpop.permute.xlu0 %2574  ;;  %2672 = vst.msk [vmem:[#allocation2 + $0x4] sm:$0xf] %vm2670_vm8, %v2577_v0  ;;  %v4957_v0 = vld [vmem:[%s6112_s22 + $0x78] sm:$0xe] }
 0x138   : > { %2671 = vst.msk [vmem:[#allocation2] sm:$0xf] %vm2670_vm8, %v2575_v1  ;;  %2123 = vrot.lane.b32.xlu1 %v5546_v57, %s6058_s26  ;;  %v3653_v1 = vsel %vm1110_vm2, %v3651_v53, %v3652_v51  ;;  %v2407_v51 = vrot.slane %v2295_v39, 4  ;;  %v2406_v53 = vrot.slane %v2294_v41, 4  ;;  %v5992_v39 = vld [vmem:[%s6112_s22 + $0x9c] ss:$0 sps:$4 sm:$0xff]  }
 0x139   : > { %2121 = vrot.lane.b32.xlu0 %v5545_v58, %s6058_s26  ;;  %v5671_v11 = vpack.c.bf16 %v3653_v1, %v3653_v1 }
 0x13a   : > { %v2581_v9 = vpop.permute.xlu1 %2580 }
 0x13b   : > { %v2579_v10 = vpop.permute.xlu0 %2578  ;;  %2674 = vst.msk [vmem:[#allocation2 + $0xc] sm:$0xf] %vm2670_vm8, %v2581_v9  ;;  %v1813_v9 = vunpack.c.l.bf16 %v4957_v0 }
 0x13c   : > { %2673 = vst.msk [vmem:[#allocation2 + $0x8] sm:$0xf] %vm2670_vm8, %v2579_v10  ;;  %2600 = vrot.lane.b32.xlu1 %v5576_v3, %s6059_s27  ;;  %v3659_v3 = vrot.slane %v3548_v55, 4  ;;  %v5672_v10 = vpack.c.bf16 %v3655_v62, %v3655_v62  ;;  %v2299_v55 = vunpack.c.l.bf16 %v5042_v42  ;;  %v2408_v62 = vsel %vm1110_vm2, %v2406_v53, %v2407_v51 }
 0x13d   : > { %2598 = vrot.lane.b32.xlu0 %v5575_v4, %s6059_s27  ;;  %v3656_v4 = vrot.slane %v3546_v56, 4  ;;  %v1925_v20 = vrot.slane %v1813_v9, 2 }
 0x13e   : > { %v2870_v18 = vpop.permute.xlu1 %2869  ;;  %v3660_v12 = vsel %vm1110_vm2, %v3657_v2, %v3659_v3  ;;  %v2414_v0 = vrot.slane %v2299_v55, 4 }
 0x13f   : > { %v2868_v19 = vpop.permute.xlu0 %2867  ;;  %2965 = vst.msk [vmem:[#allocation2 + $0x4] sm:$0xf] %vm2963_vm9, %v2870_v18  ;;  %v3658_v13 = vsel %vm1110_vm2, %v3656_v4, %v3657_v2  ;;  %v1926_v18 = vrot.slane %v1814_v7, 2  ;;  %v5674_v22 = vpack.c.bf16 %v3660_v12, %v3660_v12  ;;  %v5198_v4 = vld [vmem:[%s6112_s22 + $0x94] ss:$12 sps:$4 sm:$0xff]  }
 0x140   : > { %2964 = vst.msk [vmem:[#allocation2] sm:$0xf] %vm2963_vm9, %v2868_v19  ;;  %2604 = vrot.lane.b32.xlu1 %v5578_v14, %s6059_s27  ;;  %v4962_v14 = vld [vmem:[%s6112_s22 + $0x8c] sm:$0x1]  ;;  %v1928_v19 = vrot.slane %v1815_v8, 2  ;;  %v5673_v23 = vpack.c.bf16 %v3658_v13, %v3658_v13  ;;  %v2415_v9 = vsel %vm1110_vm2, %v2412_v63, %v2414_v0  ;;  %v3069_v13 = vunpack.c.l.bf16 %v5198_v4 }
 0x141   : > { %2602 = vrot.lane.b32.xlu0 %v5577_v15, %s6059_s27  ;;  %v4960_v15 = vld [vmem:[%s6112_s22 + $0x84] sm:$0xe]  ;;  %v1927_v33 = vsel %vm628_vm0, %v1925_v20, %v1926_v18  ;;  %v5199_v7 = vld [vmem:[%s6112_s22 + $0x98] sm:$0x1]  ;;  %v5197_v8 = vld [vmem:[%s6112_s22 + $0x90] sm:$0xe] }
 0x142   : > { %v2874_v30 = vpop.permute.xlu1 %2873  ;;  %v1929_v32 = vsel %vm628_vm0, %v1926_v18, %v1928_v19  ;;  %v5202_v18 = vld [vmem:[%s6112_s22 + $0xa4] sm:$0x1]  ;;  %v5200_v19 = vld [vmem:[%s6112_s22 + $0x9c] sm:$0xe] }
 0x143   : > { %v2872_v31 = vpop.permute.xlu0 %2871  ;;  %2967 = vst.msk [vmem:[#allocation2 + $0xc] sm:$0xf] %vm2963_vm9, %v2874_v30  ;;  %v3073_v28 = vunpack.c.l.bf16 %v5202_v18 }
 0x144   : > { %2966 = vst.msk [vmem:[#allocation2 + $0x8] sm:$0xf] %vm2963_vm9, %v2872_v31  ;;  %2893 = vrot.lane.b32.xlu1 %v5978_v24, %s6060_s28  ;;  %v1818_v24 = vunpack.c.l.bf16 %v4962_v14  ;;  %v3070_v14 = vunpack.c.l.bf16 %v5199_v7 }
 0x145   : > { %2891 = vrot.lane.b32.xlu0 %v5979_v25, %s6060_s28  ;;  %v1816_v25 = vunpack.c.l.bf16 %v4960_v15  ;;  %v3068_v15 = vunpack.c.l.bf16 %v5197_v8  ;;  %v3188_v40 = vrot.slane %v3073_v28, 2 }
 0x146   : > { %v3351_v43 = vpop.permute.xlu1 %3350 }
 0x147   : > { %v3349_v44 = vpop.permute.xlu0 %3348  ;;  %3446 = vst.msk [vmem:[#allocation2 + $0x4] sm:$0xf] %vm3444_vm10, %v3351_v43  ;;  %v1930_v38 = vrot.slane %v1816_v25, 2  ;;  %v5040_v43 = vld [vmem:[%s6112_s22 + $0x84] sm:$0xc]  ;;  %v3072_v25 = vunpack.c.h.bf16 %v5198_v4 }
 0x148   : > { %3445 = vst.msk [vmem:[#allocation2] sm:$0xf] %vm3444_vm10, %v3349_v44  ;;  %2897 = vrot.lane.b32.xlu1 %v5980_v36, %s6060_s28  ;;  %v5987_v36 = vld [vmem:[%s6112_s22 + $0x84] ss:$0 sps:$4 sm:$0xff]   ;;  %v2297_v56 = vunpack.c.l.bf16 %v5040_v43 }
 0x149   : > { %2895 = vrot.lane.b32.xlu0 %v5981_v37, %s6060_s28  ;;  %v1933_v37 = vrot.slane %v1818_v24, 2  ;;  %v1932_v50 = vsel %vm628_vm0, %v1930_v38, %v1931_v34  ;;  %v3180_v24 = vrot.slane %v3068_v15, 2  ;;  %v5991_v38 = vld [vmem:[%s6112_s22 + $0xa0] ss:$0 sps:$4 sm:$0xff]  }
 0x14a   : > { %v3355_v57 = vpop.permute.xlu1 %3354  ;;  %v2411_v1 = vrot.slane %v2297_v56, 4 }
 0x14b   : > { %v3353_v58 = vpop.permute.xlu0 %3352  ;;  %3448 = vst.msk [vmem:[#allocation2 + $0xc] sm:$0xf] %vm3444_vm10, %v3355_v57  ;;  %v1934_v49 = vsel %vm628_vm0, %v1931_v34, %v1933_v37  ;;  %v5277_v34 = vld [vmem:[%s6112_s22 + $0x90] sm:$0xc]  ;;  %v3186_v37 = vrot.slane %v3072_v25, 2 }
 0x14c   : > { %3447 = vst.msk [vmem:[#allocation2 + $0x8] sm:$0xf] %vm3444_vm10, %v3353_v58  ;;  %3374 = vrot.lane.b32.xlu1 %v5640_v47, %s6061_s7  ;;  %v5548_v47 = vpack.c.bf16 %v1929_v32, %v1929_v32  ;;  %v5550_v59 = vpack.c.bf16 %v1934_v49, %v1934_v49 }
 0x14d   : > { %3372 = vrot.lane.b32.xlu0 %v5639_v48, %s6061_s7  ;;  %v5547_v48 = vpack.c.bf16 %v1927_v33, %v1927_v33 }
 0x14e   : > { %v3832_v5 = vpop.permute.xlu1 %3831 }
 0x14f   : > { %v3830_v6 = vpop.permute.xlu0 %3829  ;;  %3927 = vst.msk [vmem:[#allocation2 + $0x4] sm:$0xf] %vm3925_vm11, %v3832_v5 }
 0x150   : > { %3926 = vst.msk [vmem:[#allocation2] sm:$0xf] %vm3925_vm11, %v3830_v6  ;;  %3378 = vrot.lane.b32.xlu1 %v5642_v60, %s6061_s7  ;;  %v5549_v60 = vpack.c.bf16 %v1932_v50, %v1932_v50  ;;  %v5579_v6 = vpack.c.bf16 %v2408_v62, %v2408_v62 }
 0x151   : > { %3376 = vrot.lane.b32.xlu0 %v5641_v61, %s6061_s7  ;;  %v2410_v61 = vsel %vm1110_vm2, %v2407_v51, %v2409_v52  ;;  %v3189_v51 = vsel %vm628_vm0, %v3186_v37, %v3188_v40 }
 0x152   : > { %v3836_v16 = vpop.permute.xlu1 %3835  ;;  %v5580_v5 = vpack.c.bf16 %v2410_v61, %v2410_v61  ;;  %v5646_v61 = vpack.c.bf16 %v3189_v51, %v3189_v51  ;;  %v5048_v51 = vld [vmem:[%s6112_s22 + $0xa4] sm:$0x3] }
 0x153   : > { %v3834_v17 = vpop.permute.xlu0 %3833  ;;  %3929 = vst.msk [vmem:[#allocation2 + $0xc] sm:$0xf] %vm3925_vm11, %v3836_v16  ;;  %v5582_v16 = vpack.c.bf16 %v2415_v9, %v2415_v9  ;;  %v4965_v9 = vld [vmem:[%s6112_s22 + $0x98] sm:$0x1] }
 0x154   : > { %3928 = vst.msk [vmem:[#allocation2 + $0x8] sm:$0xf] %vm3925_vm11, %v3834_v17  ;;  %3855 = vrot.lane.b32.xlu1 %v5672_v10, %s6062_s10  ;;  %v2413_v10 = vsel %vm1110_vm2, %v2411_v1, %v2412_v63 }
 0x155   : > { %3853 = vrot.lane.b32.xlu0 %v5671_v11, %s6062_s10  ;;  %v5581_v17 = vpack.c.bf16 %v2413_v10, %v2413_v10  ;;  %v4963_v10 = vld [vmem:[%s6112_s22 + $0x90] sm:$0xe] }
 0x156   : > { %v2104_v29 = vpop.permute.xlu1 %2103  ;;  %v1819_v18 = vunpack.c.l.bf16 %v4963_v10  ;;  %v5204_v10 = vld [vmem:[%s6112_s22 + $0xac] ss:$12 sps:$4 sm:$0xff]  }
 0x157   : > { %v2102_v30 = vpop.permute.xlu0 %2101  ;;  %v5985_v31 = vld [vmem:[#allocation2] sm:$0xff]   ;;  %2195 = vst.msk [vmem:[#allocation2 + $0x14] sm:$0xf] %vm2189_vm7, %v2104_v29  ;;  %v3071_v29 = vunpack.c.l.bf16 %v5200_v19 }
 0x158   : > { %2194 = vst.msk [vmem:[#allocation2 + $0x10] sm:$0xf] %vm2189_vm7, %v2102_v30  ;;  %3859 = vrot.lane.b32.xlu1 %v5674_v22, %s6062_s10  ;;  %5843 = vmatprep.mubr.msk.bf16.mxu0 %vm4090_vm12, %v5985_v31  ;;  %v3181_v22 = vrot.slane %v3069_v13, 2  ;;  %v5278_v30 = vld [vmem:[%s6112_s22 + $0x94] ss:$12 sps:$4 sm:$0xff]   ;;  %v1935_v28 = vrot.slane %v1819_v18, 2 }
 0x159   : > { %3857 = vrot.lane.b32.xlu0 %v5673_v23, %s6062_s10  ;;  %v3183_v23 = vrot.slane %v3070_v14, 2  ;;  %v5279_v31 = vld [vmem:[%s6112_s22 + $0x98] sm:$0x3]  ;;  %v3185_v41 = vrot.slane %v3071_v29, 2  ;;  %v3550_v42 = vunpack.c.l.bf16 %v5278_v30  ;;  %v3553_v56 = vunpack.c.h.bf16 %v5278_v30  ;;  %v5995_v30 = vld [vmem:[%s6112_s22 + $0x94] ss:$0 sps:$4 sm:$0xff]  }
 0x15a   : > { %v2108_v44 = vpop.permute.xlu1 %2107  ;;  %v3551_v43 = vunpack.c.l.bf16 %v5279_v31  ;;  %v5996_v31 = vld [vmem:[%s6112_s22 + $0x90] ss:$0 sps:$4 sm:$0xff]  }
 0x15b   : > { %v2106_v45 = vpop.permute.xlu0 %2105  ;;  %v5988_v46 = vld [vmem:[#allocation2 + $0x8] sm:$0xff]   ;;  %2197 = vst.msk [vmem:[#allocation2 + $0x1c] sm:$0xf] %vm2189_vm7, %v2108_v44  ;;  %v3549_v44 = vunpack.c.l.bf16 %v5277_v34  ;;  %v3187_v52 = vsel %vm628_vm0, %v3185_v41, %v3186_v37  ;;  %v3662_v53 = vrot.slane %v3550_v42, 4  ;;  %v3667_v1 = vrot.slane %v3553_v56, 4 }
 0x15c   : > { %2196 = vst.msk [vmem:[#allocation2 + $0x18] sm:$0xf] %vm2189_vm7, %v2106_v45  ;;  %1650 = vrot.lane.b32.xlu1 %v5986_v35, %s6057_s25  ;;  %5844 = vmatmul.mubr.msk.bf16.vlgmr.msra.gmra.mxu0 %vm4090_vm12, %v5988_v46  ;;  %v3184_v35 = vsel %vm628_vm0, %v3181_v22, %v3183_v23  ;;  %v3664_v54 = vrot.slane %v3551_v43, 4  ;;  %v5645_v62 = vpack.c.bf16 %v3187_v52, %v3187_v52  ;;  %v5044_v34 = vld [vmem:[%s6112_s22 + $0x94] ss:$12 sps:$4 sm:$0xff]  }
 0x15d   : > { %1648 = vrot.lane.b32.xlu0 %v5987_v36, %s6057_s25  ;;  %v3182_v36 = vsel %vm628_vm0, %v3180_v24, %v3181_v22  ;;  %v5644_v49 = vpack.c.bf16 %v3184_v35, %v3184_v35  ;;  %v3661_v55 = vrot.slane %v3549_v44, 4  ;;  %v4966_v22 = vld [vmem:[%s6112_s22 + $0x9c] sm:$0xe]  ;;  %v5045_v35 = vld [vmem:[%s6112_s22 + $0x98] sm:$0x3] }
 0x15e   : > { %v2585_v57 = vpop.permute.xlu1 %2584  ;;  %v5643_v50 = vpack.c.bf16 %v3182_v36, %v3182_v36  ;;  %v3665_v63 = vsel %vm1110_vm2, %v3662_v53, %v3664_v54  ;;  %v5997_v42 = vld [vmem:[%s6112_s22 + $0xa0] ss:$0 sps:$4 sm:$0xff]   ;;  %v5998_v43 = vld [vmem:[%s6112_s22 + $0x9c] ss:$0 sps:$4 sm:$0xff]   ;;  %v5046_v52 = vld [vmem:[%s6112_s22 + $0x9c] sm:$0xc] }
 0x15f   : > { %v2583_v58 = vpop.permute.xlu0 %2582  ;;  %2676 = vst.msk [vmem:[#allocation2 + $0x14] sm:$0xf] %vm2670_vm8, %v2585_v57  ;;  %v3663_v0 = vsel %vm1110_vm2, %v3661_v55, %v3662_v53  ;;  %v5676_v7 = vpack.c.bf16 %v3665_v63, %v3665_v63 }
 0x160   : > { %2675 = vst.msk [vmem:[#allocation2 + $0x10] sm:$0xf] %vm2670_vm8, %v2583_v58  ;;  %2127 = vrot.lane.b32.xlu1 %v5548_v47, %s6058_s26  ;;  %v5282_v47 = vld [vmem:[%s6112_s22 + $0xa4] sm:$0x3]  ;;  %v5675_v8 = vpack.c.bf16 %v3663_v0, %v3663_v0 }
 0x161   : > { %2125 = vrot.lane.b32.xlu0 %v5547_v48, %s6058_s26  ;;  %v5280_v48 = vld [vmem:[%s6112_s22 + $0x9c] sm:$0xc]  ;;  %v3554_v57 = vunpack.c.l.bf16 %v5282_v47  ;;  %v2302_v47 = vunpack.c.l.bf16 %v5045_v35 }
 0x162   : > { %v2589_v2 = vpop.permute.xlu1 %2588  ;;  %v3552_v58 = vunpack.c.l.bf16 %v5280_v48 }
 0x163   : > { %v2587_v3 = vpop.permute.xlu0 %2586  ;;  %2678 = vst.msk [vmem:[#allocation2 + $0x1c] sm:$0xf] %vm2670_vm8, %v2589_v2  ;;  %v3669_v2 = vrot.slane %v3554_v57, 4 }
 0x164   : > { %2677 = vst.msk [vmem:[#allocation2 + $0x18] sm:$0xf] %vm2670_vm8, %v2587_v3  ;;  %2131 = vrot.lane.b32.xlu1 %v5550_v59, %s6058_s26  ;;  %v3666_v3 = vrot.slane %v3552_v58, 4  ;;  %v2419_v58 = vrot.slane %v2302_v47, 4 }
 0x165   : > { %2129 = vrot.lane.b32.xlu0 %v5549_v60, %s6058_s26 }
 0x166   : > { %v2878_v11 = vpop.permute.xlu1 %2877 }
 0x167   : > { %v2876_v12 = vpop.permute.xlu0 %2875  ;;  %2969 = vst.msk [vmem:[#allocation2 + $0x14] sm:$0xf] %vm2963_vm9, %v2878_v11  ;;  %v3670_v11 = vsel %vm1110_vm2, %v3667_v1, %v3669_v2 }
 0x168   : > { %2968 = vst.msk [vmem:[#allocation2 + $0x10] sm:$0xf] %vm2963_vm9, %v2876_v12  ;;  %2608 = vrot.lane.b32.xlu1 %v5580_v5, %s6059_s27  ;;  %v3668_v12 = vsel %vm1110_vm2, %v3666_v3, %v3667_v1  ;;  %v5678_v19 = vpack.c.bf16 %v3670_v11, %v3670_v11 }
 0x169   : > { %2606 = vrot.lane.b32.xlu0 %v5579_v6, %s6059_s27  ;;  %v4964_v6 = vld [vmem:[%s6112_s22 + $0x94] ss:$12 sps:$4 sm:$0xff]  }
 0x16a   : > { %v2882_v20 = vpop.permute.xlu1 %2881  ;;  %v1823_v29 = vunpack.c.h.bf16 %v4964_v6 }
 0x16b   : > { %v2880_v21 = vpop.permute.xlu0 %2879  ;;  %2971 = vst.msk [vmem:[#allocation2 + $0x1c] sm:$0xf] %vm2963_vm9, %v2882_v20  ;;  %v5677_v20 = vpack.c.bf16 %v3668_v12, %v3668_v12 }
 0x16c   : > { %2970 = vst.msk [vmem:[#allocation2 + $0x18] sm:$0xf] %vm2963_vm9, %v2880_v21  ;;  %2612 = vrot.lane.b32.xlu1 %v5582_v16, %s6059_s27  ;;  %v1820_v16 = vunpack.c.l.bf16 %v4964_v6  ;;  %v4968_v21 = vld [vmem:[%s6112_s22 + $0xa4] sm:$0x1]  ;;  %v1941_v41 = vrot.slane %v1823_v29, 2 }
 0x16d   : > { %2610 = vrot.lane.b32.xlu0 %v5581_v17, %s6059_s27  ;;  %v1821_v17 = vunpack.c.l.bf16 %v4965_v9 }
 0x16e   : > { %v3359_v32 = vpop.permute.xlu1 %3358 }
 0x16f   : > { %v3357_v33 = vpop.permute.xlu0 %3356  ;;  %3450 = vst.msk [vmem:[#allocation2 + $0x14] sm:$0xf] %vm3444_vm10, %v3359_v32  ;;  %v1824_v32 = vunpack.c.l.bf16 %v4968_v21 }
 0x170   : > { %3449 = vst.msk [vmem:[#allocation2 + $0x10] sm:$0xf] %vm3444_vm10, %v3357_v33  ;;  %2901 = vrot.lane.b32.xlu1 %v5989_v26, %s6060_s28  ;;  %v1936_v26 = vrot.slane %v1820_v16, 2  ;;  %v1822_v33 = vunpack.c.l.bf16 %v4966_v22 }
 0x171   : > { %2899 = vrot.lane.b32.xlu0 %v5990_v27, %s6060_s28  ;;  %v1938_v27 = vrot.slane %v1821_v17, 2  ;;  %v1943_v44 = vrot.slane %v1824_v32, 2  ;;  %v5999_v32 = vld [vmem:[%s6112_s22 + $0xac] ss:$0 sps:$4 sm:$0xff]  }
 0x172   : > { %v3363_v45 = vpop.permute.xlu1 %3362  ;;  %v1937_v40 = vsel %vm628_vm0, %v1935_v28, %v1936_v26 }
 0x173   : > { %v3361_v46 = vpop.permute.xlu0 %3360  ;;  %3452 = vst.msk [vmem:[#allocation2 + $0x1c] sm:$0xf] %vm3444_vm10, %v3363_v45  ;;  %v1940_v45 = vrot.slane %v1822_v33, 2  ;;  %v5551_v54 = vpack.c.bf16 %v1937_v40, %v1937_v40  ;;  %v1944_v55 = vsel %vm628_vm0, %v1941_v41, %v1943_v44  ;;  %v6000_v33 = vld [vmem:[%s6112_s22 + $0xa8] ss:$0 sps:$4 sm:$0xff]  }
 0x174   : > { %3451 = vst.msk [vmem:[#allocation2 + $0x18] sm:$0xf] %vm3444_vm10, %v3361_v46  ;;  %2905 = vrot.lane.b32.xlu1 %v5991_v38, %s6060_s28  ;;  %v5043_v38 = vld [vmem:[%s6112_s22 + $0x90] sm:$0xc]  ;;  %v2301_v46 = vunpack.c.l.bf16 %v5044_v34  ;;  %v5554_v1 = vpack.c.bf16 %v1944_v55, %v1944_v55  ;;  %v5283_v40 = vld [vmem:[%s6112_s22 + $0xa8] sm:$0xc] }
 0x175   : > { %2903 = vrot.lane.b32.xlu0 %v5992_v39, %s6060_s28  ;;  %v1939_v39 = vsel %vm628_vm0, %v1936_v26, %v1938_v27  ;;  %v2300_v48 = vunpack.c.l.bf16 %v5043_v38  ;;  %v1942_v56 = vsel %vm628_vm0, %v1940_v45, %v1941_v41  ;;  %v6001_v44 = vld [vmem:[%s6112_s22 + $0xb8] ss:$0 sps:$4 sm:$0xff]   ;;  %v6002_v45 = vld [vmem:[%s6112_s22 + $0xb4] ss:$0 sps:$4 sm:$0xff]  }
 0x176   : > { %v3840_v59 = vpop.permute.xlu1 %3839  ;;  %v5552_v53 = vpack.c.bf16 %v1939_v39, %v1939_v39  ;;  %v2417_v57 = vrot.slane %v2301_v46, 4  ;;  %v5553_v2 = vpack.c.bf16 %v1942_v56, %v1942_v56 }
 0x177   : > { %v3838_v60 = vpop.permute.xlu0 %3837  ;;  %3931 = vst.msk [vmem:[#allocation2 + $0x14] sm:$0xf] %vm3925_vm11, %v3840_v59  ;;  %v2416_v59 = vrot.slane %v2300_v48, 4 }
 0x178   : > { %3930 = vst.msk [vmem:[#allocation2 + $0x10] sm:$0xf] %vm3925_vm11, %v3838_v60  ;;  %3382 = vrot.lane.b32.xlu1 %v5644_v49, %s6061_s7  ;;  %v2304_v60 = vunpack.c.h.bf16 %v5044_v34  ;;  %v2420_v3 = vsel %vm1110_vm2, %v2417_v57, %v2419_v58 }
 0x179   : > { %3380 = vrot.lane.b32.xlu0 %v5643_v50, %s6061_s7  ;;  %v5584_v11 = vpack.c.bf16 %v2420_v3, %v2420_v3 }
 0x17a   : > { %v3844_v4 = vpop.permute.xlu1 %3843 }
 0x17b   : > { %v3842_v5 = vpop.permute.xlu0 %3841  ;;  %3933 = vst.msk [vmem:[#allocation2 + $0x1c] sm:$0xf] %vm3925_vm11, %v3844_v4  ;;  %v2418_v4 = vsel %vm1110_vm2, %v2416_v59, %v2417_v57 }
 0x17c   : > { %3932 = vst.msk [vmem:[#allocation2 + $0x18] sm:$0xf] %vm3925_vm11, %v3842_v5  ;;  %3386 = vrot.lane.b32.xlu1 %v5646_v61, %s6061_s7  ;;  %v2305_v61 = vunpack.c.l.bf16 %v5048_v51  ;;  %v2422_v5 = vrot.slane %v2304_v60, 4  ;;  %v5583_v12 = vpack.c.bf16 %v2418_v4, %v2418_v4 }
 0x17d   : > { %3384 = vrot.lane.b32.xlu0 %v5645_v62, %s6061_s7  ;;  %v2303_v62 = vunpack.c.l.bf16 %v5046_v52 }
 0x17e   : > { %v2112_v13 = vpop.permute.xlu1 %2111  ;;  %v2424_v6 = vrot.slane %v2305_v61, 4 }
 0x17f   : > { %v2110_v14 = vpop.permute.xlu0 %2109  ;;  %v5993_v15 = vld [vmem:[#allocation2 + $0x10] sm:$0xff]   ;;  %2199 = vst.msk [vmem:[#allocation2 + $0x24] sm:$0xf] %vm2189_vm7, %v2112_v13 }
 0x180   : > { %2198 = vst.msk [vmem:[#allocation2 + $0x20] sm:$0xf] %vm2189_vm7, %v2110_v14  ;;  %3863 = vrot.lane.b32.xlu1 %v5676_v7, %s6062_s10  ;;  %5847 = vmatprep.mubr.msk.bf16.mxu0 %vm4090_vm12, %v5993_v15  ;;  %v2421_v7 = vrot.slane %v2303_v62, 4  ;;  %v5205_v13 = vld [vmem:[%s6112_s22 + $0xb0] sm:$0x1]  ;;  %v2425_v15 = vsel %vm1110_vm2, %v2422_v5, %v2424_v6 }
 0x181   : > { %3861 = vrot.lane.b32.xlu0 %v5675_v8, %s6062_s10  ;;  %v5203_v14 = vld [vmem:[%s6112_s22 + $0xa8] sm:$0xe]  ;;  %v5586_v22 = vpack.c.bf16 %v2425_v15, %v2425_v15 }
 0x182   : > { %v2116_v23 = vpop.permute.xlu1 %2115  ;;  %v2423_v16 = vsel %vm1110_vm2, %v2421_v7, %v2422_v5  ;;  %v3074_v21 = vunpack.c.l.bf16 %v5203_v14  ;;  %v4970_v14 = vld [vmem:[%s6112_s22 + $0xac] ss:$12 sps:$4 sm:$0xff]  }
 0x183   : > { %v2114_v24 = vpop.permute.xlu0 %2113  ;;  %v5994_v25 = vld [vmem:[#allocation2 + $0x18] sm:$0xff]   ;;  %2201 = vst.msk [vmem:[#allocation2 + $0x2c] sm:$0xf] %vm2189_vm7, %v2116_v23  ;;  %v5585_v23 = vpack.c.bf16 %v2423_v16, %v2423_v16 }
 0x184   : > { %2200 = vst.msk [vmem:[#allocation2 + $0x28] sm:$0xf] %vm2189_vm7, %v2114_v24  ;;  %3867 = vrot.lane.b32.xlu1 %v5678_v19, %s6062_s10  ;;  %5848 = vmatmul.mubr.msk.bf16.gmra.mxu0 %vm4090_vm12, %v5994_v25  ;;  %v3075_v19 = vunpack.c.l.bf16 %v5204_v10  ;;  %v5208_v24 = vld [vmem:[%s6112_s22 + $0xbc] sm:$0x1]  ;;  %v5206_v25 = vld [vmem:[%s6112_s22 + $0xb4] sm:$0xe] }
 0x185   : > { %3865 = vrot.lane.b32.xlu0 %v5677_v20, %s6062_s10  ;;  %v3076_v20 = vunpack.c.l.bf16 %v5205_v13  ;;  %v3079_v34 = vunpack.c.l.bf16 %v5208_v24  ;;  %v3077_v35 = vunpack.c.l.bf16 %v5206_v25 }
 0x186   : > { %v2593_v36 = vpop.permute.xlu1 %2592  ;;  %v3191_v28 = vrot.slane %v3075_v19, 2 }
 0x187   : > { %v2591_v37 = vpop.permute.xlu0 %2590  ;;  %2680 = vst.msk [vmem:[#allocation2 + $0x24] sm:$0xf] %vm2670_vm8, %v2593_v36  ;;  %v3193_v29 = vrot.slane %v3076_v20, 2  ;;  %v5284_v36 = vld [vmem:[%s6112_s22 + $0xac] ss:$12 sps:$4 sm:$0xff]   ;;  %v3198_v46 = vrot.slane %v3079_v34, 2 }
 0x188   : > { %2679 = vst.msk [vmem:[#allocation2 + $0x20] sm:$0xf] %vm2670_vm8, %v2591_v37  ;;  %1654 = vrot.lane.b32.xlu1 %v5995_v30, %s6057_s25  ;;  %v3190_v30 = vrot.slane %v3074_v21, 2  ;;  %v5285_v37 = vld [vmem:[%s6112_s22 + $0xb0] sm:$0x3]  ;;  %v3195_v47 = vrot.slane %v3077_v35, 2  ;;  %v3556_v48 = vunpack.c.l.bf16 %v5284_v36  ;;  %v3559_v62 = vunpack.c.h.bf16 %v5284_v36 }
 0x189   : > { %1652 = vrot.lane.b32.xlu0 %v5996_v31, %s6057_s25  ;;  %v3078_v31 = vunpack.c.h.bf16 %v5204_v10  ;;  %v3194_v41 = vsel %vm628_vm0, %v3191_v28, %v3193_v29  ;;  %v4972_v29 = vld [vmem:[%s6112_s22 + $0xb4] sm:$0xe]  ;;  %v1829_v35 = vunpack.c.h.bf16 %v4970_v14  ;;  %v6005_v36 = vld [vmem:[%s6112_s22 + $0xac] ss:$0 sps:$4 sm:$0xff]  }
 0x18a   : > { %v2597_v49 = vpop.permute.xlu1 %2596  ;;  %v5648_v55 = vpack.c.bf16 %v3194_v41, %v3194_v41  ;;  %v3672_v59 = vrot.slane %v3556_v48, 4  ;;  %v5051_v41 = vld [vmem:[%s6112_s22 + $0xb0] sm:$0x3]  ;;  %v6007_v48 = vld [vmem:[%s6112_s22 + $0xb8] ss:$0 sps:$4 sm:$0xff]  }
 0x18b   : > { %v2595_v50 = vpop.permute.xlu0 %2594  ;;  %2682 = vst.msk [vmem:[#allocation2 + $0x2c] sm:$0xf] %vm2670_vm8, %v2597_v49  ;;  %v3557_v49 = vunpack.c.l.bf16 %v5285_v37  ;;  %v6006_v37 = vld [vmem:[%s6112_s22 + $0xa8] ss:$0 sps:$4 sm:$0xff]  }
 0x18c   : > { %2681 = vst.msk [vmem:[#allocation2 + $0x28] sm:$0xf] %vm2670_vm8, %v2595_v50  ;;  %1658 = vrot.lane.b32.xlu1 %v5997_v42, %s6057_s25  ;;  %v3192_v42 = vsel %vm628_vm0, %v3190_v30, %v3191_v28  ;;  %v3555_v50 = vunpack.c.l.bf16 %v5283_v40  ;;  %v4974_v28 = vld [vmem:[%s6112_s22 + $0xbc] sm:$0x1]  ;;  %v5050_v40 = vld [vmem:[%s6112_s22 + $0xac] ss:$12 sps:$4 sm:$0xff]  }
 0x18d   : > { %1656 = vrot.lane.b32.xlu0 %v5998_v43, %s6057_s25  ;;  %v3196_v43 = vrot.slane %v3078_v31, 2  ;;  %v5647_v56 = vpack.c.bf16 %v3192_v42, %v3192_v42  ;;  %v3674_v60 = vrot.slane %v3557_v49, 4  ;;  %v6008_v49 = vld [vmem:[%s6112_s22 + $0xb4] ss:$0 sps:$4 sm:$0xff]  }
 0x18e   : > { %v2886_v63 = vpop.permute.xlu1 %2885  ;;  %v3671_v61 = vrot.slane %v3555_v50, 4 }
 0x18f   : > { %v2884_v0 = vpop.permute.xlu0 %2883  ;;  %2973 = vst.msk [vmem:[#allocation2 + $0x24] sm:$0xf] %vm2963_vm9, %v2886_v63  ;;  %v3199_v57 = vsel %vm628_vm0, %v3196_v43, %v3198_v46  ;;  %v3197_v58 = vsel %vm628_vm0, %v3195_v47, %v3196_v43  ;;  %v3675_v6 = vsel %vm1110_vm2, %v3672_v59, %v3674_v60  ;;  %v1951_v47 = vrot.slane %v1829_v35, 2 }
 0x190   : > { %2972 = vst.msk [vmem:[#allocation2 + $0x20] sm:$0xf] %vm2963_vm9, %v2884_v0  ;;  %2135 = vrot.lane.b32.xlu1 %v5552_v53, %s6058_s26  ;;  %v5288_v53 = vld [vmem:[%s6112_s22 + $0xbc] sm:$0x3]  ;;  %v5650_v4 = vpack.c.bf16 %v3199_v57, %v3199_v57  ;;  %v5649_v5 = vpack.c.bf16 %v3197_v58, %v3197_v58  ;;  %v3673_v7 = vsel %vm1110_vm2, %v3671_v61, %v3672_v59  ;;  %v5052_v58 = vld [vmem:[%s6112_s22 + $0xb4] sm:$0xc] }
 0x191   : > { %2133 = vrot.lane.b32.xlu0 %v5551_v54, %s6058_s26  ;;  %v5286_v54 = vld [vmem:[%s6112_s22 + $0xb4] sm:$0xc]  ;;  %v3560_v63 = vunpack.c.l.bf16 %v5288_v53  ;;  %v5680_v15 = vpack.c.bf16 %v3675_v6, %v3675_v6  ;;  %v5679_v16 = vpack.c.bf16 %v3673_v7, %v3673_v7  ;;  %v2308_v53 = vunpack.c.l.bf16 %v5051_v41  ;;  %v5054_v57 = vld [vmem:[%s6112_s22 + $0xbc] sm:$0x3] }
 0x192   : > { %v2890_v8 = vpop.permute.xlu1 %2889  ;;  %v3558_v0 = vunpack.c.l.bf16 %v5286_v54 }
 0x193   : > { %v2888_v9 = vpop.permute.xlu0 %2887  ;;  %2975 = vst.msk [vmem:[#allocation2 + $0x2c] sm:$0xf] %vm2963_vm9, %v2890_v8  ;;  %v3677_v8 = vrot.slane %v3559_v62, 4 }
 0x194   : > { %2974 = vst.msk [vmem:[#allocation2 + $0x28] sm:$0xf] %vm2963_vm9, %v2888_v9  ;;  %2139 = vrot.lane.b32.xlu1 %v5554_v1, %s6058_s26  ;;  %v3679_v9 = vrot.slane %v3560_v63, 4  ;;  %v3676_v10 = vrot.slane %v3558_v0, 4  ;;  %v2429_v0 = vrot.slane %v2308_v53, 4 }
 0x195   : > { %2137 = vrot.lane.b32.xlu0 %v5553_v2, %s6058_s26 }
 0x196   : > { %v3367_v17 = vpop.permute.xlu1 %3366  ;;  %v3680_v19 = vsel %vm1110_vm2, %v3677_v8, %v3679_v9  ;;  %v3678_v20 = vsel %vm1110_vm2, %v3676_v10, %v3677_v8 }
 0x197   : > { %v3365_v18 = vpop.permute.xlu0 %3364  ;;  %3454 = vst.msk [vmem:[#allocation2 + $0x24] sm:$0xf] %vm3444_vm10, %v3367_v17  ;;  %v4971_v17 = vld [vmem:[%s6112_s22 + $0xb0] sm:$0x1] }
 0x198   : > { %3453 = vst.msk [vmem:[#allocation2 + $0x20] sm:$0xf] %vm3444_vm10, %v3365_v18  ;;  %2616 = vrot.lane.b32.xlu1 %v5584_v11, %s6059_s27  ;;  %v4969_v18 = vld [vmem:[%s6112_s22 + $0xa8] sm:$0xe]  ;;  %v1827_v24 = vunpack.c.l.bf16 %v4971_v17 }
 0x199   : > { %2614 = vrot.lane.b32.xlu0 %v5583_v12, %s6059_s27  ;;  %v1825_v25 = vunpack.c.l.bf16 %v4969_v18 }
 0x19a   : > { %v3371_v26 = vpop.permute.xlu1 %3370 }
 0x19b   : > { %v3369_v27 = vpop.permute.xlu0 %3368  ;;  %3456 = vst.msk [vmem:[#allocation2 + $0x2c] sm:$0xf] %vm3444_vm10, %v3371_v26  ;;  %v5682_v26 = vpack.c.bf16 %v3680_v19, %v3680_v19  ;;  %v1945_v34 = vrot.slane %v1825_v25, 2  ;;  %v5211_v19 = vld [vmem:[%s6112_s22 + $0xc8] sm:$0x1] }
 0x19c   : > { %3455 = vst.msk [vmem:[#allocation2 + $0x28] sm:$0xf] %vm3444_vm10, %v3369_v27  ;;  %2620 = vrot.lane.b32.xlu1 %v5586_v22, %s6059_s27  ;;  %v5681_v27 = vpack.c.bf16 %v3678_v20, %v3678_v20  ;;  %v5209_v20 = vld [vmem:[%s6112_s22 + $0xc0] sm:$0xe] }
 0x19d   : > { %2618 = vrot.lane.b32.xlu0 %v5585_v23, %s6059_s27  ;;  %v1826_v23 = vunpack.c.l.bf16 %v4970_v14 }
 0x19e   : > { %v3848_v38 = vpop.permute.xlu1 %3847 }
 0x19f   : > { %v3846_v39 = vpop.permute.xlu0 %3845  ;;  %3935 = vst.msk [vmem:[#allocation2 + $0x24] sm:$0xf] %vm3925_vm11, %v3848_v38  ;;  %v1830_v38 = vunpack.c.l.bf16 %v4974_v28 }
 0x1a0   : > { %3934 = vst.msk [vmem:[#allocation2 + $0x20] sm:$0xf] %vm3925_vm11, %v3846_v39  ;;  %2909 = vrot.lane.b32.xlu1 %v5999_v32, %s6060_s28  ;;  %v1946_v32 = vrot.slane %v1826_v23, 2  ;;  %v1828_v39 = vunpack.c.l.bf16 %v4972_v29 }
 0x1a1   : > { %2907 = vrot.lane.b32.xlu0 %v6000_v33, %s6060_s28  ;;  %v1948_v33 = vrot.slane %v1827_v24, 2  ;;  %v1953_v50 = vrot.slane %v1830_v38, 2  ;;  %v6009_v38 = vld [vmem:[%s6112_s22 + $0xc4] ss:$0 sps:$4 sm:$0xff]  }
 0x1a2   : > { %v3852_v51 = vpop.permute.xlu1 %3851  ;;  %v1947_v46 = vsel %vm628_vm0, %v1945_v34, %v1946_v32 }
 0x1a3   : > { %v3850_v52 = vpop.permute.xlu0 %3849  ;;  %3937 = vst.msk [vmem:[#allocation2 + $0x2c] sm:$0xf] %vm3925_vm11, %v3852_v51  ;;  %v1950_v51 = vrot.slane %v1828_v39, 2  ;;  %v5555_v60 = vpack.c.bf16 %v1947_v46, %v1947_v46  ;;  %v1954_v61 = vsel %vm628_vm0, %v1951_v47, %v1953_v50  ;;  %v6010_v39 = vld [vmem:[%s6112_s22 + $0xc0] ss:$0 sps:$4 sm:$0xff]  }
 0x1a4   : > { %3936 = vst.msk [vmem:[#allocation2 + $0x28] sm:$0xf] %vm3925_vm11, %v3850_v52  ;;  %2913 = vrot.lane.b32.xlu1 %v6001_v44, %s6060_s28  ;;  %v5049_v44 = vld [vmem:[%s6112_s22 + $0xa8] sm:$0xc]  ;;  %v2307_v52 = vunpack.c.l.bf16 %v5050_v40  ;;  %v5558_v7 = vpack.c.bf16 %v1954_v61, %v1954_v61 }
 0x1a5   : > { %2911 = vrot.lane.b32.xlu0 %v6002_v45, %s6060_s28  ;;  %v1949_v45 = vsel %vm628_vm0, %v1946_v32, %v1948_v33  ;;  %v2306_v54 = vunpack.c.l.bf16 %v5049_v44  ;;  %v1952_v62 = vsel %vm628_vm0, %v1950_v51, %v1951_v47  ;;  %v5289_v44 = vld [vmem:[%s6112_s22 + $0xc0] sm:$0xc]  ;;  %v6012_v51 = vld [vmem:[%s6112_s22 + $0xd0] ss:$0 sps:$4 sm:$0xff]  }
 0x1a6   : > { %v2120_v1 = vpop.permute.xlu1 %2119  ;;  %v5556_v59 = vpack.c.bf16 %v1949_v45, %v1949_v45  ;;  %v2427_v63 = vrot.slane %v2307_v52, 4  ;;  %v5557_v8 = vpack.c.bf16 %v1952_v62, %v1952_v62  ;;  %v6013_v52 = vld [vmem:[%s6112_s22 + $0xcc] ss:$0 sps:$4 sm:$0xff]  }
 0x1a7   : > { %v2118_v2 = vpop.permute.xlu0 %2117  ;;  %v6003_v3 = vld [vmem:[#allocation2 + $0x20] sm:$0xff]   ;;  %2203 = vst.msk [vmem:[#allocation2 + $0x34] sm:$0xf] %vm2189_vm7, %v2120_v1  ;;  %v2426_v1 = vrot.slane %v2306_v54, 4 }
 0x1a8   : > { %2202 = vst.msk [vmem:[#allocation2 + $0x30] sm:$0xf] %vm2189_vm7, %v2118_v2  ;;  %3390 = vrot.lane.b32.xlu1 %v5648_v55, %s6061_s7  ;;  %5851 = vmatprep.mubr.msk.bf16.mxu0 %vm4090_vm12, %v6003_v3  ;;  %v2310_v2 = vunpack.c.h.bf16 %v5050_v40  ;;  %v2311_v3 = vunpack.c.l.bf16 %v5054_v57  ;;  %v2430_v9 = vsel %vm1110_vm2, %v2427_v63, %v2429_v0  ;;  %v3561_v57 = vunpack.c.l.bf16 %v5289_v44 }
 0x1a9   : > { %3388 = vrot.lane.b32.xlu0 %v5647_v56, %s6061_s7  ;;  %v2428_v10 = vsel %vm1110_vm2, %v2426_v1, %v2427_v63  ;;  %v5588_v17 = vpack.c.bf16 %v2430_v9, %v2430_v9 }
 0x1aa   : > { %v2124_v11 = vpop.permute.xlu1 %2123  ;;  %v5587_v18 = vpack.c.bf16 %v2428_v10, %v2428_v10 }
 0x1ab   : > { %v2122_v12 = vpop.permute.xlu0 %2121  ;;  %v6004_v13 = vld [vmem:[#allocation2 + $0x28] sm:$0xff]   ;;  %2205 = vst.msk [vmem:[#allocation2 + $0x3c] sm:$0xf] %vm2189_vm7, %v2124_v11  ;;  %v2432_v11 = vrot.slane %v2310_v2, 4 }
 0x1ac   : > { %2204 = vst.msk [vmem:[#allocation2 + $0x38] sm:$0xf] %vm2189_vm7, %v2122_v12  ;;  %3394 = vrot.lane.b32.xlu1 %v5650_v4, %s6061_s7  ;;  %5852 = vmatmul.mubr.msk.bf16.gmra.mxu0 %vm4090_vm12, %v6004_v13  ;;  %v2309_v4 = vunpack.c.l.bf16 %v5052_v58  ;;  %v2434_v12 = vrot.slane %v2311_v3, 4  ;;  %v5294_v58 = vld [vmem:[%s6112_s22 + $0xd4] sm:$0x3] }
 0x1ad   : > { %3392 = vrot.lane.b32.xlu0 %v5649_v5, %s6061_s7 }
 0x1ae   : > { %v2601_v21 = vpop.permute.xlu1 %2600  ;;  %v2431_v13 = vrot.slane %v2309_v4, 4 }
 0x1af   : > { %v2599_v22 = vpop.permute.xlu0 %2598  ;;  %2684 = vst.msk [vmem:[#allocation2 + $0x34] sm:$0xf] %vm2670_vm8, %v2601_v21  ;;  %v2435_v21 = vsel %vm1110_vm2, %v2432_v11, %v2434_v12 }
 0x1b0   : > { %2683 = vst.msk [vmem:[#allocation2 + $0x30] sm:$0xf] %vm2670_vm8, %v2599_v22  ;;  %3871 = vrot.lane.b32.xlu1 %v5680_v15, %s6062_s10  ;;  %v2433_v22 = vsel %vm1110_vm2, %v2431_v13, %v2432_v11  ;;  %v5590_v28 = vpack.c.bf16 %v2435_v21, %v2435_v21 }
 0x1b1   : > { %3869 = vrot.lane.b32.xlu0 %v5679_v16, %s6062_s10  ;;  %v5210_v16 = vld [vmem:[%s6112_s22 + $0xc4] ss:$12 sps:$4 sm:$0xff]   ;;  %v5589_v29 = vpack.c.bf16 %v2433_v22, %v2433_v22 }
 0x1b2   : > { %v2605_v30 = vpop.permute.xlu1 %2604  ;;  %v3081_v25 = vunpack.c.l.bf16 %v5210_v16 }
 0x1b3   : > { %v2603_v31 = vpop.permute.xlu0 %2602  ;;  %2686 = vst.msk [vmem:[#allocation2 + $0x3c] sm:$0xf] %vm2670_vm8, %v2605_v30  ;;  %v5214_v30 = vld [vmem:[%s6112_s22 + $0xd4] sm:$0x1] }
 0x1b4   : > { %2685 = vst.msk [vmem:[#allocation2 + $0x38] sm:$0xf] %vm2670_vm8, %v2603_v31  ;;  %3875 = vrot.lane.b32.xlu1 %v5682_v26, %s6062_s10  ;;  %v3082_v26 = vunpack.c.l.bf16 %v5211_v19  ;;  %v5212_v31 = vld [vmem:[%s6112_s22 + $0xcc] sm:$0xe]  ;;  %v3201_v34 = vrot.slane %v3081_v25, 2  ;;  %v3085_v40 = vunpack.c.l.bf16 %v5214_v30 }
 0x1b5   : > { %3873 = vrot.lane.b32.xlu0 %v5681_v27, %s6062_s10  ;;  %v3080_v27 = vunpack.c.l.bf16 %v5209_v20  ;;  %v3083_v41 = vunpack.c.l.bf16 %v5212_v31  ;;  %v4976_v20 = vld [vmem:[%s6112_s22 + $0xc4] ss:$12 sps:$4 sm:$0xff]  }
 0x1b6   : > { %v2894_v42 = vpop.permute.xlu1 %2893  ;;  %v3203_v35 = vrot.slane %v3082_v26, 2  ;;  %v3208_v53 = vrot.slane %v3085_v40, 2 }
 0x1b7   : > { %v2892_v43 = vpop.permute.xlu0 %2891  ;;  %2977 = vst.msk [vmem:[#allocation2 + $0x34] sm:$0xf] %vm2963_vm9, %v2894_v42  ;;  %v5290_v42 = vld [vmem:[%s6112_s22 + $0xc4] ss:$12 sps:$4 sm:$0xff]   ;;  %v3205_v54 = vrot.slane %v3083_v41, 2  ;;  %v1835_v41 = vunpack.c.h.bf16 %v4976_v20 }
 0x1b8   : > { %2976 = vst.msk [vmem:[#allocation2 + $0x30] sm:$0xf] %vm2963_vm9, %v2892_v43  ;;  %1662 = vrot.lane.b32.xlu1 %v6005_v36, %s6057_s25  ;;  %v3200_v36 = vrot.slane %v3080_v27, 2  ;;  %v5291_v43 = vld [vmem:[%s6112_s22 + $0xc8] sm:$0x3] }
 0x1b9   : > { %1660 = vrot.lane.b32.xlu0 %v6006_v37, %s6057_s25  ;;  %v3084_v37 = vunpack.c.h.bf16 %v5210_v16 }
 0x1ba   : > { %v2898_v55 = vpop.permute.xlu1 %2897 }
 0x1bb   : > { %v2896_v56 = vpop.permute.xlu0 %2895  ;;  %2979 = vst.msk [vmem:[#allocation2 + $0x3c] sm:$0xf] %vm2963_vm9, %v2898_v55  ;;  %v3206_v50 = vrot.slane %v3084_v37, 2  ;;  %v3562_v55 = vunpack.c.l.bf16 %v5290_v42 }
 0x1bc   : > { %2978 = vst.msk [vmem:[#allocation2 + $0x38] sm:$0xf] %vm2963_vm9, %v2896_v56  ;;  %1666 = vrot.lane.b32.xlu1 %v6007_v48, %s6057_s25  ;;  %v3204_v48 = vsel %vm628_vm0, %v3201_v34, %v3203_v35  ;;  %v3563_v56 = vunpack.c.l.bf16 %v5291_v43  ;;  %v4978_v35 = vld [vmem:[%s6112_s22 + $0xcc] sm:$0xe]  ;;  %v6016_v43 = vld [vmem:[%s6112_s22 + $0xc0] ss:$0 sps:$4 sm:$0xff]  }
 0x1bd   : > { %1664 = vrot.lane.b32.xlu0 %v6008_v49, %s6057_s25  ;;  %v3202_v49 = vsel %vm628_vm0, %v3200_v36, %v3201_v34  ;;  %v5652_v63 = vpack.c.bf16 %v3204_v48, %v3204_v48  ;;  %v3209_v1 = vsel %vm628_vm0, %v3206_v50, %v3208_v53  ;;  %v3207_v2 = vsel %vm628_vm0, %v3205_v54, %v3206_v50  ;;  %v4980_v34 = vld [vmem:[%s6112_s22 + $0xd4] sm:$0x1]  ;;  %v5055_v50 = vld [vmem:[%s6112_s22 + $0xc0] sm:$0xc]  ;;  %v6017_v54 = vld [vmem:[%s6112_s22 + $0xd0] ss:$0 sps:$4 sm:$0xff]  }
 0x1be   : > { %v3375_v5 = vpop.permute.xlu1 %3374  ;;  %v5651_v0 = vpack.c.bf16 %v3202_v49, %v3202_v49  ;;  %v3682_v3 = vrot.slane %v3562_v55, 4  ;;  %v3684_v4 = vrot.slane %v3563_v56, 4  ;;  %v5654_v11 = vpack.c.bf16 %v3209_v1, %v3209_v1  ;;  %v6018_v55 = vld [vmem:[%s6112_s22 + $0xcc] ss:$0 sps:$4 sm:$0xff]  }
 0x1bf   : > { %v3373_v6 = vpop.permute.xlu0 %3372  ;;  %3458 = vst.msk [vmem:[#allocation2 + $0x34] sm:$0xf] %vm3444_vm10, %v3375_v5  ;;  %v3681_v5 = vrot.slane %v3561_v57, 4  ;;  %v5653_v12 = vpack.c.bf16 %v3207_v2, %v3207_v2  ;;  %v1836_v44 = vunpack.c.l.bf16 %v4980_v34  ;;  %v1961_v53 = vrot.slane %v1835_v41, 2 }
 0x1c0   : > { %3457 = vst.msk [vmem:[#allocation2 + $0x30] sm:$0xf] %vm3444_vm10, %v3373_v6  ;;  %2143 = vrot.lane.b32.xlu1 %v5556_v59, %s6058_s26  ;;  %v5292_v59 = vld [vmem:[%s6112_s22 + $0xcc] sm:$0xc]  ;;  %v3565_v6 = vunpack.c.h.bf16 %v5290_v42  ;;  %v3685_v13 = vsel %vm1110_vm2, %v3682_v3, %v3684_v4  ;;  %v6015_v42 = vld [vmem:[%s6112_s22 + $0xc4] ss:$0 sps:$4 sm:$0xff]  }
 0x1c1   : > { %2141 = vrot.lane.b32.xlu0 %v5555_v60, %s6058_s26  ;;  %v5684_v21 = vpack.c.bf16 %v3685_v13, %v3685_v13  ;;  %v1963_v56 = vrot.slane %v1836_v44, 2 }
 0x1c2   : > { %v3379_v14 = vpop.permute.xlu1 %3378 }
 0x1c3   : > { %v3377_v15 = vpop.permute.xlu0 %3376  ;;  %3460 = vst.msk [vmem:[#allocation2 + $0x3c] sm:$0xf] %vm3444_vm10, %v3379_v14  ;;  %v3683_v14 = vsel %vm1110_vm2, %v3681_v5, %v3682_v3  ;;  %v1964_v3 = vsel %vm628_vm0, %v1961_v53, %v1963_v56 }
 0x1c4   : > { %3459 = vst.msk [vmem:[#allocation2 + $0x38] sm:$0xf] %vm3444_vm10, %v3377_v15  ;;  %2147 = vrot.lane.b32.xlu1 %v5558_v7, %s6058_s26  ;;  %v3566_v7 = vunpack.c.l.bf16 %v5294_v58  ;;  %v3687_v15 = vrot.slane %v3565_v6, 4  ;;  %v5683_v22 = vpack.c.bf16 %v3683_v14, %v3683_v14  ;;  %v5562_v13 = vpack.c.bf16 %v1964_v3, %v1964_v3  ;;  %v5300_v3 = vld [vmem:[%s6112_s22 + $0xec] sm:$0x3] }
 0x1c5   : > { %2145 = vrot.lane.b32.xlu0 %v5557_v8, %s6058_s26  ;;  %v3564_v8 = vunpack.c.l.bf16 %v5292_v59 }
 0x1c6   : > { %v3856_v23 = vpop.permute.xlu1 %3855  ;;  %v3689_v16 = vrot.slane %v3566_v7, 4 }
 0x1c7   : > { %v3854_v24 = vpop.permute.xlu0 %3853  ;;  %3939 = vst.msk [vmem:[#allocation2 + $0x34] sm:$0xf] %vm3925_vm11, %v3856_v23  ;;  %v4977_v23 = vld [vmem:[%s6112_s22 + $0xc8] sm:$0x1] }
 0x1c8   : > { %3938 = vst.msk [vmem:[#allocation2 + $0x30] sm:$0xf] %vm3925_vm11, %v3854_v24  ;;  %2624 = vrot.lane.b32.xlu1 %v5588_v17, %s6059_s27  ;;  %v3686_v17 = vrot.slane %v3564_v8, 4  ;;  %v4975_v24 = vld [vmem:[%s6112_s22 + $0xc0] sm:$0xe]  ;;  %v3690_v25 = vsel %vm1110_vm2, %v3687_v15, %v3689_v16  ;;  %v1833_v30 = vunpack.c.l.bf16 %v4977_v23 }
 0x1c9   : > { %2622 = vrot.lane.b32.xlu0 %v5587_v18, %s6059_s27  ;;  %v1831_v31 = vunpack.c.l.bf16 %v4975_v24 }
 0x1ca   : > { %v3860_v32 = vpop.permute.xlu1 %3859  ;;  %v3688_v26 = vsel %vm1110_vm2, %v3686_v17, %v3687_v15 }
 0x1cb   : > { %v3858_v33 = vpop.permute.xlu0 %3857  ;;  %3941 = vst.msk [vmem:[#allocation2 + $0x3c] sm:$0xf] %vm3925_vm11, %v3860_v32  ;;  %v5686_v32 = vpack.c.bf16 %v3690_v25, %v3690_v25  ;;  %v1955_v40 = vrot.slane %v1831_v31, 2  ;;  %v5217_v25 = vld [vmem:[%s6112_s22 + $0xe0] sm:$0x1] }
 0x1cc   : > { %3940 = vst.msk [vmem:[#allocation2 + $0x38] sm:$0xf] %vm3925_vm11, %v3858_v33  ;;  %2628 = vrot.lane.b32.xlu1 %v5590_v28, %s6059_s27  ;;  %v5685_v33 = vpack.c.bf16 %v3688_v26, %v3688_v26  ;;  %v5215_v26 = vld [vmem:[%s6112_s22 + $0xd8] sm:$0xe] }
 0x1cd   : > { %2626 = vrot.lane.b32.xlu0 %v5589_v29, %s6059_s27  ;;  %v1832_v29 = vunpack.c.l.bf16 %v4976_v20 }
 0x1ce   : > { %v1651_v45 = vpop.permute.xlu1 %1650 }
 0x1cf   : > { %v1649_v46 = vpop.permute.xlu0 %1648  ;;  %v6011_v47 = vld [vmem:[#allocation2 + $0x30] sm:$0xff]   ;;  %1728 = vst.msk [vmem:[#allocation2 + $0x4c] sm:$0xf] %vm1708_vm6, %v1651_v45  ;;  %v1834_v45 = vunpack.c.l.bf16 %v4978_v35 }
 0x1d0   : > { %1727 = vst.msk [vmem:[#allocation2 + $0x48] sm:$0xf] %vm1708_vm6, %v1649_v46  ;;  %2917 = vrot.lane.b32.xlu1 %v6009_v38, %s6060_s28  ;;  %5855 = vmatprep.mubr.msk.bf16.mxu0 %vm4090_vm12, %v6011_v47  ;;  %v1956_v38 = vrot.slane %v1832_v29, 2  ;;  %v5056_v46 = vld [vmem:[%s6112_s22 + $0xc4] ss:$12 sps:$4 sm:$0xff]  }
 0x1d1   : > { %2915 = vrot.lane.b32.xlu0 %v6010_v39, %s6060_s28  ;;  %v1958_v39 = vrot.slane %v1833_v30, 2  ;;  %v5057_v47 = vld [vmem:[%s6112_s22 + $0xc8] sm:$0x3]  ;;  %v1960_v57 = vrot.slane %v1834_v45, 2  ;;  %v2313_v58 = vunpack.c.l.bf16 %v5056_v46  ;;  %v2316_v8 = vunpack.c.h.bf16 %v5056_v46  ;;  %v6020_v45 = vld [vmem:[%s6112_s22 + $0xdc] ss:$0 sps:$4 sm:$0xff]  }
 0x1d2   : > { %v2128_v60 = vpop.permute.xlu1 %2127  ;;  %v2314_v59 = vunpack.c.l.bf16 %v5057_v47  ;;  %v6021_v46 = vld [vmem:[%s6112_s22 + $0xd8] ss:$0 sps:$4 sm:$0xff]  }
 0x1d3   : > { %v2126_v61 = vpop.permute.xlu0 %2125  ;;  %v6014_v62 = vld [vmem:[#allocation2 + $0x38] sm:$0xff]   ;;  %2207 = vst.msk [vmem:[#allocation2 + $0x44] sm:$0xf] %vm2189_vm7, %v2128_v60  ;;  %v2312_v60 = vunpack.c.l.bf16 %v5055_v50  ;;  %v1962_v4 = vsel %vm628_vm0, %v1960_v57, %v1961_v53  ;;  %v2437_v5 = vrot.slane %v2313_v58, 4  ;;  %v2442_v17 = vrot.slane %v2316_v8, 4 }
 0x1d4   : > { %2206 = vst.msk [vmem:[#allocation2 + $0x40] sm:$0xf] %vm2189_vm7, %v2126_v61  ;;  %2921 = vrot.lane.b32.xlu1 %v6012_v51, %s6060_s28  ;;  %5856 = vmatmul.mubr.msk.bf16.gmra.mxu0 %vm4090_vm12, %v6014_v62  ;;  %v1959_v51 = vsel %vm628_vm0, %v1956_v38, %v1958_v39  ;;  %v2439_v6 = vrot.slane %v2314_v59, 4  ;;  %v5561_v14 = vpack.c.bf16 %v1962_v4, %v1962_v4  ;;  %v5297_v50 = vld [vmem:[%s6112_s22 + $0xe0] sm:$0x3] }
 0x1d5   : > { %2919 = vrot.lane.b32.xlu0 %v6013_v52, %s6060_s28  ;;  %v1957_v52 = vsel %vm628_vm0, %v1955_v40, %v1956_v38  ;;  %v5560_v1 = vpack.c.bf16 %v1959_v51, %v1959_v51  ;;  %v2436_v7 = vrot.slane %v2312_v60, 4  ;;  %v5295_v51 = vld [vmem:[%s6112_s22 + $0xd8] sm:$0xc]  ;;  %v6023_v58 = vld [vmem:[%s6112_s22 + $0xe8] ss:$0 sps:$4 sm:$0xff]  }
 0x1d6   : > { %v2132_v9 = vpop.permute.xlu1 %2131  ;;  %v5559_v2 = vpack.c.bf16 %v1957_v52, %v1957_v52  ;;  %v2440_v15 = vsel %vm1110_vm2, %v2437_v5, %v2439_v6  ;;  %v6024_v59 = vld [vmem:[%s6112_s22 + $0xe4] ss:$0 sps:$4 sm:$0xff]   ;;  %v5298_v4 = vld [vmem:[%s6112_s22 + $0xe4] sm:$0xc] }
 0x1d7   : > { %v2130_v10 = vpop.permute.xlu0 %2129  ;;  %2209 = vst.msk [vmem:[#allocation2 + $0x4c] sm:$0xf] %vm2189_vm7, %v2132_v9  ;;  %v2438_v16 = vsel %vm1110_vm2, %v2436_v7, %v2437_v5  ;;  %v5592_v23 = vpack.c.bf16 %v2440_v15, %v2440_v15 }
 0x1d8   : > { %2208 = vst.msk [vmem:[#allocation2 + $0x48] sm:$0xf] %vm2189_vm7, %v2130_v10  ;;  %3398 = vrot.lane.b32.xlu1 %v5652_v63, %s6061_s7  ;;  %v5060_v63 = vld [vmem:[%s6112_s22 + $0xd4] sm:$0x3]  ;;  %v5591_v24 = vpack.c.bf16 %v2438_v16, %v2438_v16 }
 0x1d9   : > { %3396 = vrot.lane.b32.xlu0 %v5651_v0, %s6061_s7  ;;  %v5058_v0 = vld [vmem:[%s6112_s22 + $0xcc] sm:$0xc]  ;;  %v2317_v9 = vunpack.c.l.bf16 %v5060_v63  ;;  %v3569_v63 = vunpack.c.l.bf16 %v5297_v50 }
 0x1da   : > { %v2609_v18 = vpop.permute.xlu1 %2608  ;;  %v2315_v10 = vunpack.c.l.bf16 %v5058_v0  ;;  %v3567_v0 = vunpack.c.l.bf16 %v5295_v51 }
 0x1db   : > { %v2607_v19 = vpop.permute.xlu0 %2606  ;;  %2688 = vst.msk [vmem:[#allocation2 + $0x44] sm:$0xf] %vm2670_vm8, %v2609_v18  ;;  %v2444_v18 = vrot.slane %v2317_v9, 4 }
 0x1dc   : > { %2687 = vst.msk [vmem:[#allocation2 + $0x40] sm:$0xf] %vm2670_vm8, %v2607_v19  ;;  %3402 = vrot.lane.b32.xlu1 %v5654_v11, %s6061_s7  ;;  %v2441_v19 = vrot.slane %v2315_v10, 4  ;;  %v3694_v10 = vrot.slane %v3569_v63, 4 }
 0x1dd   : > { %3400 = vrot.lane.b32.xlu0 %v5653_v12, %s6061_s7 }
 0x1de   : > { %v2613_v27 = vpop.permute.xlu1 %2612 }
 0x1df   : > { %v2611_v28 = vpop.permute.xlu0 %2610  ;;  %2690 = vst.msk [vmem:[#allocation2 + $0x4c] sm:$0xf] %vm2670_vm8, %v2613_v27  ;;  %v2445_v27 = vsel %vm1110_vm2, %v2442_v17, %v2444_v18 }
 0x1e0   : > { %2689 = vst.msk [vmem:[#allocation2 + $0x48] sm:$0xf] %vm2670_vm8, %v2611_v28  ;;  %3879 = vrot.lane.b32.xlu1 %v5684_v21, %s6062_s10  ;;  %v2443_v28 = vsel %vm1110_vm2, %v2441_v19, %v2442_v17  ;;  %v5594_v34 = vpack.c.bf16 %v2445_v27, %v2445_v27 }
 0x1e1   : > { %3877 = vrot.lane.b32.xlu0 %v5683_v22, %s6062_s10  ;;  %v5216_v22 = vld [vmem:[%s6112_s22 + $0xdc] ss:$12 sps:$4 sm:$0xff]   ;;  %v5593_v35 = vpack.c.bf16 %v2443_v28, %v2443_v28 }
 0x1e2   : > { %v2902_v36 = vpop.permute.xlu1 %2901  ;;  %v3087_v31 = vunpack.c.l.bf16 %v5216_v22  ;;  %v3090_v44 = vunpack.c.h.bf16 %v5216_v22 }
 0x1e3   : > { %v2900_v37 = vpop.permute.xlu0 %2899  ;;  %2981 = vst.msk [vmem:[#allocation2 + $0x44] sm:$0xf] %vm2963_vm9, %v2902_v36  ;;  %v5220_v36 = vld [vmem:[%s6112_s22 + $0xec] sm:$0x1] }
 0x1e4   : > { %2980 = vst.msk [vmem:[#allocation2 + $0x40] sm:$0xf] %vm2963_vm9, %v2900_v37  ;;  %3883 = vrot.lane.b32.xlu1 %v5686_v32, %s6062_s10  ;;  %v3088_v32 = vunpack.c.l.bf16 %v5217_v25  ;;  %v5218_v37 = vld [vmem:[%s6112_s22 + $0xe4] sm:$0xe]  ;;  %v3211_v41 = vrot.slane %v3087_v31, 2  ;;  %v3091_v47 = vunpack.c.l.bf16 %v5220_v36  ;;  %v3216_v57 = vrot.slane %v3090_v44, 2 }
 0x1e5   : > { %3881 = vrot.lane.b32.xlu0 %v5685_v33, %s6062_s10  ;;  %v3086_v33 = vunpack.c.l.bf16 %v5215_v26 }
 0x1e6   : > { %v2906_v48 = vpop.permute.xlu1 %2905  ;;  %v3218_v60 = vrot.slane %v3091_v47, 2 }
 0x1e7   : > { %v2904_v49 = vpop.permute.xlu0 %2903  ;;  %2983 = vst.msk [vmem:[#allocation2 + $0x4c] sm:$0xf] %vm2963_vm9, %v2906_v48  ;;  %v3089_v48 = vunpack.c.l.bf16 %v5218_v37 }
 0x1e8   : > { %2982 = vst.msk [vmem:[#allocation2 + $0x48] sm:$0xf] %vm2963_vm9, %v2904_v49  ;;  %1670 = vrot.lane.b32.xlu1 %v6015_v42, %s6057_s25  ;;  %v3213_v42 = vrot.slane %v3088_v32, 2  ;;  %v5296_v49 = vld [vmem:[%s6112_s22 + $0xdc] ss:$12 sps:$4 sm:$0xff]   ;;  %v3219_v7 = vsel %vm628_vm0, %v3216_v57, %v3218_v60 }
 0x1e9   : > { %1668 = vrot.lane.b32.xlu0 %v6016_v43, %s6057_s25  ;;  %v3210_v43 = vrot.slane %v3086_v33, 2  ;;  %v5658_v17 = vpack.c.bf16 %v3219_v7, %v3219_v7 }
 0x1ea   : > { %v3383_v61 = vpop.permute.xlu1 %3382 }
 0x1eb   : > { %v3381_v62 = vpop.permute.xlu0 %3380  ;;  %3462 = vst.msk [vmem:[#allocation2 + $0x44] sm:$0xf] %vm3444_vm10, %v3383_v61  ;;  %v3212_v56 = vsel %vm628_vm0, %v3210_v43, %v3211_v41  ;;  %v3215_v61 = vrot.slane %v3089_v48, 2 }
 0x1ec   : > { %3461 = vst.msk [vmem:[#allocation2 + $0x40] sm:$0xf] %vm3444_vm10, %v3381_v62  ;;  %1674 = vrot.lane.b32.xlu1 %v6017_v54, %s6057_s25  ;;  %v3568_v62 = vunpack.c.l.bf16 %v5296_v49  ;;  %v5655_v6 = vpack.c.bf16 %v3212_v56, %v3212_v56 }
 0x1ed   : > { %1672 = vrot.lane.b32.xlu0 %v6018_v55, %s6057_s25  ;;  %v3214_v55 = vsel %vm628_vm0, %v3211_v41, %v3213_v42  ;;  %v3217_v8 = vsel %vm628_vm0, %v3215_v61, %v3216_v57 }
 0x1ee   : > { %v3387_v11 = vpop.permute.xlu1 %3386  ;;  %v5656_v5 = vpack.c.bf16 %v3214_v55, %v3214_v55  ;;  %v3692_v9 = vrot.slane %v3568_v62, 4  ;;  %v5657_v18 = vpack.c.bf16 %v3217_v8, %v3217_v8 }
 0x1ef   : > { %v3385_v12 = vpop.permute.xlu0 %3384  ;;  %3464 = vst.msk [vmem:[#allocation2 + $0x4c] sm:$0xf] %vm3444_vm10, %v3387_v11  ;;  %v3691_v11 = vrot.slane %v3567_v0, 4 }
 0x1f0   : > { %3463 = vst.msk [vmem:[#allocation2 + $0x48] sm:$0xf] %vm3444_vm10, %v3385_v12  ;;  %2151 = vrot.lane.b32.xlu1 %v5560_v1, %s6058_s26  ;;  %v3571_v12 = vunpack.c.h.bf16 %v5296_v49  ;;  %v3695_v19 = vsel %vm1110_vm2, %v3692_v9, %v3694_v10 }
 0x1f1   : > { %2149 = vrot.lane.b32.xlu0 %v5559_v2, %s6058_s26  ;;  %v5688_v26 = vpack.c.bf16 %v3695_v19, %v3695_v19 }
 0x1f2   : > { %v3864_v20 = vpop.permute.xlu1 %3863 }
 0x1f3   : > { %v3862_v21 = vpop.permute.xlu0 %3861  ;;  %3943 = vst.msk [vmem:[#allocation2 + $0x44] sm:$0xf] %vm3925_vm11, %v3864_v20  ;;  %v3693_v20 = vsel %vm1110_vm2, %v3691_v11, %v3692_v9 }
 0x1f4   : > { %3942 = vst.msk [vmem:[#allocation2 + $0x40] sm:$0xf] %vm3925_vm11, %v3862_v21  ;;  %2155 = vrot.lane.b32.xlu1 %v5562_v13, %s6058_s26  ;;  %v3572_v13 = vunpack.c.l.bf16 %v5300_v3  ;;  %v3697_v21 = vrot.slane %v3571_v12, 4  ;;  %v5687_v27 = vpack.c.bf16 %v3693_v20, %v3693_v20 }
 0x1f5   : > { %2153 = vrot.lane.b32.xlu0 %v5561_v14, %s6058_s26  ;;  %v3570_v14 = vunpack.c.l.bf16 %v5298_v4 }
 0x1f6   : > { %v3868_v29 = vpop.permute.xlu1 %3867  ;;  %v3699_v22 = vrot.slane %v3572_v13, 4 }
 0x1f7   : > { %v3866_v30 = vpop.permute.xlu0 %3865  ;;  %3945 = vst.msk [vmem:[#allocation2 + $0x4c] sm:$0xf] %vm3925_vm11, %v3868_v29 }
 0x1f8   : > { %3944 = vst.msk [vmem:[#allocation2 + $0x48] sm:$0xf] %vm3925_vm11, %v3866_v30  ;;  %2632 = vrot.lane.b32.xlu1 %v5592_v23, %s6059_s27  ;;  %v3696_v23 = vrot.slane %v3570_v14, 4  ;;  %v3700_v28 = vsel %vm1110_vm2, %v3697_v21, %v3699_v22 }
 0x1f9   : > { %2630 = vrot.lane.b32.xlu0 %v5591_v24, %s6059_s27  ;;  %v5690_v32 = vpack.c.bf16 %v3700_v28, %v3700_v28 }
 0x1fa   : > { %v1655_v38 = vpop.permute.xlu1 %1654  ;;  %v3698_v29 = vsel %vm1110_vm2, %v3696_v23, %v3697_v21 }
 0x1fb   : > { %v1653_v39 = vpop.permute.xlu0 %1652  ;;  %v6019_v40 = vld [vmem:[#allocation2 + $0x40] sm:$0xff]   ;;  %1730 = vst.msk [vmem:[#allocation2 + $0x54] sm:$0xf] %vm1708_vm6, %v1655_v38  ;;  %v5689_v33 = vpack.c.bf16 %v3698_v29, %v3698_v29 }
 0x1fc   : > { %1729 = vst.msk [vmem:[#allocation2 + $0x50] sm:$0xf] %vm1708_vm6, %v1653_v39  ;;  %2636 = vrot.lane.b32.xlu1 %v5594_v34, %s6059_s27  ;;  %5859 = vmatprep.mubr.msk.bf16.mxu1 %vm4090_vm12, %v6019_v40 }
 0x1fd   : > { %2634 = vrot.lane.b32.xlu0 %v5593_v35, %s6059_s27 }
 0x1fe   : > { %v1659_v52 = vpop.permute.xlu1 %1658 }
 0x1ff   : > { %v1657_v53 = vpop.permute.xlu0 %1656  ;;  %v6022_v54 = vld [vmem:[#allocation2 + $0x48] sm:$0xff]   ;;  %1732 = vst.msk [vmem:[#allocation2 + $0x5c] sm:$0xf] %vm1708_vm6, %v1659_v52 }
 0x200   : > { %1731 = vst.msk [vmem:[#allocation2 + $0x58] sm:$0xf] %vm1708_vm6, %v1657_v53  ;;  %2925 = vrot.lane.b32.xlu1 %v6020_v45, %s6060_s28  ;;  %5860 = vmatmul.mubr.msk.bf16.vlgmr.msra.gmra.mxu1 %vm4090_vm12, %v6022_v54 }
 0x201   : > { %2923 = vrot.lane.b32.xlu0 %v6021_v46, %s6060_s28 }
 0x202   : > { %v2136_v1 = vpop.permute.xlu1 %2135 }
 0x203   : > { %v2134_v2 = vpop.permute.xlu0 %2133  ;;  %2211 = vst.msk [vmem:[#allocation2 + $0x54] sm:$0xf] %vm2189_vm7, %v2136_v1 }
 0x204   : > { %2210 = vst.msk [vmem:[#allocation2 + $0x50] sm:$0xf] %vm2189_vm7, %v2134_v2  ;;  %2929 = vrot.lane.b32.xlu1 %v6023_v58, %s6060_s28 }
 0x205   : > { %2927 = vrot.lane.b32.xlu0 %v6024_v59, %s6060_s28 }
 0x206   : > { %v2140_v15 = vpop.permute.xlu1 %2139 }
 0x207   : > { %v2138_v16 = vpop.permute.xlu0 %2137  ;;  %2213 = vst.msk [vmem:[#allocation2 + $0x5c] sm:$0xf] %vm2189_vm7, %v2140_v15 }
 0x208   : > { %2212 = vst.msk [vmem:[#allocation2 + $0x58] sm:$0xf] %vm2189_vm7, %v2138_v16  ;;  %3406 = vrot.lane.b32.xlu1 %v5656_v5, %s6061_s7 }
 0x209   : > { %3404 = vrot.lane.b32.xlu0 %v5655_v6, %s6061_s7 }
 0x20a   : > { %v2617_v24 = vpop.permute.xlu1 %2616 }
 0x20b   : > { %v2615_v25 = vpop.permute.xlu0 %2614  ;;  %2692 = vst.msk [vmem:[#allocation2 + $0x54] sm:$0xf] %vm2670_vm8, %v2617_v24 }
 0x20c   : > { %2691 = vst.msk [vmem:[#allocation2 + $0x50] sm:$0xf] %vm2670_vm8, %v2615_v25  ;;  %3410 = vrot.lane.b32.xlu1 %v5658_v17, %s6061_s7 }
 0x20d   : > { %3408 = vrot.lane.b32.xlu0 %v5657_v18, %s6061_s7 }
 0x20e   : > { %v2621_v30 = vpop.permute.xlu1 %2620 }
 0x20f   : > { %v2619_v31 = vpop.permute.xlu0 %2618  ;;  %2694 = vst.msk [vmem:[#allocation2 + $0x5c] sm:$0xf] %vm2670_vm8, %v2621_v30 }
 0x210   : > { %2693 = vst.msk [vmem:[#allocation2 + $0x58] sm:$0xf] %vm2670_vm8, %v2619_v31  ;;  %3887 = vrot.lane.b32.xlu1 %v5688_v26, %s6062_s10 }
 0x211   : > { %3885 = vrot.lane.b32.xlu0 %v5687_v27, %s6062_s10 }
 0x212   : > { %v2910_v34 = vpop.permute.xlu1 %2909 }
 0x213   : > { %v2908_v35 = vpop.permute.xlu0 %2907  ;;  %2985 = vst.msk [vmem:[#allocation2 + $0x54] sm:$0xf] %vm2963_vm9, %v2910_v34 }
 0x214   : > { %2984 = vst.msk [vmem:[#allocation2 + $0x50] sm:$0xf] %vm2963_vm9, %v2908_v35  ;;  %3891 = vrot.lane.b32.xlu1 %v5690_v32, %s6062_s10 }
 0x215   : > { %3889 = vrot.lane.b32.xlu0 %v5689_v33, %s6062_s10 }
 0x216   : > { %v2914_v36 = vpop.permute.xlu1 %2913 }
 0x217   : > { %v2912_v37 = vpop.permute.xlu0 %2911  ;;  %2987 = vst.msk [vmem:[#allocation2 + $0x5c] sm:$0xf] %vm2963_vm9, %v2914_v36 }
 0x218   : > { %2986 = vst.msk [vmem:[#allocation2 + $0x58] sm:$0xf] %vm2963_vm9, %v2912_v37 }
 0x21a   : > { %v3391_v38 = vpop.permute.xlu1 %3390 }
 0x21b   : > { %v3389_v39 = vpop.permute.xlu0 %3388  ;;  %3466 = vst.msk [vmem:[#allocation2 + $0x54] sm:$0xf] %vm3444_vm10, %v3391_v38 }
 0x21c   : > { %3465 = vst.msk [vmem:[#allocation2 + $0x50] sm:$0xf] %vm3444_vm10, %v3389_v39  ;;  %v5845_v40 = vpop.f32.mrf.mxu0 }
 0x21d   : > { %v4504_v53 = vmul.f32 %v5845_v40, %v5845_v40 }
 0x21e   : > { %v3395_v41 = vpop.permute.xlu1 %3394  ;;  %v4177_v43 = vpop.f32.mrf.mxu0 }
 0x21f   : > { %v3393_v42 = vpop.permute.xlu0 %3392  ;;  %3468 = vst.msk [vmem:[#allocation2 + $0x5c] sm:$0xf] %vm3444_vm10, %v3395_v41  ;;  %v4502_v49 = vmul.f32 %v4177_v43, %v4177_v43 }
 0x220   : > { %3467 = vst.msk [vmem:[#allocation2 + $0x58] sm:$0xf] %vm3444_vm10, %v3393_v42  ;;  %v5846_v44 = vpop.f32.mrf.mxu0 }
 0x221   : > { %v5731_v45 = vpack.c.bf16 %v5846_v44, %v5845_v40  ;;  %v4505_v58 = vmul.f32 %v5846_v44, %v5846_v44 }
 0x222   : > { %v3872_v46 = vpop.permute.xlu1 %3871  ;;  %v4180_v48 = vpop.f32.mrf.mxu0 }
 0x223   : > { %v3870_v47 = vpop.permute.xlu0 %3869  ;;  %3947 = vst.msk [vmem:[#allocation2 + $0x54] sm:$0xf] %vm3925_vm11, %v3872_v46  ;;  %5803 = vst [vmem:[%s7165_s14 + $0x8] sm:$0xff] %v5731_v45   ;;  %v5726_v50 = vpack.c.bf16 %v4180_v48, %v4177_v43  ;;  %v4464_v51 = vadd.f32 %v4180_v48, %v4177_v43  ;;  %v4503_v52 = vmul.f32 %v4180_v48, %v4180_v48 }
 0x224   : > { %3946 = vst.msk [vmem:[#allocation2 + $0x50] sm:$0xf] %vm3925_vm11, %v3870_v47 }
 0x225   : > { %5727 = vst [vmem:[%s7165_s14] sm:$0xff] %v5726_v50   ;;  %v4465_v54 = vadd.f32 %v5845_v40, %v4464_v51  ;;  %v4534_v55 = vadd.f32 %v4503_v52, %v4502_v49 }
 0x226   : > { %v3876_v56 = vpop.permute.xlu1 %3875 }
 0x227   : > { %v3874_v57 = vpop.permute.xlu0 %3873  ;;  %3949 = vst.msk [vmem:[#allocation2 + $0x5c] sm:$0xf] %vm3925_vm11, %v3876_v56  ;;  %v4535_v59 = vadd.f32 %v4534_v55, %v4504_v53  ;;  %v4466_v60 = vadd.f32 %v5846_v44, %v4465_v54 }
 0x228   : > { %3948 = vst.msk [vmem:[#allocation2 + $0x58] sm:$0xf] %vm3925_vm11, %v3874_v57 }
 0x229   : > { %v4536_v0 = vadd.f32 %v4535_v59, %v4505_v58 }
 0x22a   : > { %v1663_v61 = vpop.permute.xlu1 %1662 }
 0x22b   : > { %v1661_v62 = vpop.permute.xlu0 %1660  ;;  %v6025_v63 = vld [vmem:[#allocation2 + $0x50] sm:$0xff]   ;;  %1734 = vst.msk [vmem:[#allocation2 + $0x64] sm:$0xf] %vm1708_vm6, %v1663_v61 }
 0x22c   : > { %1733 = vst.msk [vmem:[#allocation2 + $0x60] sm:$0xf] %vm1708_vm6, %v1661_v62  ;;  %5863 = vmatprep.mubr.msk.bf16.mxu1 %vm4090_vm12, %v6025_v63 }
 0x22e   : > { %v1667_v1 = vpop.permute.xlu1 %1666 }
 0x22f   : > { %v1665_v2 = vpop.permute.xlu0 %1664  ;;  %v6026_v3 = vld [vmem:[#allocation2 + $0x58] sm:$0xff]   ;;  %1736 = vst.msk [vmem:[#allocation2 + $0x6c] sm:$0xf] %vm1708_vm6, %v1667_v1 }
 0x230   : > { %1735 = vst.msk [vmem:[#allocation2 + $0x68] sm:$0xf] %vm1708_vm6, %v1665_v2  ;;  %5864 = vmatmul.mubr.msk.bf16.gmra.mxu1 %vm4090_vm12, %v6026_v3 }
 0x232   : > { %v2144_v4 = vpop.permute.xlu1 %2143 }
 0x233   : > { %v2142_v5 = vpop.permute.xlu0 %2141  ;;  %2215 = vst.msk [vmem:[#allocation2 + $0x64] sm:$0xf] %vm2189_vm7, %v2144_v4 }
 0x234   : > { %2214 = vst.msk [vmem:[#allocation2 + $0x60] sm:$0xf] %vm2189_vm7, %v2142_v5 }
 0x236   : > { %v2148_v6 = vpop.permute.xlu1 %2147 }
 0x237   : > { %v2146_v7 = vpop.permute.xlu0 %2145  ;;  %2217 = vst.msk [vmem:[#allocation2 + $0x6c] sm:$0xf] %vm2189_vm7, %v2148_v6 }
 0x238   : > { %2216 = vst.msk [vmem:[#allocation2 + $0x68] sm:$0xf] %vm2189_vm7, %v2146_v7 }
 0x23a   : > { %v2625_v8 = vpop.permute.xlu1 %2624 }
 0x23b   : > { %v2623_v9 = vpop.permute.xlu0 %2622  ;;  %2696 = vst.msk [vmem:[#allocation2 + $0x64] sm:$0xf] %vm2670_vm8, %v2625_v8 }
 0x23c   : > { %2695 = vst.msk [vmem:[#allocation2 + $0x60] sm:$0xf] %vm2670_vm8, %v2623_v9 }
 0x23e   : > { %v2629_v10 = vpop.permute.xlu1 %2628 }
 0x23f   : > { %v2627_v11 = vpop.permute.xlu0 %2626  ;;  %2698 = vst.msk [vmem:[#allocation2 + $0x6c] sm:$0xf] %vm2670_vm8, %v2629_v10 }
 0x240   : > { %2697 = vst.msk [vmem:[#allocation2 + $0x68] sm:$0xf] %vm2670_vm8, %v2627_v11 }
 0x242   : > { %v2918_v12 = vpop.permute.xlu1 %2917 }
 0x243   : > { %v2916_v13 = vpop.permute.xlu0 %2915  ;;  %2989 = vst.msk [vmem:[#allocation2 + $0x64] sm:$0xf] %vm2963_vm9, %v2918_v12 }
 0x244   : > { %2988 = vst.msk [vmem:[#allocation2 + $0x60] sm:$0xf] %vm2963_vm9, %v2916_v13  ;;  %v5849_v14 = vpop.f32.mrf.mxu0 }
 0x245   : > { %v4508_v29 = vmul.f32 %v5849_v14, %v5849_v14 }
 0x246   : > { %v2922_v15 = vpop.permute.xlu1 %2921  ;;  %v4193_v17 = vpop.f32.mrf.mxu0 }
 0x247   : > { %v2920_v16 = vpop.permute.xlu0 %2919  ;;  %2991 = vst.msk [vmem:[#allocation2 + $0x6c] sm:$0xf] %vm2963_vm9, %v2922_v15  ;;  %v4467_v18 = vadd.f32 %v4466_v60, %v4193_v17  ;;  %v4506_v19 = vmul.f32 %v4193_v17, %v4193_v17 }
 0x248   : > { %2990 = vst.msk [vmem:[#allocation2 + $0x68] sm:$0xf] %vm2963_vm9, %v2920_v16  ;;  %v5850_v20 = vpop.f32.mrf.mxu0 }
 0x249   : > { %v4537_v21 = vadd.f32 %v4536_v0, %v4506_v19  ;;  %v5741_v22 = vpack.c.bf16 %v5850_v20, %v5849_v14  ;;  %v4509_v34 = vmul.f32 %v5850_v20, %v5850_v20 }
 0x24a   : > { %v3399_v23 = vpop.permute.xlu1 %3398  ;;  %v4196_v25 = vpop.f32.mrf.mxu0 }
 0x24b   : > { %v3397_v24 = vpop.permute.xlu0 %3396  ;;  %3470 = vst.msk [vmem:[#allocation2 + $0x64] sm:$0xf] %vm3444_vm10, %v3399_v23  ;;  %5805 = vst [vmem:[%s7165_s14 + $0x18] sm:$0xff] %v5741_v22   ;;  %v5736_v26 = vpack.c.bf16 %v4196_v25, %v4193_v17  ;;  %v4468_v27 = vadd.f32 %v4467_v18, %v4196_v25  ;;  %v4507_v28 = vmul.f32 %v4196_v25, %v4196_v25 }
 0x24c   : > { %3469 = vst.msk [vmem:[#allocation2 + $0x60] sm:$0xf] %vm3444_vm10, %v3397_v24 }
 0x24d   : > { %5804 = vst [vmem:[%s7165_s14 + $0x10] sm:$0xff] %v5736_v26   ;;  %v4469_v30 = vadd.f32 %v5849_v14, %v4468_v27  ;;  %v4538_v31 = vadd.f32 %v4537_v21, %v4507_v28 }
 0x24e   : > { %v3403_v32 = vpop.permute.xlu1 %3402 }
 0x24f   : > { %v3401_v33 = vpop.permute.xlu0 %3400  ;;  %3472 = vst.msk [vmem:[#allocation2 + $0x6c] sm:$0xf] %vm3444_vm10, %v3403_v32  ;;  %v4539_v35 = vadd.f32 %v4538_v31, %v4508_v29  ;;  %v4470_v36 = vadd.f32 %v5850_v20, %v4469_v30 }
 0x250   : > { %3471 = vst.msk [vmem:[#allocation2 + $0x68] sm:$0xf] %vm3444_vm10, %v3401_v33 }
 0x251   : > { %v4540_v39 = vadd.f32 %v4539_v35, %v4509_v34 }
 0x252   : > { %v3880_v37 = vpop.permute.xlu1 %3879 }
 0x253   : > { %v3878_v38 = vpop.permute.xlu0 %3877  ;;  %3951 = vst.msk [vmem:[#allocation2 + $0x64] sm:$0xf] %vm3925_vm11, %v3880_v37 }
 0x254   : > { %3950 = vst.msk [vmem:[#allocation2 + $0x60] sm:$0xf] %vm3925_vm11, %v3878_v38 }
 0x256   : > { %v3884_v40 = vpop.permute.xlu1 %3883 }
 0x257   : > { %v3882_v41 = vpop.permute.xlu0 %3881  ;;  %3953 = vst.msk [vmem:[#allocation2 + $0x6c] sm:$0xf] %vm3925_vm11, %v3884_v40 }
 0x258   : > { %3952 = vst.msk [vmem:[#allocation2 + $0x68] sm:$0xf] %vm3925_vm11, %v3882_v41 }
 0x25a   : > { %v1671_v42 = vpop.permute.xlu1 %1670 }
 0x25b   : > { %v1669_v43 = vpop.permute.xlu0 %1668  ;;  %v6027_v44 = vld [vmem:[#allocation2 + $0x60] sm:$0xff]   ;;  %1738 = vst.msk [vmem:[#allocation2 + $0x74] sm:$0xf] %vm1708_vm6, %v1671_v42 }
 0x25c   : > { %1737 = vst.msk [vmem:[#allocation2 + $0x70] sm:$0xf] %vm1708_vm6, %v1669_v43  ;;  %5867 = vmatprep.mubr.msk.bf16.mxu1 %vm4090_vm12, %v6027_v44 }
 0x25e   : > { %v1675_v45 = vpop.permute.xlu1 %1674 }
 0x25f   : > { %v1673_v46 = vpop.permute.xlu0 %1672  ;;  %v6028_v47 = vld [vmem:[#allocation2 + $0x68] sm:$0xff]   ;;  %1740 = vst.msk [vmem:[#allocation2 + $0x7c] sm:$0xf] %vm1708_vm6, %v1675_v45 }
 0x260   : > { %1739 = vst.msk [vmem:[#allocation2 + $0x78] sm:$0xf] %vm1708_vm6, %v1673_v46  ;;  %5868 = vmatmul.mubr.msk.bf16.gmra.mxu1 %vm4090_vm12, %v6028_v47 }
 0x262   : > { %v2152_v48 = vpop.permute.xlu1 %2151 }
 0x263   : > { %v2150_v49 = vpop.permute.xlu0 %2149  ;;  %2219 = vst.msk [vmem:[#allocation2 + $0x74] sm:$0xf] %vm2189_vm7, %v2152_v48 }
 0x264   : > { %2218 = vst.msk [vmem:[#allocation2 + $0x70] sm:$0xf] %vm2189_vm7, %v2150_v49 }
 0x266   : > { %v2156_v50 = vpop.permute.xlu1 %2155 }
 0x267   : > { %v2154_v51 = vpop.permute.xlu0 %2153  ;;  %2221 = vst.msk [vmem:[#allocation2 + $0x7c] sm:$0xf] %vm2189_vm7, %v2156_v50 }
 0x268   : > { %2220 = vst.msk [vmem:[#allocation2 + $0x78] sm:$0xf] %vm2189_vm7, %v2154_v51 }
 0x26a   : > { %v2633_v52 = vpop.permute.xlu1 %2632 }
 0x26b   : > { %v2631_v53 = vpop.permute.xlu0 %2630  ;;  %2700 = vst.msk [vmem:[#allocation2 + $0x74] sm:$0xf] %vm2670_vm8, %v2633_v52 }
 0x26c   : > { %2699 = vst.msk [vmem:[#allocation2 + $0x70] sm:$0xf] %vm2670_vm8, %v2631_v53  ;;  %v5853_v54 = vpop.f32.mrf.mxu0 }
 0x26d   : > { %v4512_v5 = vmul.f32 %v5853_v54, %v5853_v54 }
 0x26e   : > { %v2637_v55 = vpop.permute.xlu1 %2636  ;;  %v4209_v57 = vpop.f32.mrf.mxu0 }
 0x26f   : > { %v2635_v56 = vpop.permute.xlu0 %2634  ;;  %2702 = vst.msk [vmem:[#allocation2 + $0x7c] sm:$0xf] %vm2670_vm8, %v2637_v55  ;;  %v4471_v58 = vadd.f32 %v4470_v36, %v4209_v57  ;;  %v4510_v59 = vmul.f32 %v4209_v57, %v4209_v57 }
 0x270   : > { %2701 = vst.msk [vmem:[#allocation2 + $0x78] sm:$0xf] %vm2670_vm8, %v2635_v56  ;;  %v5854_v60 = vpop.f32.mrf.mxu0 }
 0x271   : > { %v4541_v61 = vadd.f32 %v4540_v39, %v4510_v59  ;;  %v5751_v62 = vpack.c.bf16 %v5854_v60, %v5853_v54  ;;  %v4513_v10 = vmul.f32 %v5854_v60, %v5854_v60 }
 0x272   : > { %v2926_v63 = vpop.permute.xlu1 %2925  ;;  %v4212_v1 = vpop.f32.mrf.mxu0 }
 0x273   : > { %v2924_v0 = vpop.permute.xlu0 %2923  ;;  %2993 = vst.msk [vmem:[#allocation2 + $0x74] sm:$0xf] %vm2963_vm9, %v2926_v63  ;;  %5807 = vst [vmem:[%s7165_s14 + $0x28] sm:$0xff] %v5751_v62   ;;  %v5746_v2 = vpack.c.bf16 %v4212_v1, %v4209_v57  ;;  %v4472_v3 = vadd.f32 %v4471_v58, %v4212_v1  ;;  %v4511_v4 = vmul.f32 %v4212_v1, %v4212_v1 }
 0x274   : > { %2992 = vst.msk [vmem:[#allocation2 + $0x70] sm:$0xf] %vm2963_vm9, %v2924_v0 }
 0x275   : > { %5806 = vst [vmem:[%s7165_s14 + $0x20] sm:$0xff] %v5746_v2   ;;  %v4473_v6 = vadd.f32 %v5853_v54, %v4472_v3  ;;  %v4542_v7 = vadd.f32 %v4541_v61, %v4511_v4 }
 0x276   : > { %v2930_v8 = vpop.permute.xlu1 %2929 }
 0x277   : > { %v2928_v9 = vpop.permute.xlu0 %2927  ;;  %2995 = vst.msk [vmem:[#allocation2 + $0x7c] sm:$0xf] %vm2963_vm9, %v2930_v8  ;;  %v4543_v11 = vadd.f32 %v4542_v7, %v4512_v5  ;;  %v4474_v12 = vadd.f32 %v5854_v60, %v4473_v6 }
 0x278   : > { %2994 = vst.msk [vmem:[#allocation2 + $0x78] sm:$0xf] %vm2963_vm9, %v2928_v9 }
 0x279   : > { %v4544_v15 = vadd.f32 %v4543_v11, %v4513_v10 }
 0x27a   : > { %v3407_v13 = vpop.permute.xlu1 %3406 }
 0x27b   : > { %v3405_v14 = vpop.permute.xlu0 %3404  ;;  %3474 = vst.msk [vmem:[#allocation2 + $0x74] sm:$0xf] %vm3444_vm10, %v3407_v13 }
 0x27c   : > { %3473 = vst.msk [vmem:[#allocation2 + $0x70] sm:$0xf] %vm3444_vm10, %v3405_v14 }
 0x27e   : > { %v3411_v16 = vpop.permute.xlu1 %3410 }
 0x27f   : > { %v3409_v17 = vpop.permute.xlu0 %3408  ;;  %3476 = vst.msk [vmem:[#allocation2 + $0x7c] sm:$0xf] %vm3444_vm10, %v3411_v16 }
 0x280   : > { %3475 = vst.msk [vmem:[#allocation2 + $0x78] sm:$0xf] %vm3444_vm10, %v3409_v17 }
 0x282   : > { %v3888_v18 = vpop.permute.xlu1 %3887 }
 0x283   : > { %v3886_v19 = vpop.permute.xlu0 %3885  ;;  %3955 = vst.msk [vmem:[#allocation2 + $0x74] sm:$0xf] %vm3925_vm11, %v3888_v18 }
 0x284   : > { %3954 = vst.msk [vmem:[#allocation2 + $0x70] sm:$0xf] %vm3925_vm11, %v3886_v19 }
 0x286   : > { %v3892_v20 = vpop.permute.xlu1 %3891 }
 0x287   : > { %v3890_v21 = vpop.permute.xlu0 %3889  ;;  %3957 = vst.msk [vmem:[#allocation2 + $0x7c] sm:$0xf] %vm3925_vm11, %v3892_v20 }
 0x288   : > { %3956 = vst.msk [vmem:[#allocation2 + $0x78] sm:$0xf] %vm3925_vm11, %v3890_v21 }
 0x28b   : > { %v6029_v22 = vld [vmem:[#allocation2 + $0x70] sm:$0xff]  }
 0x28c   : > { %5871 = vmatprep.mubr.msk.bf16.mxu1 %vm4090_vm12, %v6029_v22 }
 0x28f   : > { %v6030_v23 = vld [vmem:[#allocation2 + $0x78] sm:$0xff]  }
 0x290   : > { %5872 = vmatmul.mubr.msk.bf16.gmra.mxu1 %vm4090_vm12, %v6030_v23 }
 0x294   : > { %v5857_v24 = vpop.f32.mrf.mxu0 }
 0x295   : > { %v4516_v35 = vmul.f32 %v5857_v24, %v5857_v24 }
 0x296   : > { %v4225_v25 = vpop.f32.mrf.mxu0 }
 0x297   : > { %v4475_v26 = vadd.f32 %v4474_v12, %v4225_v25  ;;  %v4514_v27 = vmul.f32 %v4225_v25, %v4225_v25 }
 0x298   : > { %v5858_v28 = vpop.f32.mrf.mxu0 }
 0x299   : > { %v4545_v29 = vadd.f32 %v4544_v15, %v4514_v27  ;;  %v5761_v30 = vpack.c.bf16 %v5858_v28, %v5857_v24  ;;  %v4517_v38 = vmul.f32 %v5858_v28, %v5858_v28 }
 0x29a   : > { %v4228_v31 = vpop.f32.mrf.mxu0 }
 0x29b   : > { %5809 = vst [vmem:[%s7165_s14 + $0x38] sm:$0xff] %v5761_v30   ;;  %v5756_v32 = vpack.c.bf16 %v4228_v31, %v4225_v25  ;;  %v4476_v33 = vadd.f32 %v4475_v26, %v4228_v31  ;;  %v4515_v34 = vmul.f32 %v4228_v31, %v4228_v31 }
 0x29d   : > { %5808 = vst [vmem:[%s7165_s14 + $0x30] sm:$0xff] %v5756_v32   ;;  %v4477_v36 = vadd.f32 %v5857_v24, %v4476_v33  ;;  %v4546_v37 = vadd.f32 %v4545_v29, %v4515_v34 }
 0x29f   : > { %v4547_v39 = vadd.f32 %v4546_v37, %v4516_v35  ;;  %v4478_v40 = vadd.f32 %v5858_v28, %v4477_v36 }
 0x2a1   : > { %v4548_v41 = vadd.f32 %v4547_v39, %v4517_v38 }
 0x2c0   : > { %v5861_v42 = vpop.f32.mrf.mxu1 }
 0x2c1   : > { %v4520_v53 = vmul.f32 %v5861_v42, %v5861_v42 }
 0x2c2   : > { %v4241_v43 = vpop.f32.mrf.mxu1 }
 0x2c3   : > { %v4479_v44 = vadd.f32 %v4478_v40, %v4241_v43  ;;  %v4518_v45 = vmul.f32 %v4241_v43, %v4241_v43 }
 0x2c4   : > { %v5862_v46 = vpop.f32.mrf.mxu1 }
 0x2c5   : > { %v4549_v47 = vadd.f32 %v4548_v41, %v4518_v45  ;;  %v5771_v48 = vpack.c.bf16 %v5862_v46, %v5861_v42  ;;  %v4521_v56 = vmul.f32 %v5862_v46, %v5862_v46 }
 0x2c6   : > { %v4244_v49 = vpop.f32.mrf.mxu1 }
 0x2c7   : > { %5811 = vst [vmem:[%s7165_s14 + $0x48] sm:$0xff] %v5771_v48   ;;  %v5766_v50 = vpack.c.bf16 %v4244_v49, %v4241_v43  ;;  %v4480_v51 = vadd.f32 %v4479_v44, %v4244_v49  ;;  %v4519_v52 = vmul.f32 %v4244_v49, %v4244_v49 }
 0x2c9   : > { %5810 = vst [vmem:[%s7165_s14 + $0x40] sm:$0xff] %v5766_v50   ;;  %v4481_v54 = vadd.f32 %v5861_v42, %v4480_v51  ;;  %v4550_v55 = vadd.f32 %v4549_v47, %v4519_v52 }
 0x2cb   : > { %v4551_v57 = vadd.f32 %v4550_v55, %v4520_v53  ;;  %v4482_v58 = vadd.f32 %v5862_v46, %v4481_v54 }
 0x2cd   : > { %v4552_v59 = vadd.f32 %v4551_v57, %v4521_v56 }
 0x2f0   : > { %v5865_v60 = vpop.f32.mrf.mxu1 }
 0x2f1   : > { %v4524_v7 = vmul.f32 %v5865_v60, %v5865_v60 }
 0x2f2   : > { %v4257_v61 = vpop.f32.mrf.mxu1 }
 0x2f3   : > { %v4483_v62 = vadd.f32 %v4482_v58, %v4257_v61  ;;  %v4522_v63 = vmul.f32 %v4257_v61, %v4257_v61 }
 0x2f4   : > { %v5866_v0 = vpop.f32.mrf.mxu1 }
 0x2f5   : > { %v4553_v1 = vadd.f32 %v4552_v59, %v4522_v63  ;;  %v5781_v2 = vpack.c.bf16 %v5866_v0, %v5865_v60  ;;  %v4525_v10 = vmul.f32 %v5866_v0, %v5866_v0 }
 0x2f6   : > { %v4260_v3 = vpop.f32.mrf.mxu1 }
 0x2f7   : > { %5813 = vst [vmem:[%s7165_s14 + $0x58] sm:$0xff] %v5781_v2   ;;  %v5776_v4 = vpack.c.bf16 %v4260_v3, %v4257_v61  ;;  %v4484_v5 = vadd.f32 %v4483_v62, %v4260_v3  ;;  %v4523_v6 = vmul.f32 %v4260_v3, %v4260_v3 }
 0x2f9   : > { %5812 = vst [vmem:[%s7165_s14 + $0x50] sm:$0xff] %v5776_v4   ;;  %v4485_v8 = vadd.f32 %v5865_v60, %v4484_v5  ;;  %v4554_v9 = vadd.f32 %v4553_v1, %v4523_v6 }
 0x2fb   : > { %v4555_v11 = vadd.f32 %v4554_v9, %v4524_v7  ;;  %v4486_v12 = vadd.f32 %v5866_v0, %v4485_v8 }
 0x2fd   : > { %v4556_v13 = vadd.f32 %v4555_v11, %v4525_v10 }
 0x320   : > { %v5869_v14 = vpop.f32.mrf.mxu1 }
 0x321   : > { %v4528_v26 = vmul.f32 %v5869_v14, %v5869_v14 }
 0x322   : > { %v4273_v15 = vpop.f32.mrf.mxu1 }
 0x323   : > { %v4526_v20 = vmul.f32 %v4273_v15, %v4273_v15  ;;  %v4487_v21 = vadd.f32 %v4486_v12, %v4273_v15 }
 0x324   : > { %v5870_v16 = vpop.f32.mrf.mxu1 }
 0x325   : > { %v5791_v17 = vpack.c.bf16 %v5870_v16, %v5869_v14  ;;  %v4557_v23 = vadd.f32 %v4556_v13, %v4526_v20  ;;  %v4529_v31 = vmul.f32 %v5870_v16, %v5870_v16 }
 0x326   : > { %v4276_v18 = vpop.f32.mrf.mxu1 }
 0x327   : > { %5815 = vst [vmem:[%s7165_s14 + $0x68] sm:$0xff] %v5791_v17   ;;  %v5786_v19 = vpack.c.bf16 %v4276_v18, %v4273_v15  ;;  %v4527_v22 = vmul.f32 %v4276_v18, %v4276_v18  ;;  %v4488_v24 = vadd.f32 %v4487_v21, %v4276_v18 }
 0x329   : > { %5814 = vst [vmem:[%s7165_s14 + $0x60] sm:$0xff] %v5786_v19   ;;  %v4558_v25 = vadd.f32 %v4557_v23, %v4527_v22  ;;  %v4489_v27 = vadd.f32 %v5869_v14, %v4488_v24 }
 0x32b   : > { %v4559_v29 = vadd.f32 %v4558_v25, %v4528_v26  ;;  %v4490_v32 = vadd.f32 %v5870_v16, %v4489_v27 }
 0x32d   : > { %v4560_v36 = vadd.f32 %v4559_v29, %v4529_v31 }
 0x350   : > { %v5873_v28 = vpop.f32.mrf.mxu1 }
 0x351   : > { %v4532_v43 = vmul.f32 %v5873_v28, %v5873_v28 }
 0x352   : > { %v4289_v30 = vpop.f32.mrf.mxu1 }
 0x353   : > { %v4530_v33 = vmul.f32 %v4289_v30, %v4289_v30  ;;  %v4491_v35 = vadd.f32 %v4490_v32, %v4289_v30 }
 0x354   : > { %v5874_v34 = vpop.f32.mrf.mxu1 }
 0x355   : > { %v5801_v37 = vpack.c.bf16 %v5874_v34, %v5873_v28  ;;  %v4561_v39 = vadd.f32 %v4560_v36, %v4530_v33  ;;  %v4533_v46 = vmul.f32 %v5874_v34, %v5874_v34 }
 0x356   : > { %v4292_v38 = vpop.f32.mrf.mxu1 }
 0x357   : > { %5817 = vst [vmem:[%s7165_s14 + $0x78] sm:$0xff] %v5801_v37   ;;  %v5796_v40 = vpack.c.bf16 %v4292_v38, %v4289_v30  ;;  %v4492_v41 = vadd.f32 %v4491_v35, %v4292_v38  ;;  %v4531_v42 = vmul.f32 %v4292_v38, %v4292_v38 }
 0x359   : > { %5816 = vst [vmem:[%s7165_s14 + $0x70] sm:$0xff] %v5796_v40   ;;  %v4493_v44 = vadd.f32 %v5873_v28, %v4492_v41  ;;  %v4562_v45 = vadd.f32 %v4561_v39, %v4531_v42 }
 0x35b   : > { %v4494_v47 = vadd.f32 %v5874_v34, %v4493_v44  ;;  %v4563_v48 = vadd.f32 %v4562_v45, %v4532_v43 }
 0x35d   : > { %v4495_v49 = vrot.slane %v4494_v47, 4  ;;  %v4564_v50 = vadd.f32 %v4563_v48, %v4533_v46 }
 0x35f   : > { %v4496_v51 = vadd.f32 %v4495_v49, %v4494_v47  ;;  %v4565_v52 = vrot.slane %v4564_v50, 4 }
 0x361   : > { %v4497_v53 = vrot.slane %v4496_v51, 2  ;;  %v4566_v54 = vadd.f32 %v4565_v52, %v4564_v50 }
 0x363   : > { %v4498_v55 = vadd.f32 %v4497_v53, %v4496_v51  ;;  %v4567_v56 = vrot.slane %v4566_v54, 2 }
 0x365   : > { %v4499_v57 = vrot.slane %v4498_v55, 1  ;;  %v4568_v58 = vadd.f32 %v4567_v56, %v4566_v54 }
 0x367   : > { %v4500_v59 = vadd.f32 %v4499_v57, %v4498_v55  ;;  %v4569_v60 = vrot.slane %v4568_v58, 1 }
 0x369   : > { %4501 = vst [vmem:[%s247_s21] sm:$0x1] %v4500_v59  ;;  %v4570_v61 = vadd.f32 %v4569_v60, %v4568_v58 }
 0x36b   : > { %4571 = vst [vmem:[%s253_s24] sm:$0x1] %v4570_v61 }
 0x36c PF: > { %s15_s17 = sadd.s32 1, %s6053_s17   ;;  %s7263_s15 = smov %s6049_s16 }
 0x36d   : > { %p12_p5 = scmp.ge.s32.totalorder %s15_s17, 4   ;;  %s7264_s16 = smov %s7266_s18 }
 0x36f   :  { %14 = sbr.rel (!%p12_p5) target bundleno = 2 (0x2), region = 85 }

</bundles_post_ra>
